<compile_context>
chip_gen: v7x
topology: tpu7x:2x2x1
jax: 0.10.0
libtpu: 0.0.40
codegen_flags: <defaults>
</compile_context>

<pallas_src>
import math

import numpy as np
import jax
import jax.numpy as jnp
from jax.experimental import pallas as pl
from jax.experimental.pallas import tpu as pltpu

# ---------------- small config consistent with the module ----------------
IMG = 16          # img_size
PATCH = 4         # patch_size
IN_CH = 3         # in_channels
EMBED = 32        # embed_dim
LAYERS = 2        # num_layers
HEADS = 4         # num_heads
MLP = 64          # mlp_dim
NUM_CLASSES = 1
BATCH = 2

NUM_PATCHES = (IMG // PATCH) ** 2      # 16
SEQ = NUM_PATCHES + 1                  # 17 (cls + patches)
HEAD_DIM = EMBED // HEADS              # 8
CPP = IN_CH * PATCH * PATCH            # im2col width = 48
LN_EPS = 1e-5
INV_SCALE = 1.0 / math.sqrt(HEAD_DIM)

BBLK = BATCH                           # images folded per grid step (whole batch)
ROWS = BBLK * SEQ                      # 34 token rows per grid step
QPAD = ((ROWS + 7) // 8) * 8           # 40: sublane-aligned per-j-block stride
STACK = HEADS * QPAD                   # 160 rows of the (j, token) stacked layout
NEG = -1e30


# ---------------- in-kernel helpers (f32 / VPU+EUP) ----------------
def _layernorm(x, g, b):
    mu = jnp.mean(x, axis=-1, keepdims=True)
    d = x - mu
    var = jnp.mean(d * d, axis=-1, keepdims=True)
    return d * jax.lax.rsqrt(var + LN_EPS) * g + b


def _erf(x):
    # Abramowitz & Stegun 7.1.26 (|err| < 1.5e-7); reciprocal on the EUP.
    a1, a2, a3, a4, a5 = 0.254829592, -0.284496736, 1.421413741, -1.453152027, 1.061405429
    p = 0.3275911
    s = jnp.where(x >= 0.0, 1.0, -1.0)
    ax = jnp.abs(x)
    t = pl.reciprocal(1.0 + p * ax, approx=True)
    poly = ((((a5 * t + a4) * t + a3) * t + a2) * t + a1) * t
    return s * (1.0 - poly * jnp.exp(-ax * ax))


def _gelu_exact(x):
    # nn.GELU() default (erf-based).
    return 0.5 * x * (1.0 + _erf(x / math.sqrt(2.0)))


# ---------------- the single fused kernel ----------------
def qvit_kernel(p_ref, wp_ref, add_ref, repp_ref, hmask_ref, bias_ref,
                ln1_g_ref, ln1_b_ref, wqkv_ref, bqkv_ref, cw_ref, bo_ref,
                ln2_g_ref, ln2_b_ref, w1_ref, b1_ref, w2_ref, b2_ref,
                lnf_g_ref, lnf_b_ref, fcw_ref, fcb_ref,
                out_ref):
    f32 = jnp.float32
    bf16 = jnp.bfloat16

    repp = repp_ref[...]      # (STACK, ROWS) bf16 one-hot: token replication, j-major
    hmask = hmask_ref[...]    # (STACK, EMBED) f32 0/1: per-row head-column mask
    bias = bias_ref[...]      # (STACK, ROWS) f32: 0 / -1e30 batch block-diag mask

    # Patch embedding: one matmul over all rows (cls slot fed by a zero row of p,
    # add_ref already holds cls + pos and pos + conv-bias terms per row).
    x = jnp.dot(p_ref[...].astype(bf16), wp_ref[...],
                preferred_element_type=f32) + add_ref[...]            # (ROWS, E) f32
    # dropout: eval mode -> identity

    for l in range(LAYERS):
        # ---------------- self-attention block ----------------
        xn = _layernorm(x, ln1_g_ref[l], ln1_b_ref[l])
        qkv = jnp.dot(xn.astype(bf16), wqkv_ref[l],
                      preferred_element_type=f32) + bqkv_ref[l]       # (ROWS, 3E)
        q = qkv[:, :EMBED]                       # softmax scale folded into weights
        k = qkv[:, EMBED:2 * EMBED].astype(bf16)
        v = qkv[:, 2 * EMBED:].astype(bf16)

        # Replicate q into the j-major stacked layout and mask to each row's head
        # columns: one matmul + one VPU multiply (no per-head lane slicing).
        q_all = jnp.dot(repp, q.astype(bf16), preferred_element_type=f32) * hmask

        # All heads, all images: ONE scores matmul, contracting last dims (no k.T).
        scores = jax.lax.dot_general(
            q_all.astype(bf16), k,
            dimension_numbers=(((1,), (1,)), ((), ())),
            preferred_element_type=f32) + bias                        # (STACK, ROWS)
        m = jnp.max(scores, axis=-1, keepdims=True)
        e = jnp.exp(scores - m)
        att = e * pl.reciprocal(jnp.sum(e, axis=-1, keepdims=True), approx=True)

        # All heads' attention-weighted values in ONE matmul; drop the cross-head
        # columns with one VPU multiply.
        headout = jnp.dot(att.astype(bf16), v, preferred_element_type=f32) * hmask

        # fc_out fused with torch's reshape-without-head-transpose: block j of the
        # stack is a static sublane-aligned slice, CW_j = Wo rows [8j:8j+8] tiled
        # per head.  4 independent accumulating matmuls (MRB-friendly on v7x).
        cw_l = cw_ref[l]                                              # (4E, E) bf16
        attn = bo_ref[l]                                              # (1, E) broadcast
        for j in range(HEADS):
            blk = headout[j * QPAD:j * QPAD + ROWS, :].astype(bf16)   # (ROWS, E)
            attn = attn + jnp.dot(blk, cw_l[j * EMBED:(j + 1) * EMBED, :],
                                  preferred_element_type=f32)
        x = x + attn                                                  # residual 1

        # ---------------- MLP block ----------------  (dropouts identity)
        xn2 = _layernorm(x, ln2_g_ref[l], ln2_b_ref[l])
        h1 = jnp.dot(xn2.astype(bf16), w1_ref[l],
                     preferred_element_type=f32) + b1_ref[l]
        h1 = _gelu_exact(h1)
        x = x + jnp.dot(h1.astype(bf16), w2_ref[l],
                        preferred_element_type=f32) + b2_ref[l]       # residual 2

    # ---- final LayerNorm on cls rows + classifier head on the VPU/XLU ----
    for b in range(BBLK):
        cls_n = _layernorm(x[b * SEQ:b * SEQ + 1, :], lnf_g_ref[...], lnf_b_ref[...])
        out_ref[b:b + 1, :] = (jnp.sum(cls_n * fcw_ref[...], axis=-1, keepdims=True)
                               + fcb_ref[...])


# ---------------- pallas_call wrapper ----------------
WEIGHT_ORDER = ["wp", "add", "repp", "hmask", "bias",
                "ln1_g", "ln1_b", "wqkv_t", "bqkv", "cw", "bo",
                "ln2_g", "ln2_b", "w1_t", "b1", "w2_t", "b2",
                "lnf_g", "lnf_b", "fcw", "fcb"]


def _rep_spec(a):
    zero = (0,) * a.ndim
    return pl.BlockSpec(a.shape, lambda i, _z=zero: _z)


def qvit_fused(p_flat, pk):
    B = p_flat.shape[0] // SEQ
    weights = [pk[name] for name in WEIGHT_ORDER]
    in_specs = [pl.BlockSpec((ROWS, CPP), lambda i: (i, 0))]
    in_specs += [_rep_spec(w) for w in weights]
    return pl.pallas_call(
        qvit_kernel,
        out_shape=jax.ShapeDtypeStruct((B, NUM_CLASSES), jnp.float32),
        grid=(B // BBLK,),
        in_specs=in_specs,
        out_specs=pl.BlockSpec((BBLK, NUM_CLASSES), lambda i: (i, 0)),
        compiler_params=pltpu.CompilerParams(dimension_semantics=("parallel",)),
    )(p_flat, *weights)


# ---------------- parameter init (deterministic, synthetic) ----------------
def init_params(key):
    keys = iter(jax.random.split(key, 64))

    def nrm(shape, scale=0.02):
        return (scale * jax.random.normal(next(keys), shape)).astype(jnp.float32)

    params = {
        "conv_w": nrm((EMBED, IN_CH, PATCH, PATCH)),   # PyTorch Conv2d weight layout
        "conv_b": nrm((EMBED,)),
        "cls": jnp.zeros((1, 1, EMBED), jnp.float32),          # nn.Parameter(zeros)
        "pos": jnp.zeros((1, SEQ, EMBED), jnp.float32),        # nn.Parameter(zeros)
        "ln_g": jnp.ones((EMBED,), jnp.float32),
        "ln_b": jnp.zeros((EMBED,), jnp.float32),
        "fc_w": nrm((NUM_CLASSES, EMBED)),             # PyTorch Linear weight (out, in)
        "fc_b": nrm((NUM_CLASSES,)),
        "layers": [],
    }
    for _ in range(LAYERS):
        params["layers"].append(dict(
            ln1_g=jnp.ones((EMBED,), jnp.float32), ln1_b=jnp.zeros((EMBED,), jnp.float32),
            wqkv=nrm((3 * EMBED, EMBED)), bqkv=nrm((3 * EMBED,)),
            wo=nrm((EMBED, EMBED)), bo=nrm((EMBED,)),
            ln2_g=jnp.ones((EMBED,), jnp.float32), ln2_b=jnp.zeros((EMBED,), jnp.float32),
            w1=nrm((MLP, EMBED)), b1=nrm((MLP,)),
            w2=nrm((EMBED, MLP)), b2=nrm((EMBED,)),
        ))
    return params


def _perm_constants():
    """Constants realizing torch's (B,H,S,Dh)->(B,S,E) reshape-without-transpose
    on a j-major / token-minor stacked layout, plus per-head column masks and the
    cross-image attention bias for the batch-folded rows."""
    repp = np.zeros((STACK, ROWS), np.float32)     # one-hot token replication
    hmask = np.zeros((STACK, EMBED), np.float32)   # head-column 0/1 mask
    bias = np.zeros((STACK, ROWS), np.float32)     # 0 / -1e30 block-diag batch mask
    for j in range(HEADS):
        for b in range(BBLK):
            for s_out in range(SEQ):
                q_row = b * SEQ + s_out
                p_idx = j * QPAD + q_row
                m = HEADS * s_out + j              # flat cell index of the torch reshape
                h_src, s_src = divmod(m, SEQ)
                repp[p_idx, b * SEQ + s_src] = 1.0
                hmask[p_idx, h_src * HEAD_DIM:(h_src + 1) * HEAD_DIM] = 1.0
                bias[p_idx, :] = NEG
                bias[p_idx, b * SEQ:(b + 1) * SEQ] = 0.0
    return jnp.asarray(repp), jnp.asarray(hmask), jnp.asarray(bias)


def pack_params(params):
    """One-time repack: pre-transpose weights (bf16 for MXU operands), fold the
    softmax scale into q, fold cls/pos/conv-bias into one additive term, and build
    the permutation / mask constants."""
    L = params["layers"]
    bf16 = jnp.bfloat16
    stack_f = lambda key: jnp.stack([lyr[key] for lyr in L])

    add_one = jnp.concatenate(
        [params["cls"][0] + params["pos"][0, 0:1],                    # row 0: cls + pos[0]
         params["pos"][0, 1:] + params["conv_b"][None, :]], axis=0)   # rows 1..: pos + conv bias

    repp, hmask, bias = _perm_constants()

    wqkv_t, bqkv_s, cw = [], [], []
    for lyr in L:
        wt = lyr["wqkv"].T                                   # (E, 3E)
        wt = wt.at[:, :EMBED].multiply(INV_SCALE)            # fold softmax scale into q
        bq = lyr["bqkv"].at[:EMBED].multiply(INV_SCALE)
        wqkv_t.append(wt)
        bqkv_s.append(bq)
        wo_t = lyr["wo"].T                                   # (E_in, E_out)
        cw.append(jnp.concatenate(
            [jnp.tile(wo_t[HEAD_DIM * j:HEAD_DIM * (j + 1), :], (HEADS, 1))
             for j in range(HEADS)], axis=0))                # (4E, E)

    return {
        "wp": params["conv_w"].reshape(EMBED, CPP).T.astype(bf16),    # (CPP, E)
        "add": jnp.tile(add_one, (BBLK, 1)),                          # (ROWS, E) f32
        "repp": repp.astype(bf16),                                    # (STACK, ROWS)
        "hmask": hmask,                                               # (STACK, E) f32
        "bias": bias,                                                 # (STACK, ROWS) f32
        "ln1_g": stack_f("ln1_g")[:, None, :], "ln1_b": stack_f("ln1_b")[:, None, :],
        "wqkv_t": jnp.stack(wqkv_t).astype(bf16),                     # (L, E, 3E)
        "bqkv": jnp.stack(bqkv_s)[:, None, :],                        # (L, 1, 3E) f32
        "cw": jnp.stack(cw).astype(bf16),                             # (L, 4E, E)
        "bo": stack_f("bo")[:, None, :],
        "ln2_g": stack_f("ln2_g")[:, None, :], "ln2_b": stack_f("ln2_b")[:, None, :],
        "w1_t": jnp.stack([l_["w1"].T for l_ in L]).astype(bf16),     # (L, E, MLP)
        "b1": stack_f("b1")[:, None, :],
        "w2_t": jnp.stack([l_["w2"].T for l_ in L]).astype(bf16),     # (L, MLP, E)
        "b2": stack_f("b2")[:, None, :],
        "lnf_g": params["ln_g"][None, :], "lnf_b": params["ln_b"][None, :],
        "fcw": params["fc_w"],                                        # (1, E) f32 (VPU head)
        "fcb": params["fc_b"][None, :],                               # (1, 1) f32
    }


# ---------------- full forward ----------------
@jax.jit
def qvit_forward(x_nchw, packed):
    B = x_nchw.shape[0]
    # im2col for the stride-PATCH conv (glue) plus an exactly-zero leading row per
    # image so the fused kernel's single patch-embed matmul also covers the cls slot.
    p = x_nchw.reshape(B, IN_CH, IMG // PATCH, PATCH, IMG // PATCH, PATCH)
    p = p.transpose(0, 2, 4, 1, 3, 5).reshape(B, NUM_PATCHES, CPP)
    p = jnp.concatenate([jnp.zeros((B, 1, CPP), jnp.float32), p], axis=1)
    p = p.reshape(B * SEQ, CPP)                                      # (B*SEQ, CPP)

    logits = qvit_fused(p, packed)                                   # (B, NUM_CLASSES)

    # Hybrid quantum layer: H|0>, RY(theta) -> <Z> = -sin(theta) (analytic,
    # deterministic stand-in for the 100-shot PennyLane circuit), then sigmoid.
    # TODO(synk): shot noise of the sampled expectation is not modeled.
    return 1.0 / (1.0 + jnp.exp(jnp.sin(logits)))                    # sigmoid(-sin(logits))


# ---------------- main ----------------
if __name__ == "__main__":
    root = jax.random.PRNGKey(0)
    k_x, k_p = jax.random.split(root)
    x = jax.random.normal(k_x, (BATCH, IN_CH, IMG, IMG), dtype=jnp.float32)
    packed = pack_params(init_params(k_p))

    out = jax.block_until_ready(qvit_forward(x, packed))
    assert out.shape == (BATCH, NUM_CLASSES)
    assert bool(jnp.all(jnp.isfinite(out)))
    print("KERNEL_OK")
</pallas_src>

<mosaic_0001>
module attributes {stable_mosaic.version = 11 : i64} {
  func.func @qvit_kernel(%arg0: i32, %arg1: memref<34x48xf32, #tpu.memory_space<vmem>>, %arg2: memref<48x32xbf16, #tpu.memory_space<vmem>>, %arg3: memref<34x32xf32, #tpu.memory_space<vmem>>, %arg4: memref<160x34xbf16, #tpu.memory_space<vmem>>, %arg5: memref<160x32xf32, #tpu.memory_space<vmem>>, %arg6: memref<160x34xf32, #tpu.memory_space<vmem>>, %arg7: memref<2x1x32xf32, #tpu.memory_space<vmem>>, %arg8: memref<2x1x32xf32, #tpu.memory_space<vmem>>, %arg9: memref<2x32x96xbf16, #tpu.memory_space<vmem>>, %arg10: memref<2x1x96xf32, #tpu.memory_space<vmem>>, %arg11: memref<2x128x32xbf16, #tpu.memory_space<vmem>>, %arg12: memref<2x1x32xf32, #tpu.memory_space<vmem>>, %arg13: memref<2x1x32xf32, #tpu.memory_space<vmem>>, %arg14: memref<2x1x32xf32, #tpu.memory_space<vmem>>, %arg15: memref<2x32x64xbf16, #tpu.memory_space<vmem>>, %arg16: memref<2x1x64xf32, #tpu.memory_space<vmem>>, %arg17: memref<2x64x32xbf16, #tpu.memory_space<vmem>>, %arg18: memref<2x1x32xf32, #tpu.memory_space<vmem>>, %arg19: memref<1x32xf32, #tpu.memory_space<vmem>>, %arg20: memref<1x32xf32, #tpu.memory_space<vmem>>, %arg21: memref<1x32xf32, #tpu.memory_space<vmem>>, %arg22: memref<1x1xf32, #tpu.memory_space<vmem>>, %arg23: memref<2x1xf32, #tpu.memory_space<vmem>>) attributes {dimension_semantics = [#tpu.dimension_semantics<parallel>], iteration_bounds = array<i64: 1>, scalar_prefetch = 0 : i64, scratch_operands = 0 : i64, tpu.core_type = #tpu.core_type<tc>, window_params = [{transform_indices = @transform_0, window_bounds = array<i64: 34, 48>}, {pipeline_mode = #tpu.pipeline_mode<synchronous>, transform_indices = @transform_1, window_bounds = array<i64: 48, 32>}, {pipeline_mode = #tpu.pipeline_mode<synchronous>, transform_indices = @transform_2, window_bounds = array<i64: 34, 32>}, {pipeline_mode = #tpu.pipeline_mode<synchronous>, transform_indices = @transform_3, window_bounds = array<i64: 160, 34>}, {pipeline_mode = #tpu.pipeline_mode<synchronous>, transform_indices = @transform_4, window_bounds = array<i64: 160, 32>}, {pipeline_mode = #tpu.pipeline_mode<synchronous>, transform_indices = @transform_5, window_bounds = array<i64: 160, 34>}, {pipeline_mode = #tpu.pipeline_mode<synchronous>, transform_indices = @transform_6, window_bounds = array<i64: 2, 1, 32>}, {pipeline_mode = #tpu.pipeline_mode<synchronous>, transform_indices = @transform_7, window_bounds = array<i64: 2, 1, 32>}, {pipeline_mode = #tpu.pipeline_mode<synchronous>, transform_indices = @transform_8, window_bounds = array<i64: 2, 32, 96>}, {pipeline_mode = #tpu.pipeline_mode<synchronous>, transform_indices = @transform_9, window_bounds = array<i64: 2, 1, 96>}, {pipeline_mode = #tpu.pipeline_mode<synchronous>, transform_indices = @transform_10, window_bounds = array<i64: 2, 128, 32>}, {pipeline_mode = #tpu.pipeline_mode<synchronous>, transform_indices = @transform_11, window_bounds = array<i64: 2, 1, 32>}, {pipeline_mode = #tpu.pipeline_mode<synchronous>, transform_indices = @transform_12, window_bounds = array<i64: 2, 1, 32>}, {pipeline_mode = #tpu.pipeline_mode<synchronous>, transform_indices = @transform_13, window_bounds = array<i64: 2, 1, 32>}, {pipeline_mode = #tpu.pipeline_mode<synchronous>, transform_indices = @transform_14, window_bounds = array<i64: 2, 32, 64>}, {pipeline_mode = #tpu.pipeline_mode<synchronous>, transform_indices = @transform_15, window_bounds = array<i64: 2, 1, 64>}, {pipeline_mode = #tpu.pipeline_mode<synchronous>, transform_indices = @transform_16, window_bounds = array<i64: 2, 64, 32>}, {pipeline_mode = #tpu.pipeline_mode<synchronous>, transform_indices = @transform_17, window_bounds = array<i64: 2, 1, 32>}, {pipeline_mode = #tpu.pipeline_mode<synchronous>, transform_indices = @transform_18, window_bounds = array<i64: 1, 32>}, {pipeline_mode = #tpu.pipeline_mode<synchronous>, transform_indices = @transform_19, window_bounds = array<i64: 1, 32>}, {pipeline_mode = #tpu.pipeline_mode<synchronous>, transform_indices = @transform_20, window_bounds = array<i64: 1, 32>}, {pipeline_mode = #tpu.pipeline_mode<synchronous>, transform_indices = @transform_21, window_bounds = array<i64: 1, 1>}, {transform_indices = @transform_22, window_bounds = array<i64: 2, 1>}]} {
    %c0 = arith.constant 0 : index
    %c0_0 = arith.constant 0 : index
    %0 = vector.load %arg4[%c0, %c0_0] : memref<160x34xbf16, #tpu.memory_space<vmem>>, vector<160x34xbf16>
    %c0_1 = arith.constant 0 : index
    %c0_2 = arith.constant 0 : index
    %1 = vector.load %arg5[%c0_1, %c0_2] : memref<160x32xf32, #tpu.memory_space<vmem>>, vector<160x32xf32>
    %c0_3 = arith.constant 0 : index
    %c0_4 = arith.constant 0 : index
    %2 = vector.load %arg6[%c0_3, %c0_4] : memref<160x34xf32, #tpu.memory_space<vmem>>, vector<160x34xf32>
    %c0_5 = arith.constant 0 : index
    %c0_6 = arith.constant 0 : index
    %3 = vector.load %arg1[%c0_5, %c0_6] : memref<34x48xf32, #tpu.memory_space<vmem>>, vector<34x48xf32>
    %4 = arith.truncf %3 : vector<34x48xf32> to vector<34x48xbf16>
    %c0_7 = arith.constant 0 : index
    %c0_8 = arith.constant 0 : index
    %5 = vector.load %arg2[%c0_7, %c0_8] : memref<48x32xbf16, #tpu.memory_space<vmem>>, vector<48x32xbf16>
    %cst = arith.constant dense<0.000000e+00> : vector<34x32xf32>
    %6 = tpu.matmul %4, %5, %cst {dimension_numbers = #tpu.dot_dimension_numbers<[1], [0], [0], [1], [0, 0, 1, 1], [], []>} : vector<34x48xbf16>, vector<48x32xbf16>, vector<34x32xf32> -> vector<34x32xf32>
    %c0_9 = arith.constant 0 : index
    %c0_10 = arith.constant 0 : index
    %7 = vector.load %arg3[%c0_9, %c0_10] : memref<34x32xf32, #tpu.memory_space<vmem>>, vector<34x32xf32>
    %8 = arith.addf %6, %7 : vector<34x32xf32>
    %c0_11 = arith.constant 0 : index
    %c0_12 = arith.constant 0 : index
    %c0_13 = arith.constant 0 : index
    %9 = vector.load %arg7[%c0_11, %c0_12, %c0_13] : memref<2x1x32xf32, #tpu.memory_space<vmem>>, vector<1x1x32xf32>
    %10 = vector.shape_cast %9 : vector<1x1x32xf32> to vector<1x32xf32>
    %c0_14 = arith.constant 0 : index
    %c0_15 = arith.constant 0 : index
    %c0_16 = arith.constant 0 : index
    %11 = vector.load %arg8[%c0_14, %c0_15, %c0_16] : memref<2x1x32xf32, #tpu.memory_space<vmem>>, vector<1x1x32xf32>
    %12 = vector.shape_cast %11 : vector<1x1x32xf32> to vector<1x32xf32>
    %cst_17 = arith.constant dense<0.000000e+00> : vector<34xf32>
    %13 = vector.multi_reduction <add>, %8, %cst_17 [1] : vector<34x32xf32> to vector<34xf32>
    %14 = vector.shape_cast %13 : vector<34xf32> to vector<34x1xf32>
    %cst_18 = arith.constant 3.200000e+01 : f32
    %15 = vector.broadcast %cst_18 : f32 to vector<34x1xf32>
    %16 = arith.divf %14, %15 : vector<34x1xf32>
    %17 = vector.broadcast %16 : vector<34x1xf32> to vector<34x32xf32>
    %18 = arith.subf %8, %17 : vector<34x32xf32>
    %19 = arith.mulf %18, %18 : vector<34x32xf32>
    %cst_19 = arith.constant dense<0.000000e+00> : vector<34xf32>
    %20 = vector.multi_reduction <add>, %19, %cst_19 [1] : vector<34x32xf32> to vector<34xf32>
    %21 = vector.shape_cast %20 : vector<34xf32> to vector<34x1xf32>
    %cst_20 = arith.constant 3.200000e+01 : f32
    %22 = vector.broadcast %cst_20 : f32 to vector<34x1xf32>
    %23 = arith.divf %21, %22 : vector<34x1xf32>
    %cst_21 = arith.constant 9.99999974E-6 : f32
    %24 = vector.broadcast %cst_21 : f32 to vector<34x1xf32>
    %25 = arith.addf %23, %24 : vector<34x1xf32>
    %26 = math.rsqrt %25 : vector<34x1xf32>
    %27 = vector.broadcast %26 : vector<34x1xf32> to vector<34x32xf32>
    %28 = arith.mulf %18, %27 : vector<34x32xf32>
    %29 = vector.broadcast %10 : vector<1x32xf32> to vector<34x32xf32>
    %30 = arith.mulf %28, %29 : vector<34x32xf32>
    %31 = vector.broadcast %12 : vector<1x32xf32> to vector<34x32xf32>
    %32 = arith.addf %30, %31 : vector<34x32xf32>
    %33 = arith.truncf %32 : vector<34x32xf32> to vector<34x32xbf16>
    %c0_22 = arith.constant 0 : index
    %c0_23 = arith.constant 0 : index
    %c0_24 = arith.constant 0 : index
    %34 = vector.load %arg9[%c0_22, %c0_23, %c0_24] : memref<2x32x96xbf16, #tpu.memory_space<vmem>>, vector<1x32x96xbf16>
    %35 = vector.shape_cast %34 : vector<1x32x96xbf16> to vector<32x96xbf16>
    %cst_25 = arith.constant dense<0.000000e+00> : vector<34x96xf32>
    %36 = tpu.matmul %33, %35, %cst_25 {dimension_numbers = #tpu.dot_dimension_numbers<[1], [0], [0], [1], [0, 0, 1, 1], [], []>} : vector<34x32xbf16>, vector<32x96xbf16>, vector<34x96xf32> -> vector<34x96xf32>
    %c0_26 = arith.constant 0 : index
    %c0_27 = arith.constant 0 : index
    %c0_28 = arith.constant 0 : index
    %37 = vector.load %arg10[%c0_26, %c0_27, %c0_28] : memref<2x1x96xf32, #tpu.memory_space<vmem>>, vector<1x1x96xf32>
    %38 = vector.shape_cast %37 : vector<1x1x96xf32> to vector<1x96xf32>
    %39 = vector.broadcast %38 : vector<1x96xf32> to vector<34x96xf32>
    %40 = arith.addf %36, %39 : vector<34x96xf32>
    %41 = vector.extract_strided_slice %40 {offsets = [0, 0], sizes = [34, 32], strides = [1, 1]} : vector<34x96xf32> to vector<34x32xf32>
    %42 = vector.extract_strided_slice %40 {offsets = [0, 32], sizes = [34, 32], strides = [1, 1]} : vector<34x96xf32> to vector<34x32xf32>
    %43 = arith.truncf %42 : vector<34x32xf32> to vector<34x32xbf16>
    %44 = vector.extract_strided_slice %40 {offsets = [0, 64], sizes = [34, 32], strides = [1, 1]} : vector<34x96xf32> to vector<34x32xf32>
    %45 = arith.truncf %44 : vector<34x32xf32> to vector<34x32xbf16>
    %46 = arith.truncf %41 : vector<34x32xf32> to vector<34x32xbf16>
    %cst_29 = arith.constant dense<0.000000e+00> : vector<160x32xf32>
    %47 = tpu.matmul %0, %46, %cst_29 {dimension_numbers = #tpu.dot_dimension_numbers<[1], [0], [0], [1], [0, 0, 1, 1], [], []>} : vector<160x34xbf16>, vector<34x32xbf16>, vector<160x32xf32> -> vector<160x32xf32>
    %48 = arith.mulf %47, %1 : vector<160x32xf32>
    %49 = arith.truncf %48 : vector<160x32xf32> to vector<160x32xbf16>
    %cst_30 = arith.constant dense<0.000000e+00> : vector<160x34xf32>
    %50 = tpu.matmul %49, %43, %cst_30 {dimension_numbers = #tpu.dot_dimension_numbers<[1], [1], [0], [0], [0, 0, 1, 0], [], []>} : vector<160x32xbf16>, vector<34x32xbf16>, vector<160x34xf32> -> vector<160x34xf32>
    %51 = arith.addf %50, %2 : vector<160x34xf32>
    %cst_31 = arith.constant dense<0xFF800000> : vector<160xf32>
    %52 = vector.multi_reduction <maximumf>, %51, %cst_31 [1] : vector<160x34xf32> to vector<160xf32>
    %53 = vector.shape_cast %52 : vector<160xf32> to vector<160x1xf32>
    %54 = vector.broadcast %53 : vector<160x1xf32> to vector<160x34xf32>
    %55 = arith.subf %51, %54 : vector<160x34xf32>
    %56 = math.exp %55 : vector<160x34xf32>
    %cst_32 = arith.constant dense<0.000000e+00> : vector<160xf32>
    %57 = vector.multi_reduction <add>, %56, %cst_32 [1] : vector<160x34xf32> to vector<160xf32>
    %58 = vector.shape_cast %57 : vector<160xf32> to vector<160x1xf32>
    %59 = tpu.reciprocal %58 {approx = true} : vector<160x1xf32> -> vector<160x1xf32>
    %60 = vector.broadcast %59 : vector<160x1xf32> to vector<160x34xf32>
    %61 = arith.mulf %56, %60 : vector<160x34xf32>
    %62 = arith.truncf %61 : vector<160x34xf32> to vector<160x34xbf16>
    %cst_33 = arith.constant dense<0.000000e+00> : vector<160x32xf32>
    %63 = tpu.matmul %62, %45, %cst_33 {dimension_numbers = #tpu.dot_dimension_numbers<[1], [0], [0], [1], [0, 0, 1, 1], [], []>} : vector<160x34xbf16>, vector<34x32xbf16>, vector<160x32xf32> -> vector<160x32xf32>
    %64 = arith.mulf %63, %1 : vector<160x32xf32>
    %c0_34 = arith.constant 0 : index
    %c0_35 = arith.constant 0 : index
    %c0_36 = arith.constant 0 : index
    %65 = vector.load %arg11[%c0_34, %c0_35, %c0_36] : memref<2x128x32xbf16, #tpu.memory_space<vmem>>, vector<1x128x32xbf16>
    %66 = vector.shape_cast %65 : vector<1x128x32xbf16> to vector<128x32xbf16>
    %c0_37 = arith.constant 0 : index
    %c0_38 = arith.constant 0 : index
    %c0_39 = arith.constant 0 : index
    %67 = vector.load %arg12[%c0_37, %c0_38, %c0_39] : memref<2x1x32xf32, #tpu.memory_space<vmem>>, vector<1x1x32xf32>
    %68 = vector.shape_cast %67 : vector<1x1x32xf32> to vector<1x32xf32>
    %69 = vector.extract_strided_slice %64 {offsets = [0, 0], sizes = [34, 32], strides = [1, 1]} : vector<160x32xf32> to vector<34x32xf32>
    %70 = arith.truncf %69 : vector<34x32xf32> to vector<34x32xbf16>
    %71 = vector.extract_strided_slice %66 {offsets = [0, 0], sizes = [32, 32], strides = [1, 1]} : vector<128x32xbf16> to vector<32x32xbf16>
    %cst_40 = arith.constant dense<0.000000e+00> : vector<34x32xf32>
    %72 = tpu.matmul %70, %71, %cst_40 {dimension_numbers = #tpu.dot_dimension_numbers<[1], [0], [0], [1], [0, 0, 1, 1], [], []>} : vector<34x32xbf16>, vector<32x32xbf16>, vector<34x32xf32> -> vector<34x32xf32>
    %73 = vector.broadcast %68 : vector<1x32xf32> to vector<34x32xf32>
    %74 = arith.addf %73, %72 : vector<34x32xf32>
    %75 = vector.extract_strided_slice %64 {offsets = [40, 0], sizes = [34, 32], strides = [1, 1]} : vector<160x32xf32> to vector<34x32xf32>
    %76 = arith.truncf %75 : vector<34x32xf32> to vector<34x32xbf16>
    %77 = vector.extract_strided_slice %66 {offsets = [32, 0], sizes = [32, 32], strides = [1, 1]} : vector<128x32xbf16> to vector<32x32xbf16>
    %cst_41 = arith.constant dense<0.000000e+00> : vector<34x32xf32>
    %78 = tpu.matmul %76, %77, %cst_41 {dimension_numbers = #tpu.dot_dimension_numbers<[1], [0], [0], [1], [0, 0, 1, 1], [], []>} : vector<34x32xbf16>, vector<32x32xbf16>, vector<34x32xf32> -> vector<34x32xf32>
    %79 = arith.addf %74, %78 : vector<34x32xf32>
    %80 = vector.extract_strided_slice %64 {offsets = [80, 0], sizes = [34, 32], strides = [1, 1]} : vector<160x32xf32> to vector<34x32xf32>
    %81 = arith.truncf %80 : vector<34x32xf32> to vector<34x32xbf16>
    %82 = vector.extract_strided_slice %66 {offsets = [64, 0], sizes = [32, 32], strides = [1, 1]} : vector<128x32xbf16> to vector<32x32xbf16>
    %cst_42 = arith.constant dense<0.000000e+00> : vector<34x32xf32>
    %83 = tpu.matmul %81, %82, %cst_42 {dimension_numbers = #tpu.dot_dimension_numbers<[1], [0], [0], [1], [0, 0, 1, 1], [], []>} : vector<34x32xbf16>, vector<32x32xbf16>, vector<34x32xf32> -> vector<34x32xf32>
    %84 = arith.addf %79, %83 : vector<34x32xf32>
    %85 = vector.extract_strided_slice %64 {offsets = [120, 0], sizes = [34, 32], strides = [1, 1]} : vector<160x32xf32> to vector<34x32xf32>
    %86 = arith.truncf %85 : vector<34x32xf32> to vector<34x32xbf16>
    %87 = vector.extract_strided_slice %66 {offsets = [96, 0], sizes = [32, 32], strides = [1, 1]} : vector<128x32xbf16> to vector<32x32xbf16>
    %cst_43 = arith.constant dense<0.000000e+00> : vector<34x32xf32>
    %88 = tpu.matmul %86, %87, %cst_43 {dimension_numbers = #tpu.dot_dimension_numbers<[1], [0], [0], [1], [0, 0, 1, 1], [], []>} : vector<34x32xbf16>, vector<32x32xbf16>, vector<34x32xf32> -> vector<34x32xf32>
    %89 = arith.addf %84, %88 : vector<34x32xf32>
    %90 = arith.addf %8, %89 : vector<34x32xf32>
    %c0_44 = arith.constant 0 : index
    %c0_45 = arith.constant 0 : index
    %c0_46 = arith.constant 0 : index
    %91 = vector.load %arg13[%c0_44, %c0_45, %c0_46] : memref<2x1x32xf32, #tpu.memory_space<vmem>>, vector<1x1x32xf32>
    %92 = vector.shape_cast %91 : vector<1x1x32xf32> to vector<1x32xf32>
    %c0_47 = arith.constant 0 : index
    %c0_48 = arith.constant 0 : index
    %c0_49 = arith.constant 0 : index
    %93 = vector.load %arg14[%c0_47, %c0_48, %c0_49] : memref<2x1x32xf32, #tpu.memory_space<vmem>>, vector<1x1x32xf32>
    %94 = vector.shape_cast %93 : vector<1x1x32xf32> to vector<1x32xf32>
    %cst_50 = arith.constant dense<0.000000e+00> : vector<34xf32>
    %95 = vector.multi_reduction <add>, %90, %cst_50 [1] : vector<34x32xf32> to vector<34xf32>
    %96 = vector.shape_cast %95 : vector<34xf32> to vector<34x1xf32>
    %cst_51 = arith.constant 3.200000e+01 : f32
    %97 = vector.broadcast %cst_51 : f32 to vector<34x1xf32>
    %98 = arith.divf %96, %97 : vector<34x1xf32>
    %99 = vector.broadcast %98 : vector<34x1xf32> to vector<34x32xf32>
    %100 = arith.subf %90, %99 : vector<34x32xf32>
    %101 = arith.mulf %100, %100 : vector<34x32xf32>
    %cst_52 = arith.constant dense<0.000000e+00> : vector<34xf32>
    %102 = vector.multi_reduction <add>, %101, %cst_52 [1] : vector<34x32xf32> to vector<34xf32>
    %103 = vector.shape_cast %102 : vector<34xf32> to vector<34x1xf32>
    %cst_53 = arith.constant 3.200000e+01 : f32
    %104 = vector.broadcast %cst_53 : f32 to vector<34x1xf32>
    %105 = arith.divf %103, %104 : vector<34x1xf32>
    %cst_54 = arith.constant 9.99999974E-6 : f32
    %106 = vector.broadcast %cst_54 : f32 to vector<34x1xf32>
    %107 = arith.addf %105, %106 : vector<34x1xf32>
    %108 = math.rsqrt %107 : vector<34x1xf32>
    %109 = vector.broadcast %108 : vector<34x1xf32> to vector<34x32xf32>
    %110 = arith.mulf %100, %109 : vector<34x32xf32>
    %111 = vector.broadcast %92 : vector<1x32xf32> to vector<34x32xf32>
    %112 = arith.mulf %110, %111 : vector<34x32xf32>
    %113 = vector.broadcast %94 : vector<1x32xf32> to vector<34x32xf32>
    %114 = arith.addf %112, %113 : vector<34x32xf32>
    %115 = arith.truncf %114 : vector<34x32xf32> to vector<34x32xbf16>
    %c0_55 = arith.constant 0 : index
    %c0_56 = arith.constant 0 : index
    %c0_57 = arith.constant 0 : index
    %116 = vector.load %arg15[%c0_55, %c0_56, %c0_57] : memref<2x32x64xbf16, #tpu.memory_space<vmem>>, vector<1x32x64xbf16>
    %117 = vector.shape_cast %116 : vector<1x32x64xbf16> to vector<32x64xbf16>
    %cst_58 = arith.constant dense<0.000000e+00> : vector<34x64xf32>
    %118 = tpu.matmul %115, %117, %cst_58 {dimension_numbers = #tpu.dot_dimension_numbers<[1], [0], [0], [1], [0, 0, 1, 1], [], []>} : vector<34x32xbf16>, vector<32x64xbf16>, vector<34x64xf32> -> vector<34x64xf32>
    %c0_59 = arith.constant 0 : index
    %c0_60 = arith.constant 0 : index
    %c0_61 = arith.constant 0 : index
    %119 = vector.load %arg16[%c0_59, %c0_60, %c0_61] : memref<2x1x64xf32, #tpu.memory_space<vmem>>, vector<1x1x64xf32>
    %120 = vector.shape_cast %119 : vector<1x1x64xf32> to vector<1x64xf32>
    %121 = vector.broadcast %120 : vector<1x64xf32> to vector<34x64xf32>
    %122 = arith.addf %118, %121 : vector<34x64xf32>
    %cst_62 = arith.constant 5.000000e-01 : f32
    %123 = vector.broadcast %cst_62 : f32 to vector<34x64xf32>
    %124 = arith.mulf %123, %122 : vector<34x64xf32>
    %cst_63 = arith.constant 1.41421354 : f32
    %125 = vector.broadcast %cst_63 : f32 to vector<34x64xf32>
    %126 = arith.divf %122, %125 : vector<34x64xf32>
    %cst_64 = arith.constant 0.000000e+00 : f32
    %127 = vector.broadcast %cst_64 : f32 to vector<34x64xf32>
    %128 = arith.cmpf oge, %126, %127 : vector<34x64xf32>
    %cst_65 = arith.constant 1.000000e+00 : f32
    %cst_66 = arith.constant -1.000000e+00 : f32
    %129 = vector.broadcast %cst_65 : f32 to vector<34x64xf32>
    %130 = vector.broadcast %cst_66 : f32 to vector<34x64xf32>
    %131 = arith.select %128, %129, %130 : vector<34x64xi1>, vector<34x64xf32>
    %132 = math.absf %126 : vector<34x64xf32>
    %cst_67 = arith.constant 0.327591091 : f32
    %133 = vector.broadcast %cst_67 : f32 to vector<34x64xf32>
    %134 = arith.mulf %133, %132 : vector<34x64xf32>
    %cst_68 = arith.constant 1.000000e+00 : f32
    %135 = vector.broadcast %cst_68 : f32 to vector<34x64xf32>
    %136 = arith.addf %135, %134 : vector<34x64xf32>
    %137 = tpu.reciprocal %136 {approx = true} : vector<34x64xf32> -> vector<34x64xf32>
    %cst_69 = arith.constant 1.06140542 : f32
    %138 = vector.broadcast %cst_69 : f32 to vector<34x64xf32>
    %139 = arith.mulf %138, %137 : vector<34x64xf32>
    %cst_70 = arith.constant -1.45315206 : f32
    %140 = vector.broadcast %cst_70 : f32 to vector<34x64xf32>
    %141 = arith.addf %139, %140 : vector<34x64xf32>
    %142 = arith.mulf %141, %137 : vector<34x64xf32>
    %cst_71 = arith.constant 1.42141378 : f32
    %143 = vector.broadcast %cst_71 : f32 to vector<34x64xf32>
    %144 = arith.addf %142, %143 : vector<34x64xf32>
    %145 = arith.mulf %144, %137 : vector<34x64xf32>
    %cst_72 = arith.constant -0.284496725 : f32
    %146 = vector.broadcast %cst_72 : f32 to vector<34x64xf32>
    %147 = arith.addf %145, %146 : vector<34x64xf32>
    %148 = arith.mulf %147, %137 : vector<34x64xf32>
    %cst_73 = arith.constant 0.254829586 : f32
    %149 = vector.broadcast %cst_73 : f32 to vector<34x64xf32>
    %150 = arith.addf %148, %149 : vector<34x64xf32>
    %151 = arith.mulf %150, %137 : vector<34x64xf32>
    %cst_74 = arith.constant 0.000000e+00 : f32
    %152 = vector.broadcast %cst_74 : f32 to vector<34x64xf32>
    %153 = arith.subf %152, %132 : vector<34x64xf32>
    %154 = arith.mulf %153, %132 : vector<34x64xf32>
    %155 = math.exp %154 : vector<34x64xf32>
    %156 = arith.mulf %151, %155 : vector<34x64xf32>
    %cst_75 = arith.constant 1.000000e+00 : f32
    %157 = vector.broadcast %cst_75 : f32 to vector<34x64xf32>
    %158 = arith.subf %157, %156 : vector<34x64xf32>
    %159 = arith.mulf %131, %158 : vector<34x64xf32>
    %cst_76 = arith.constant 1.000000e+00 : f32
    %160 = vector.broadcast %cst_76 : f32 to vector<34x64xf32>
    %161 = arith.addf %160, %159 : vector<34x64xf32>
    %162 = arith.mulf %124, %161 : vector<34x64xf32>
    %163 = arith.truncf %162 : vector<34x64xf32> to vector<34x64xbf16>
    %c0_77 = arith.constant 0 : index
    %c0_78 = arith.constant 0 : index
    %c0_79 = arith.constant 0 : index
    %164 = vector.load %arg17[%c0_77, %c0_78, %c0_79] : memref<2x64x32xbf16, #tpu.memory_space<vmem>>, vector<1x64x32xbf16>
    %165 = vector.shape_cast %164 : vector<1x64x32xbf16> to vector<64x32xbf16>
    %cst_80 = arith.constant dense<0.000000e+00> : vector<34x32xf32>
    %166 = tpu.matmul %163, %165, %cst_80 {dimension_numbers = #tpu.dot_dimension_numbers<[1], [0], [0], [1], [0, 0, 1, 1], [], []>} : vector<34x64xbf16>, vector<64x32xbf16>, vector<34x32xf32> -> vector<34x32xf32>
    %167 = arith.addf %90, %166 : vector<34x32xf32>
    %c0_81 = arith.constant 0 : index
    %c0_82 = arith.constant 0 : index
    %c0_83 = arith.constant 0 : index
    %168 = vector.load %arg18[%c0_81, %c0_82, %c0_83] : memref<2x1x32xf32, #tpu.memory_space<vmem>>, vector<1x1x32xf32>
    %169 = vector.shape_cast %168 : vector<1x1x32xf32> to vector<1x32xf32>
    %170 = vector.broadcast %169 : vector<1x32xf32> to vector<34x32xf32>
    %171 = arith.addf %167, %170 : vector<34x32xf32>
    %c1 = arith.constant 1 : index
    %c0_84 = arith.constant 0 : index
    %c0_85 = arith.constant 0 : index
    %172 = vector.load %arg7[%c1, %c0_84, %c0_85] : memref<2x1x32xf32, #tpu.memory_space<vmem>>, vector<1x1x32xf32>
    %173 = vector.shape_cast %172 : vector<1x1x32xf32> to vector<1x32xf32>
    %c1_86 = arith.constant 1 : index
    %c0_87 = arith.constant 0 : index
    %c0_88 = arith.constant 0 : index
    %174 = vector.load %arg8[%c1_86, %c0_87, %c0_88] : memref<2x1x32xf32, #tpu.memory_space<vmem>>, vector<1x1x32xf32>
    %175 = vector.shape_cast %174 : vector<1x1x32xf32> to vector<1x32xf32>
    %cst_89 = arith.constant dense<0.000000e+00> : vector<34xf32>
    %176 = vector.multi_reduction <add>, %171, %cst_89 [1] : vector<34x32xf32> to vector<34xf32>
    %177 = vector.shape_cast %176 : vector<34xf32> to vector<34x1xf32>
    %cst_90 = arith.constant 3.200000e+01 : f32
    %178 = vector.broadcast %cst_90 : f32 to vector<34x1xf32>
    %179 = arith.divf %177, %178 : vector<34x1xf32>
    %180 = vector.broadcast %179 : vector<34x1xf32> to vector<34x32xf32>
    %181 = arith.subf %171, %180 : vector<34x32xf32>
    %182 = arith.mulf %181, %181 : vector<34x32xf32>
    %cst_91 = arith.constant dense<0.000000e+00> : vector<34xf32>
    %183 = vector.multi_reduction <add>, %182, %cst_91 [1] : vector<34x32xf32> to vector<34xf32>
    %184 = vector.shape_cast %183 : vector<34xf32> to vector<34x1xf32>
    %cst_92 = arith.constant 3.200000e+01 : f32
    %185 = vector.broadcast %cst_92 : f32 to vector<34x1xf32>
    %186 = arith.divf %184, %185 : vector<34x1xf32>
    %cst_93 = arith.constant 9.99999974E-6 : f32
    %187 = vector.broadcast %cst_93 : f32 to vector<34x1xf32>
    %188 = arith.addf %186, %187 : vector<34x1xf32>
    %189 = math.rsqrt %188 : vector<34x1xf32>
    %190 = vector.broadcast %189 : vector<34x1xf32> to vector<34x32xf32>
    %191 = arith.mulf %181, %190 : vector<34x32xf32>
    %192 = vector.broadcast %173 : vector<1x32xf32> to vector<34x32xf32>
    %193 = arith.mulf %191, %192 : vector<34x32xf32>
    %194 = vector.broadcast %175 : vector<1x32xf32> to vector<34x32xf32>
    %195 = arith.addf %193, %194 : vector<34x32xf32>
    %196 = arith.truncf %195 : vector<34x32xf32> to vector<34x32xbf16>
    %c1_94 = arith.constant 1 : index
    %c0_95 = arith.constant 0 : index
    %c0_96 = arith.constant 0 : index
    %197 = vector.load %arg9[%c1_94, %c0_95, %c0_96] : memref<2x32x96xbf16, #tpu.memory_space<vmem>>, vector<1x32x96xbf16>
    %198 = vector.shape_cast %197 : vector<1x32x96xbf16> to vector<32x96xbf16>
    %cst_97 = arith.constant dense<0.000000e+00> : vector<34x96xf32>
    %199 = tpu.matmul %196, %198, %cst_97 {dimension_numbers = #tpu.dot_dimension_numbers<[1], [0], [0], [1], [0, 0, 1, 1], [], []>} : vector<34x32xbf16>, vector<32x96xbf16>, vector<34x96xf32> -> vector<34x96xf32>
    %c1_98 = arith.constant 1 : index
    %c0_99 = arith.constant 0 : index
    %c0_100 = arith.constant 0 : index
    %200 = vector.load %arg10[%c1_98, %c0_99, %c0_100] : memref<2x1x96xf32, #tpu.memory_space<vmem>>, vector<1x1x96xf32>
    %201 = vector.shape_cast %200 : vector<1x1x96xf32> to vector<1x96xf32>
    %202 = vector.broadcast %201 : vector<1x96xf32> to vector<34x96xf32>
    %203 = arith.addf %199, %202 : vector<34x96xf32>
    %204 = vector.extract_strided_slice %203 {offsets = [0, 0], sizes = [34, 32], strides = [1, 1]} : vector<34x96xf32> to vector<34x32xf32>
    %205 = vector.extract_strided_slice %203 {offsets = [0, 32], sizes = [34, 32], strides = [1, 1]} : vector<34x96xf32> to vector<34x32xf32>
    %206 = arith.truncf %205 : vector<34x32xf32> to vector<34x32xbf16>
    %207 = vector.extract_strided_slice %203 {offsets = [0, 64], sizes = [34, 32], strides = [1, 1]} : vector<34x96xf32> to vector<34x32xf32>
    %208 = arith.truncf %207 : vector<34x32xf32> to vector<34x32xbf16>
    %209 = arith.truncf %204 : vector<34x32xf32> to vector<34x32xbf16>
    %cst_101 = arith.constant dense<0.000000e+00> : vector<160x32xf32>
    %210 = tpu.matmul %0, %209, %cst_101 {dimension_numbers = #tpu.dot_dimension_numbers<[1], [0], [0], [1], [0, 0, 1, 1], [], []>} : vector<160x34xbf16>, vector<34x32xbf16>, vector<160x32xf32> -> vector<160x32xf32>
    %211 = arith.mulf %210, %1 : vector<160x32xf32>
    %212 = arith.truncf %211 : vector<160x32xf32> to vector<160x32xbf16>
    %cst_102 = arith.constant dense<0.000000e+00> : vector<160x34xf32>
    %213 = tpu.matmul %212, %206, %cst_102 {dimension_numbers = #tpu.dot_dimension_numbers<[1], [1], [0], [0], [0, 0, 1, 0], [], []>} : vector<160x32xbf16>, vector<34x32xbf16>, vector<160x34xf32> -> vector<160x34xf32>
    %214 = arith.addf %213, %2 : vector<160x34xf32>
    %cst_103 = arith.constant dense<0xFF800000> : vector<160xf32>
    %215 = vector.multi_reduction <maximumf>, %214, %cst_103 [1] : vector<160x34xf32> to vector<160xf32>
    %216 = vector.shape_cast %215 : vector<160xf32> to vector<160x1xf32>
    %217 = vector.broadcast %216 : vector<160x1xf32> to vector<160x34xf32>
    %218 = arith.subf %214, %217 : vector<160x34xf32>
    %219 = math.exp %218 : vector<160x34xf32>
    %cst_104 = arith.constant dense<0.000000e+00> : vector<160xf32>
    %220 = vector.multi_reduction <add>, %219, %cst_104 [1] : vector<160x34xf32> to vector<160xf32>
    %221 = vector.shape_cast %220 : vector<160xf32> to vector<160x1xf32>
    %222 = tpu.reciprocal %221 {approx = true} : vector<160x1xf32> -> vector<160x1xf32>
    %223 = vector.broadcast %222 : vector<160x1xf32> to vector<160x34xf32>
    %224 = arith.mulf %219, %223 : vector<160x34xf32>
    %225 = arith.truncf %224 : vector<160x34xf32> to vector<160x34xbf16>
    %cst_105 = arith.constant dense<0.000000e+00> : vector<160x32xf32>
    %226 = tpu.matmul %225, %208, %cst_105 {dimension_numbers = #tpu.dot_dimension_numbers<[1], [0], [0], [1], [0, 0, 1, 1], [], []>} : vector<160x34xbf16>, vector<34x32xbf16>, vector<160x32xf32> -> vector<160x32xf32>
    %227 = arith.mulf %226, %1 : vector<160x32xf32>
    %c1_106 = arith.constant 1 : index
    %c0_107 = arith.constant 0 : index
    %c0_108 = arith.constant 0 : index
    %228 = vector.load %arg11[%c1_106, %c0_107, %c0_108] : memref<2x128x32xbf16, #tpu.memory_space<vmem>>, vector<1x128x32xbf16>
    %229 = vector.shape_cast %228 : vector<1x128x32xbf16> to vector<128x32xbf16>
    %c1_109 = arith.constant 1 : index
    %c0_110 = arith.constant 0 : index
    %c0_111 = arith.constant 0 : index
    %230 = vector.load %arg12[%c1_109, %c0_110, %c0_111] : memref<2x1x32xf32, #tpu.memory_space<vmem>>, vector<1x1x32xf32>
    %231 = vector.shape_cast %230 : vector<1x1x32xf32> to vector<1x32xf32>
    %232 = vector.extract_strided_slice %227 {offsets = [0, 0], sizes = [34, 32], strides = [1, 1]} : vector<160x32xf32> to vector<34x32xf32>
    %233 = arith.truncf %232 : vector<34x32xf32> to vector<34x32xbf16>
    %234 = vector.extract_strided_slice %229 {offsets = [0, 0], sizes = [32, 32], strides = [1, 1]} : vector<128x32xbf16> to vector<32x32xbf16>
    %cst_112 = arith.constant dense<0.000000e+00> : vector<34x32xf32>
    %235 = tpu.matmul %233, %234, %cst_112 {dimension_numbers = #tpu.dot_dimension_numbers<[1], [0], [0], [1], [0, 0, 1, 1], [], []>} : vector<34x32xbf16>, vector<32x32xbf16>, vector<34x32xf32> -> vector<34x32xf32>
    %236 = vector.broadcast %231 : vector<1x32xf32> to vector<34x32xf32>
    %237 = arith.addf %236, %235 : vector<34x32xf32>
    %238 = vector.extract_strided_slice %227 {offsets = [40, 0], sizes = [34, 32], strides = [1, 1]} : vector<160x32xf32> to vector<34x32xf32>
    %239 = arith.truncf %238 : vector<34x32xf32> to vector<34x32xbf16>
    %240 = vector.extract_strided_slice %229 {offsets = [32, 0], sizes = [32, 32], strides = [1, 1]} : vector<128x32xbf16> to vector<32x32xbf16>
    %cst_113 = arith.constant dense<0.000000e+00> : vector<34x32xf32>
    %241 = tpu.matmul %239, %240, %cst_113 {dimension_numbers = #tpu.dot_dimension_numbers<[1], [0], [0], [1], [0, 0, 1, 1], [], []>} : vector<34x32xbf16>, vector<32x32xbf16>, vector<34x32xf32> -> vector<34x32xf32>
    %242 = arith.addf %237, %241 : vector<34x32xf32>
    %243 = vector.extract_strided_slice %227 {offsets = [80, 0], sizes = [34, 32], strides = [1, 1]} : vector<160x32xf32> to vector<34x32xf32>
    %244 = arith.truncf %243 : vector<34x32xf32> to vector<34x32xbf16>
    %245 = vector.extract_strided_slice %229 {offsets = [64, 0], sizes = [32, 32], strides = [1, 1]} : vector<128x32xbf16> to vector<32x32xbf16>
    %cst_114 = arith.constant dense<0.000000e+00> : vector<34x32xf32>
    %246 = tpu.matmul %244, %245, %cst_114 {dimension_numbers = #tpu.dot_dimension_numbers<[1], [0], [0], [1], [0, 0, 1, 1], [], []>} : vector<34x32xbf16>, vector<32x32xbf16>, vector<34x32xf32> -> vector<34x32xf32>
    %247 = arith.addf %242, %246 : vector<34x32xf32>
    %248 = vector.extract_strided_slice %227 {offsets = [120, 0], sizes = [34, 32], strides = [1, 1]} : vector<160x32xf32> to vector<34x32xf32>
    %249 = arith.truncf %248 : vector<34x32xf32> to vector<34x32xbf16>
    %250 = vector.extract_strided_slice %229 {offsets = [96, 0], sizes = [32, 32], strides = [1, 1]} : vector<128x32xbf16> to vector<32x32xbf16>
    %cst_115 = arith.constant dense<0.000000e+00> : vector<34x32xf32>
    %251 = tpu.matmul %249, %250, %cst_115 {dimension_numbers = #tpu.dot_dimension_numbers<[1], [0], [0], [1], [0, 0, 1, 1], [], []>} : vector<34x32xbf16>, vector<32x32xbf16>, vector<34x32xf32> -> vector<34x32xf32>
    %252 = arith.addf %247, %251 : vector<34x32xf32>
    %253 = arith.addf %171, %252 : vector<34x32xf32>
    %c1_116 = arith.constant 1 : index
    %c0_117 = arith.constant 0 : index
    %c0_118 = arith.constant 0 : index
    %254 = vector.load %arg13[%c1_116, %c0_117, %c0_118] : memref<2x1x32xf32, #tpu.memory_space<vmem>>, vector<1x1x32xf32>
    %255 = vector.shape_cast %254 : vector<1x1x32xf32> to vector<1x32xf32>
    %c1_119 = arith.constant 1 : index
    %c0_120 = arith.constant 0 : index
    %c0_121 = arith.constant 0 : index
    %256 = vector.load %arg14[%c1_119, %c0_120, %c0_121] : memref<2x1x32xf32, #tpu.memory_space<vmem>>, vector<1x1x32xf32>
    %257 = vector.shape_cast %256 : vector<1x1x32xf32> to vector<1x32xf32>
    %cst_122 = arith.constant dense<0.000000e+00> : vector<34xf32>
    %258 = vector.multi_reduction <add>, %253, %cst_122 [1] : vector<34x32xf32> to vector<34xf32>
    %259 = vector.shape_cast %258 : vector<34xf32> to vector<34x1xf32>
    %cst_123 = arith.constant 3.200000e+01 : f32
    %260 = vector.broadcast %cst_123 : f32 to vector<34x1xf32>
    %261 = arith.divf %259, %260 : vector<34x1xf32>
    %262 = vector.broadcast %261 : vector<34x1xf32> to vector<34x32xf32>
    %263 = arith.subf %253, %262 : vector<34x32xf32>
    %264 = arith.mulf %263, %263 : vector<34x32xf32>
    %cst_124 = arith.constant dense<0.000000e+00> : vector<34xf32>
    %265 = vector.multi_reduction <add>, %264, %cst_124 [1] : vector<34x32xf32> to vector<34xf32>
    %266 = vector.shape_cast %265 : vector<34xf32> to vector<34x1xf32>
    %cst_125 = arith.constant 3.200000e+01 : f32
    %267 = vector.broadcast %cst_125 : f32 to vector<34x1xf32>
    %268 = arith.divf %266, %267 : vector<34x1xf32>
    %cst_126 = arith.constant 9.99999974E-6 : f32
    %269 = vector.broadcast %cst_126 : f32 to vector<34x1xf32>
    %270 = arith.addf %268, %269 : vector<34x1xf32>
    %271 = math.rsqrt %270 : vector<34x1xf32>
    %272 = vector.broadcast %271 : vector<34x1xf32> to vector<34x32xf32>
    %273 = arith.mulf %263, %272 : vector<34x32xf32>
    %274 = vector.broadcast %255 : vector<1x32xf32> to vector<34x32xf32>
    %275 = arith.mulf %273, %274 : vector<34x32xf32>
    %276 = vector.broadcast %257 : vector<1x32xf32> to vector<34x32xf32>
    %277 = arith.addf %275, %276 : vector<34x32xf32>
    %278 = arith.truncf %277 : vector<34x32xf32> to vector<34x32xbf16>
    %c1_127 = arith.constant 1 : index
    %c0_128 = arith.constant 0 : index
    %c0_129 = arith.constant 0 : index
    %279 = vector.load %arg15[%c1_127, %c0_128, %c0_129] : memref<2x32x64xbf16, #tpu.memory_space<vmem>>, vector<1x32x64xbf16>
    %280 = vector.shape_cast %279 : vector<1x32x64xbf16> to vector<32x64xbf16>
    %cst_130 = arith.constant dense<0.000000e+00> : vector<34x64xf32>
    %281 = tpu.matmul %278, %280, %cst_130 {dimension_numbers = #tpu.dot_dimension_numbers<[1], [0], [0], [1], [0, 0, 1, 1], [], []>} : vector<34x32xbf16>, vector<32x64xbf16>, vector<34x64xf32> -> vector<34x64xf32>
    %c1_131 = arith.constant 1 : index
    %c0_132 = arith.constant 0 : index
    %c0_133 = arith.constant 0 : index
    %282 = vector.load %arg16[%c1_131, %c0_132, %c0_133] : memref<2x1x64xf32, #tpu.memory_space<vmem>>, vector<1x1x64xf32>
    %283 = vector.shape_cast %282 : vector<1x1x64xf32> to vector<1x64xf32>
    %284 = vector.broadcast %283 : vector<1x64xf32> to vector<34x64xf32>
    %285 = arith.addf %281, %284 : vector<34x64xf32>
    %cst_134 = arith.constant 5.000000e-01 : f32
    %286 = vector.broadcast %cst_134 : f32 to vector<34x64xf32>
    %287 = arith.mulf %286, %285 : vector<34x64xf32>
    %cst_135 = arith.constant 1.41421354 : f32
    %288 = vector.broadcast %cst_135 : f32 to vector<34x64xf32>
    %289 = arith.divf %285, %288 : vector<34x64xf32>
    %cst_136 = arith.constant 0.000000e+00 : f32
    %290 = vector.broadcast %cst_136 : f32 to vector<34x64xf32>
    %291 = arith.cmpf oge, %289, %290 : vector<34x64xf32>
    %cst_137 = arith.constant 1.000000e+00 : f32
    %cst_138 = arith.constant -1.000000e+00 : f32
    %292 = vector.broadcast %cst_137 : f32 to vector<34x64xf32>
    %293 = vector.broadcast %cst_138 : f32 to vector<34x64xf32>
    %294 = arith.select %291, %292, %293 : vector<34x64xi1>, vector<34x64xf32>
    %295 = math.absf %289 : vector<34x64xf32>
    %cst_139 = arith.constant 0.327591091 : f32
    %296 = vector.broadcast %cst_139 : f32 to vector<34x64xf32>
    %297 = arith.mulf %296, %295 : vector<34x64xf32>
    %cst_140 = arith.constant 1.000000e+00 : f32
    %298 = vector.broadcast %cst_140 : f32 to vector<34x64xf32>
    %299 = arith.addf %298, %297 : vector<34x64xf32>
    %300 = tpu.reciprocal %299 {approx = true} : vector<34x64xf32> -> vector<34x64xf32>
    %cst_141 = arith.constant 1.06140542 : f32
    %301 = vector.broadcast %cst_141 : f32 to vector<34x64xf32>
    %302 = arith.mulf %301, %300 : vector<34x64xf32>
    %cst_142 = arith.constant -1.45315206 : f32
    %303 = vector.broadcast %cst_142 : f32 to vector<34x64xf32>
    %304 = arith.addf %302, %303 : vector<34x64xf32>
    %305 = arith.mulf %304, %300 : vector<34x64xf32>
    %cst_143 = arith.constant 1.42141378 : f32
    %306 = vector.broadcast %cst_143 : f32 to vector<34x64xf32>
    %307 = arith.addf %305, %306 : vector<34x64xf32>
    %308 = arith.mulf %307, %300 : vector<34x64xf32>
    %cst_144 = arith.constant -0.284496725 : f32
    %309 = vector.broadcast %cst_144 : f32 to vector<34x64xf32>
    %310 = arith.addf %308, %309 : vector<34x64xf32>
    %311 = arith.mulf %310, %300 : vector<34x64xf32>
    %cst_145 = arith.constant 0.254829586 : f32
    %312 = vector.broadcast %cst_145 : f32 to vector<34x64xf32>
    %313 = arith.addf %311, %312 : vector<34x64xf32>
    %314 = arith.mulf %313, %300 : vector<34x64xf32>
    %cst_146 = arith.constant 0.000000e+00 : f32
    %315 = vector.broadcast %cst_146 : f32 to vector<34x64xf32>
    %316 = arith.subf %315, %295 : vector<34x64xf32>
    %317 = arith.mulf %316, %295 : vector<34x64xf32>
    %318 = math.exp %317 : vector<34x64xf32>
    %319 = arith.mulf %314, %318 : vector<34x64xf32>
    %cst_147 = arith.constant 1.000000e+00 : f32
    %320 = vector.broadcast %cst_147 : f32 to vector<34x64xf32>
    %321 = arith.subf %320, %319 : vector<34x64xf32>
    %322 = arith.mulf %294, %321 : vector<34x64xf32>
    %cst_148 = arith.constant 1.000000e+00 : f32
    %323 = vector.broadcast %cst_148 : f32 to vector<34x64xf32>
    %324 = arith.addf %323, %322 : vector<34x64xf32>
    %325 = arith.mulf %287, %324 : vector<34x64xf32>
    %326 = arith.truncf %325 : vector<34x64xf32> to vector<34x64xbf16>
    %c1_149 = arith.constant 1 : index
    %c0_150 = arith.constant 0 : index
    %c0_151 = arith.constant 0 : index
    %327 = vector.load %arg17[%c1_149, %c0_150, %c0_151] : memref<2x64x32xbf16, #tpu.memory_space<vmem>>, vector<1x64x32xbf16>
    %328 = vector.shape_cast %327 : vector<1x64x32xbf16> to vector<64x32xbf16>
    %cst_152 = arith.constant dense<0.000000e+00> : vector<34x32xf32>
    %329 = tpu.matmul %326, %328, %cst_152 {dimension_numbers = #tpu.dot_dimension_numbers<[1], [0], [0], [1], [0, 0, 1, 1], [], []>} : vector<34x64xbf16>, vector<64x32xbf16>, vector<34x32xf32> -> vector<34x32xf32>
    %330 = arith.addf %253, %329 : vector<34x32xf32>
    %c1_153 = arith.constant 1 : index
    %c0_154 = arith.constant 0 : index
    %c0_155 = arith.constant 0 : index
    %331 = vector.load %arg18[%c1_153, %c0_154, %c0_155] : memref<2x1x32xf32, #tpu.memory_space<vmem>>, vector<1x1x32xf32>
    %332 = vector.shape_cast %331 : vector<1x1x32xf32> to vector<1x32xf32>
    %333 = vector.broadcast %332 : vector<1x32xf32> to vector<34x32xf32>
    %334 = arith.addf %330, %333 : vector<34x32xf32>
    %335 = vector.extract_strided_slice %334 {offsets = [0, 0], sizes = [1, 32], strides = [1, 1]} : vector<34x32xf32> to vector<1x32xf32>
    %c0_156 = arith.constant 0 : index
    %c0_157 = arith.constant 0 : index
    %336 = vector.load %arg19[%c0_156, %c0_157] : memref<1x32xf32, #tpu.memory_space<vmem>>, vector<1x32xf32>
    %c0_158 = arith.constant 0 : index
    %c0_159 = arith.constant 0 : index
    %337 = vector.load %arg20[%c0_158, %c0_159] : memref<1x32xf32, #tpu.memory_space<vmem>>, vector<1x32xf32>
    %cst_160 = arith.constant dense<0.000000e+00> : vector<1xf32>
    %338 = vector.multi_reduction <add>, %335, %cst_160 [1] : vector<1x32xf32> to vector<1xf32>
    %339 = vector.shape_cast %338 : vector<1xf32> to vector<1x1xf32>
    %cst_161 = arith.constant 3.200000e+01 : f32
    %340 = vector.broadcast %cst_161 : f32 to vector<1x1xf32>
    %341 = arith.divf %339, %340 : vector<1x1xf32>
    %342 = vector.broadcast %341 : vector<1x1xf32> to vector<1x32xf32>
    %343 = arith.subf %335, %342 : vector<1x32xf32>
    %344 = arith.mulf %343, %343 : vector<1x32xf32>
    %cst_162 = arith.constant dense<0.000000e+00> : vector<1xf32>
    %345 = vector.multi_reduction <add>, %344, %cst_162 [1] : vector<1x32xf32> to vector<1xf32>
    %346 = vector.shape_cast %345 : vector<1xf32> to vector<1x1xf32>
    %cst_163 = arith.constant 3.200000e+01 : f32
    %347 = vector.broadcast %cst_163 : f32 to vector<1x1xf32>
    %348 = arith.divf %346, %347 : vector<1x1xf32>
    %cst_164 = arith.constant 9.99999974E-6 : f32
    %349 = vector.broadcast %cst_164 : f32 to vector<1x1xf32>
    %350 = arith.addf %348, %349 : vector<1x1xf32>
    %351 = math.rsqrt %350 : vector<1x1xf32>
    %352 = vector.broadcast %351 : vector<1x1xf32> to vector<1x32xf32>
    %353 = arith.mulf %343, %352 : vector<1x32xf32>
    %354 = arith.mulf %353, %336 : vector<1x32xf32>
    %355 = arith.addf %354, %337 : vector<1x32xf32>
    %c0_165 = arith.constant 0 : index
    %c0_166 = arith.constant 0 : index
    %356 = vector.load %arg21[%c0_165, %c0_166] : memref<1x32xf32, #tpu.memory_space<vmem>>, vector<1x32xf32>
    %357 = arith.mulf %355, %356 : vector<1x32xf32>
    %cst_167 = arith.constant dense<0.000000e+00> : vector<1xf32>
    %358 = vector.multi_reduction <add>, %357, %cst_167 [1] : vector<1x32xf32> to vector<1xf32>
    %359 = vector.shape_cast %358 : vector<1xf32> to vector<1x1xf32>
    %c0_168 = arith.constant 0 : index
    %c0_169 = arith.constant 0 : index
    %360 = vector.load %arg22[%c0_168, %c0_169] : memref<1x1xf32, #tpu.memory_space<vmem>>, vector<1x1xf32>
    %361 = arith.addf %359, %360 : vector<1x1xf32>
    %c0_170 = arith.constant 0 : index
    %c0_171 = arith.constant 0 : index
    %362 = vector.load %arg23[%c0_170, %c0_171] : memref<2x1xf32, #tpu.memory_space<vmem>>, vector<1x1xf32>
    tpu.vector_store %arg23[%c0_170, %c0_171], %361 {strides = array<i32>} : memref<2x1xf32, #tpu.memory_space<vmem>>, vector<1x1xf32>,
    %363 = vector.extract_strided_slice %334 {offsets = [17, 0], sizes = [1, 32], strides = [1, 1]} : vector<34x32xf32> to vector<1x32xf32>
    %c0_172 = arith.constant 0 : index
    %c0_173 = arith.constant 0 : index
    %364 = vector.load %arg19[%c0_172, %c0_173] : memref<1x32xf32, #tpu.memory_space<vmem>>, vector<1x32xf32>
    %c0_174 = arith.constant 0 : index
    %c0_175 = arith.constant 0 : index
    %365 = vector.load %arg20[%c0_174, %c0_175] : memref<1x32xf32, #tpu.memory_space<vmem>>, vector<1x32xf32>
    %cst_176 = arith.constant dense<0.000000e+00> : vector<1xf32>
    %366 = vector.multi_reduction <add>, %363, %cst_176 [1] : vector<1x32xf32> to vector<1xf32>
    %367 = vector.shape_cast %366 : vector<1xf32> to vector<1x1xf32>
    %cst_177 = arith.constant 3.200000e+01 : f32
    %368 = vector.broadcast %cst_177 : f32 to vector<1x1xf32>
    %369 = arith.divf %367, %368 : vector<1x1xf32>
    %370 = vector.broadcast %369 : vector<1x1xf32> to vector<1x32xf32>
    %371 = arith.subf %363, %370 : vector<1x32xf32>
    %372 = arith.mulf %371, %371 : vector<1x32xf32>
    %cst_178 = arith.constant dense<0.000000e+00> : vector<1xf32>
    %373 = vector.multi_reduction <add>, %372, %cst_178 [1] : vector<1x32xf32> to vector<1xf32>
    %374 = vector.shape_cast %373 : vector<1xf32> to vector<1x1xf32>
    %cst_179 = arith.constant 3.200000e+01 : f32
    %375 = vector.broadcast %cst_179 : f32 to vector<1x1xf32>
    %376 = arith.divf %374, %375 : vector<1x1xf32>
    %cst_180 = arith.constant 9.99999974E-6 : f32
    %377 = vector.broadcast %cst_180 : f32 to vector<1x1xf32>
    %378 = arith.addf %376, %377 : vector<1x1xf32>
    %379 = math.rsqrt %378 : vector<1x1xf32>
    %380 = vector.broadcast %379 : vector<1x1xf32> to vector<1x32xf32>
    %381 = arith.mulf %371, %380 : vector<1x32xf32>
    %382 = arith.mulf %381, %364 : vector<1x32xf32>
    %383 = arith.addf %382, %365 : vector<1x32xf32>
    %c0_181 = arith.constant 0 : index
    %c0_182 = arith.constant 0 : index
    %384 = vector.load %arg21[%c0_181, %c0_182] : memref<1x32xf32, #tpu.memory_space<vmem>>, vector<1x32xf32>
    %385 = arith.mulf %383, %384 : vector<1x32xf32>
    %cst_183 = arith.constant dense<0.000000e+00> : vector<1xf32>
    %386 = vector.multi_reduction <add>, %385, %cst_183 [1] : vector<1x32xf32> to vector<1xf32>
    %387 = vector.shape_cast %386 : vector<1xf32> to vector<1x1xf32>
    %c0_184 = arith.constant 0 : index
    %c0_185 = arith.constant 0 : index
    %388 = vector.load %arg22[%c0_184, %c0_185] : memref<1x1xf32, #tpu.memory_space<vmem>>, vector<1x1xf32>
    %389 = arith.addf %387, %388 : vector<1x1xf32>
    %c1_186 = arith.constant 1 : index
    %c0_187 = arith.constant 0 : index
    %390 = vector.load %arg23[%c1_186, %c0_187] : memref<2x1xf32, #tpu.memory_space<vmem>>, vector<1x1xf32>
    tpu.vector_store %arg23[%c1_186, %c0_187], %389 {strides = array<i32>} : memref<2x1xf32, #tpu.memory_space<vmem>>, vector<1x1xf32>,
    return
  }
  func.func @transform_0(%arg0: i32) -> (i32, i32) {
    %c0_i32 = arith.constant 0 : i32
    %c0_i32_0 = arith.constant 0 : i32
    return %arg0, %c0_i32 : i32, i32
  }
  func.func @transform_1(%arg0: i32) -> (i32, i32) {
    %c0_i32 = arith.constant 0 : i32
    %c0_i32_0 = arith.constant 0 : i32
    %c0_i32_1 = arith.constant 0 : i32
    return %c0_i32, %c0_i32_0 : i32, i32
  }
  func.func @transform_2(%arg0: i32) -> (i32, i32) {
    %c0_i32 = arith.constant 0 : i32
    %c0_i32_0 = arith.constant 0 : i32
    %c0_i32_1 = arith.constant 0 : i32
    return %c0_i32, %c0_i32_0 : i32, i32
  }
  func.func @transform_3(%arg0: i32) -> (i32, i32) {
    %c0_i32 = arith.constant 0 : i32
    %c0_i32_0 = arith.constant 0 : i32
    %c0_i32_1 = arith.constant 0 : i32
    return %c0_i32, %c0_i32_0 : i32, i32
  }
  func.func @transform_4(%arg0: i32) -> (i32, i32) {
    %c0_i32 = arith.constant 0 : i32
    %c0_i32_0 = arith.constant 0 : i32
    %c0_i32_1 = arith.constant 0 : i32
    return %c0_i32, %c0_i32_0 : i32, i32
  }
  func.func @transform_5(%arg0: i32) -> (i32, i32) {
    %c0_i32 = arith.constant 0 : i32
    %c0_i32_0 = arith.constant 0 : i32
    %c0_i32_1 = arith.constant 0 : i32
    return %c0_i32, %c0_i32_0 : i32, i32
  }
  func.func @transform_6(%arg0: i32) -> (i32, i32, i32) {
    %c0_i32 = arith.constant 0 : i32
    %c0_i32_0 = arith.constant 0 : i32
    %c0_i32_1 = arith.constant 0 : i32
    %c0_i32_2 = arith.constant 0 : i32
    return %c0_i32, %c0_i32_0, %c0_i32_1 : i32, i32, i32
  }
  func.func @transform_7(%arg0: i32) -> (i32, i32, i32) {
    %c0_i32 = arith.constant 0 : i32
    %c0_i32_0 = arith.constant 0 : i32
    %c0_i32_1 = arith.constant 0 : i32
    %c0_i32_2 = arith.constant 0 : i32
    return %c0_i32, %c0_i32_0, %c0_i32_1 : i32, i32, i32
  }
  func.func @transform_8(%arg0: i32) -> (i32, i32, i32) {
    %c0_i32 = arith.constant 0 : i32
    %c0_i32_0 = arith.constant 0 : i32
    %c0_i32_1 = arith.constant 0 : i32
    %c0_i32_2 = arith.constant 0 : i32
    return %c0_i32, %c0_i32_0, %c0_i32_1 : i32, i32, i32
  }
  func.func @transform_9(%arg0: i32) -> (i32, i32, i32) {
    %c0_i32 = arith.constant 0 : i32
    %c0_i32_0 = arith.constant 0 : i32
    %c0_i32_1 = arith.constant 0 : i32
    %c0_i32_2 = arith.constant 0 : i32
    return %c0_i32, %c0_i32_0, %c0_i32_1 : i32, i32, i32
  }
  func.func @transform_10(%arg0: i32) -> (i32, i32, i32) {
    %c0_i32 = arith.constant 0 : i32
    %c0_i32_0 = arith.constant 0 : i32
    %c0_i32_1 = arith.constant 0 : i32
    %c0_i32_2 = arith.constant 0 : i32
    return %c0_i32, %c0_i32_0, %c0_i32_1 : i32, i32, i32
  }
  func.func @transform_11(%arg0: i32) -> (i32, i32, i32) {
    %c0_i32 = arith.constant 0 : i32
    %c0_i32_0 = arith.constant 0 : i32
    %c0_i32_1 = arith.constant 0 : i32
    %c0_i32_2 = arith.constant 0 : i32
    return %c0_i32, %c0_i32_0, %c0_i32_1 : i32, i32, i32
  }
  func.func @transform_12(%arg0: i32) -> (i32, i32, i32) {
    %c0_i32 = arith.constant 0 : i32
    %c0_i32_0 = arith.constant 0 : i32
    %c0_i32_1 = arith.constant 0 : i32
    %c0_i32_2 = arith.constant 0 : i32
    return %c0_i32, %c0_i32_0, %c0_i32_1 : i32, i32, i32
  }
  func.func @transform_13(%arg0: i32) -> (i32, i32, i32) {
    %c0_i32 = arith.constant 0 : i32
    %c0_i32_0 = arith.constant 0 : i32
    %c0_i32_1 = arith.constant 0 : i32
    %c0_i32_2 = arith.constant 0 : i32
    return %c0_i32, %c0_i32_0, %c0_i32_1 : i32, i32, i32
  }
  func.func @transform_14(%arg0: i32) -> (i32, i32, i32) {
    %c0_i32 = arith.constant 0 : i32
    %c0_i32_0 = arith.constant 0 : i32
    %c0_i32_1 = arith.constant 0 : i32
    %c0_i32_2 = arith.constant 0 : i32
    return %c0_i32, %c0_i32_0, %c0_i32_1 : i32, i32, i32
  }
  func.func @transform_15(%arg0: i32) -> (i32, i32, i32) {
    %c0_i32 = arith.constant 0 : i32
    %c0_i32_0 = arith.constant 0 : i32
    %c0_i32_1 = arith.constant 0 : i32
    %c0_i32_2 = arith.constant 0 : i32
    return %c0_i32, %c0_i32_0, %c0_i32_1 : i32, i32, i32
  }
  func.func @transform_16(%arg0: i32) -> (i32, i32, i32) {
    %c0_i32 = arith.constant 0 : i32
    %c0_i32_0 = arith.constant 0 : i32
    %c0_i32_1 = arith.constant 0 : i32
    %c0_i32_2 = arith.constant 0 : i32
    return %c0_i32, %c0_i32_0, %c0_i32_1 : i32, i32, i32
  }
  func.func @transform_17(%arg0: i32) -> (i32, i32, i32) {
    %c0_i32 = arith.constant 0 : i32
    %c0_i32_0 = arith.constant 0 : i32
    %c0_i32_1 = arith.constant 0 : i32
    %c0_i32_2 = arith.constant 0 : i32
    return %c0_i32, %c0_i32_0, %c0_i32_1 : i32, i32, i32
  }
  func.func @transform_18(%arg0: i32) -> (i32, i32) {
    %c0_i32 = arith.constant 0 : i32
    %c0_i32_0 = arith.constant 0 : i32
    %c0_i32_1 = arith.constant 0 : i32
    return %c0_i32, %c0_i32_0 : i32, i32
  }
  func.func @transform_19(%arg0: i32) -> (i32, i32) {
    %c0_i32 = arith.constant 0 : i32
    %c0_i32_0 = arith.constant 0 : i32
    %c0_i32_1 = arith.constant 0 : i32
    return %c0_i32, %c0_i32_0 : i32, i32
  }
  func.func @transform_20(%arg0: i32) -> (i32, i32) {
    %c0_i32 = arith.constant 0 : i32
    %c0_i32_0 = arith.constant 0 : i32
    %c0_i32_1 = arith.constant 0 : i32
    return %c0_i32, %c0_i32_0 : i32, i32
  }
  func.func @transform_21(%arg0: i32) -> (i32, i32) {
    %c0_i32 = arith.constant 0 : i32
    %c0_i32_0 = arith.constant 0 : i32
    %c0_i32_1 = arith.constant 0 : i32
    return %c0_i32, %c0_i32_0 : i32, i32
  }
  func.func @transform_22(%arg0: i32) -> (i32, i32) {
    %c0_i32 = arith.constant 0 : i32
    %c0_i32_0 = arith.constant 0 : i32
    return %arg0, %c0_i32 : i32, i32
  }
}

</mosaic_0001>

<bundles_post_ra>
// kernel: qvit_forward.1
= control target key start
LH: loop header
LB: loop body
LE: loop exit
PB: predicated region body
PF: predicated region fallthrough
CT: control target
= control target key end

     0   :  { %v4924_v0 = vmov 0.0   ;;  %vm4925_vm0 = vmmov 0   ;;  %vm171_vm1 = vcmask 392192   ;;  %vm239_vm2 = vcmask 261120   ;;  %s6635_s1 = inlined_call_operand.vmem [shape: bf16[48,32], index: 1, kind: input, shape index: {}]   ;;  %s6636_s0 = inlined_call_operand.vmem [shape: f32[34,48], index: 0, kind: input, shape index: {}]   ;;  %s6637_s2 = inlined_call_operand.vmem [shape: f32[34,32], index: 2, kind: input, shape index: {}]   ;;  %s6638_s8 = inlined_call_operand.vmem [shape: bf16[2,32,96], index: 8, kind: input, shape index: {}]   ;;  %s6639_s6 = inlined_call_operand.vmem [shape: f32[2,1,32], index: 6, kind: input, shape index: {}]   ;;  %s6640_s7 = inlined_call_operand.vmem [shape: f32[2,1,32], index: 7, kind: input, shape index: {}]   ;;  %s6641_s3 = inlined_call_operand.vmem [shape: bf16[160,34], index: 3, kind: input, shape index: {}]   ;;  %s6642_s9 = inlined_call_operand.vmem [shape: f32[2,1,96], index: 9, kind: input, shape index: {}]   ;;  %s6643_s4 = inlined_call_operand.vmem [shape: f32[160,32], index: 4, kind: input, shape index: {}]   ;;  %s6644_s5 = inlined_call_operand.vmem [shape: f32[160,34], index: 5, kind: input, shape index: {}]   ;;  %s6645_s10 = inlined_call_operand.vmem [shape: bf16[2,128,32], index: 10, kind: input, shape index: {}]   ;;  %s6646_s11 = inlined_call_operand.vmem [shape: f32[2,1,32], index: 11, kind: input, shape index: {}]   ;;  %s6647_s14 = inlined_call_operand.vmem [shape: bf16[2,32,64], index: 14, kind: input, shape index: {}]   ;;  %s6648_s12 = inlined_call_operand.vmem [shape: f32[2,1,32], index: 12, kind: input, shape index: {}]   ;;  %s6649_s13 = inlined_call_operand.vmem [shape: f32[2,1,32], index: 13, kind: input, shape index: {}]   ;;  %s6650_s16 = inlined_call_operand.vmem [shape: bf16[2,64,32], index: 16, kind: input, shape index: {}]   ;;  %s6651_s15 = inlined_call_operand.vmem [shape: f32[2,1,64], index: 15, kind: input, shape index: {}]   ;;  %s6652_s17 = inlined_call_operand.vmem [shape: f32[2,1,32], index: 17, kind: input, shape index: {}]   ;;  %s6653_s21 = inlined_call_operand.<no memory space> [shape: f32[1,1], index: 21, kind: input, shape index: {}]   ;;  %s6654_s18 = inlined_call_operand.vmem [shape: f32[1,32], index: 18, kind: input, shape index: {}]   ;;  %s6655_s19 = inlined_call_operand.vmem [shape: f32[1,32], index: 19, kind: input, shape index: {}]   ;;  %s6656_s20 = inlined_call_operand.vmem [shape: f32[1,32], index: 20, kind: input, shape index: {}]   ;;  %s6657_s22 = inlined_call_operand.vmem [shape: f32[2,1], index: 22, kind: output, shape index: {}]  }
   0x1   :  { %6667 = sst [smem:[#allocation3_spill]] %s6635_s1  ;;  %4155 = vmatprep.subr.bf16.mxu0 %v4924_v0  ;;  %4161 = vmatprep.mubr.msk.bf16.mxu0 %vm4925_vm0, %v4924_v0  ;;  %vm252_vm3 = vcmask 254976   ;;  %vm473_vm4 = vcmask 277504   ;;  %vm504_vm5 = vcmask 1040384   ;;  %vm1930_vm9 = vcmask 523264  }
   0x2   :  { %6668 = sst [smem:[#allocation4_spill]] %s6636_s0  ;;  %s6674_s29 = sld [smem:[#allocation3_spill]]  ;;  %4173 = vmatprep.subr.bf16.mxu1 %v4924_v0  ;;  %4177 = vmatprep.mubr.msk.bf16.mxu1 %vm4925_vm0, %v4924_v0 }
   0x3   :  { %6669 = sst [smem:[#allocation5_spill]] %s6637_s2  ;;  %s6675_s24 = sld [smem:[#allocation4_spill]] }
   0x4   :  { %6670 = sst [smem:[#allocation6_spill]] %s6638_s8  ;;  %s6676_s1 = sld [smem:[#allocation5_spill]] }
   0x5   :  { %6671 = sst [smem:[#allocation7_spill]] %s6639_s6  ;;  %s6677_s28 = sld [smem:[#allocation6_spill]] }
   0x6   :  { %6672 = sst [smem:[#allocation8_spill]] %s6640_s7  ;;  %s6678_s23 = sld [smem:[#allocation7_spill]] }
   0x7   :  { %6673 = sst [smem:[#allocation9_spill]] %s6641_s3  ;;  %s4926_s8 = smov 96  }
   0x8   :  { %v4583_v1 = vld [vmem:[%s6674_s29] sm:$0xff]   ;;  %v4584_v2 = vld [vmem:[%s6674_s29 + $0x8] sm:$0xff]   ;;  %v4585_v3 = vld [vmem:[%s6674_s29 + $0x10] sm:$0xff]   ;;  %s6680_s26 = sld [smem:[#allocation9_spill]]  ;;  %s4927_s0 = smov 64  }
   0x9   :  { %4156 = vmatpush3.bf16.msra.mxu0 %v4583_v1  ;;  %v134_v4 = vld [vmem:[%s6675_s24] sm:$0xff]  ;;  %v135_v5 = vld [vmem:[%s6675_s24 + $0x8] sm:$0xff]  ;;  %v136_v7 = vld [vmem:[%s6675_s24 + $0x10] sm:$0xff] }
   0xa   :  { %4157 = vmatprep.subr.bf16.mxu0 %v4924_v0  ;;  %v139_v6 = vpack.c.bf16 %v135_v5, %v134_v4  ;;  %v137_v8 = vld [vmem:[%s6675_s24 + $0x18] sm:$0xff]  ;;  %v138_v10 = vld [vmem:[%s6675_s24 + $0x20] sm:$0x3]  ;;  %v149_v14 = vld [vmem:[%s6676_s1 + $0x8] sm:$0xff]  ;;  %s6679_s24 = sld [smem:[#allocation8_spill]] }
   0xb   :  { %v140_v9 = vpack.c.bf16 %v137_v8, %v136_v7  ;;  %v141_v11 = vpack.c.bf16 %v138_v10, %v138_v10  ;;  %v148_v12 = vld [vmem:[%s6676_s1] sm:$0xff]  ;;  %v150_v21 = vld [vmem:[%s6676_s1 + $0x10] sm:$0xff]  ;;  %v151_v24 = vld [vmem:[%s6676_s1 + $0x18] sm:$0xff] }
   0xc   :  { %v152_v31 = vld [vmem:[%s6676_s1 + $0x20] sm:$0x3] }
   0xd   :  { %4158 = vmatpush3.bf16.msra.mxu0 %v4584_v2  ;;  %v4586_v1 = vld [vmem:[%s6677_s28] sm:$0xff]   ;;  %v4587_v2 = vld [vmem:[%s6677_s28 + $0x8] sm:$0xff]  }
   0xe   :  { %4159 = vmatprep.subr.bf16.mxu0 %v4924_v0  ;;  %4174 = vmatpush3.bf16.msra.mxu1 %v4586_v1 }
   0xf   :  { %4175 = vmatprep.subr.bf16.mxu1 %v4924_v0 }
  0x11   :  { %4160 = vmatpush3.bf16.msra.mxu0 %v4585_v3 }
  0x12   :  { %4176 = vmatpush3.bf16.msra.mxu1 %v4587_v2 }
  0x14   :  { %4162 = vmatmul.mubr.msk.bf16.vlgmr.msra.gmra.mrb[0].mxu0 %vm171_vm1, %v139_v6 }
  0x15   :  { %4165 = vmatprep.mubr.msk.bf16.mxu0 %vm4925_vm0, %v4924_v0 }
  0x1c   :  { %4166 = vmatmul.mubr.msk.bf16.gmra.mrb[4].mxu0 %vm171_vm1, %v140_v9 }
  0x1d   :  { %4169 = vmatprep.mubr.msk.bf16.mxu0 %vm4925_vm0, %v4924_v0 }
  0x24   :  { %4170 = vmatmul.mubr.msk.bf16.gmra.mrb[8].mxu0 %vm171_vm1, %v141_v11  ;;  %vm3707_vm1 = vcmask 253952  }
  0xe7   :  { %v215_v13 = vpop.f32.mrb[0].mxu0 }
  0xe8   :  { %v5086_v15 = vadd.f32 %v215_v13, %v148_v12  ;;  %v4163_v16 = vpop.f32.mrb[1].mxu0 }
  0xe9   :  { %v218_v17 = vpop.f32.mrb[2].mxu0 }
  0xea   :  { %v5088_v18 = vadd.f32 %v218_v17, %v149_v14  ;;  %v4164_v19 = vpop.f32.mrb[3].mxu0  ;;  %v240_v20 = vsel %vm239_vm2, %v5086_v15, 0.0 }
  0xeb   :  { %241 = vadd.xlane.f32.xlu0 %v240_v20 }
  0xec   :  { %v243_v22 = vsel %vm239_vm2, %v5088_v18, 0.0 }
  0xef   :  { %244 = vadd.xlane.f32.xlu0 %v243_v22  ;;  %v223_v23 = vpop.f32.mrb[4].mxu0 }
  0xf0   :  { %v5100_v25 = vadd.f32 %v223_v23, %v150_v21  ;;  %v4167_v26 = vpop.f32.mrb[5].mxu0  ;;  %v3793_v21 = vld [vmem:[%s6678_s23] ss:$0 sm:$0xff] }
  0xf1   :  { %v226_v27 = vpop.f32.mrb[6].mxu0 }
  0xf2   :  { %v5102_v28 = vadd.f32 %v226_v27, %v151_v24  ;;  %v4168_v29 = vpop.f32.mrb[7].mxu0  ;;  %v246_v30 = vsel %vm239_vm2, %v5100_v25, 0.0  ;;  %v3794_v27 = vld [vmem:[%s6679_s24] ss:$0 sm:$0xff] }
  0xf3   :  { %247 = vadd.xlane.f32.xlu1 %v246_v30 }
  0xf4   :  { %v249_v32 = vsel %vm239_vm2, %v5102_v28, 0.0 }
  0xf7   :  { %250 = vadd.xlane.f32.xlu1 %v249_v32  ;;  %v231_v33 = vpop.f32.mrb[8].mxu0 }
  0xf8   :  { %v5111_v34 = vadd.f32 %v231_v33, %v152_v31  ;;  %v4171_v35 = vpop.f32.mrb[9].mxu0 }
  0xf9   :  { %v234_v36 = vpop.f32.mrb[10].mxu0 }
  0xfa   :  { %v253_v37 = vsel %vm252_vm3, %v5111_v34, 0.0  ;;  %v4172_v38 = vpop.f32.mrb[11].mxu0 }
  0xfb   :  { %254 = vadd.xlane.f32.xlu0 %v253_v37 }
 0x178   :  { %v242_v39 = vpop.xlane.xlu0 %241 }
 0x179   :  { %v257_v40 = vmul.f32 0.03125, %v242_v39 }
 0x17b   :  { %v262_v41 = vsub.f32 %v5086_v15, %v257_v40 }
 0x17c   :  { %v245_v42 = vpop.xlane.xlu0 %244 }
 0x17d   :  { %v258_v43 = vmul.f32 0.03125, %v245_v42  ;;  %v267_v44 = vmul.f32 %v262_v41, %v262_v41 }
 0x17f   :  { %v263_v45 = vsub.f32 %v5088_v18, %v258_v43  ;;  %v272_v46 = vsel %vm239_vm2, %v267_v44, 0.0 }
 0x180   :  { %v248_v47 = vpop.xlane.xlu1 %247  ;;  %273 = vadd.xlane.f32.xlu1 %v272_v46 }
 0x181   :  { %v259_v48 = vmul.f32 0.03125, %v248_v47  ;;  %v268_v49 = vmul.f32 %v263_v45, %v263_v45 }
 0x183   :  { %v264_v50 = vsub.f32 %v5100_v25, %v259_v48  ;;  %v275_v51 = vsel %vm239_vm2, %v268_v49, 0.0  ;;  %v4588_v48 = vld [vmem:[%s6680_s26] sm:$0xff]  }
 0x184   :  { %v251_v52 = vpop.xlane.xlu1 %250  ;;  %276 = vadd.xlane.f32.xlu0 %v275_v51  ;;  %v3795_v49 = vld [vmem:[%s6642_s9] ss:$0 sm:$0xff] }
 0x185   :  { %v260_v53 = vmul.f32 0.03125, %v251_v52  ;;  %v269_v54 = vmul.f32 %v264_v50, %v264_v50 }
 0x187   :  { %v265_v55 = vsub.f32 %v5102_v28, %v260_v53  ;;  %v278_v56 = vsel %vm239_vm2, %v269_v54, 0.0 }
 0x188   :  { %279 = vadd.xlane.f32.xlu1 %v278_v56  ;;  %v255_v57 = vpop.xlane.xlu0 %254 }
 0x189   :  { %v261_v58 = vmul.f32 0.03125, %v255_v57  ;;  %v270_v59 = vmul.f32 %v265_v55, %v265_v55 }
 0x18b   :  { %v266_v60 = vsub.f32 %v5111_v34, %v261_v58  ;;  %v281_v61 = vsel %vm239_vm2, %v270_v59, 0.0 }
 0x18c   :  { %282 = vadd.xlane.f32.xlu0 %v281_v61 }
 0x18d   :  { %v271_v62 = vmul.f32 %v266_v60, %v266_v60 }
 0x18f   :  { %v284_v63 = vsel %vm252_vm3, %v271_v62, 0.0 }
 0x190   :  { %285 = vadd.xlane.f32.xlu1 %v284_v63 }
 0x20d   :  { %v274_v3 = vpop.xlane.xlu1 %273 }
 0x20e   :  { %v287_v4 = vmul.f32 0.03125, %v274_v3 }
 0x210   :  { %v292_v5 = vadd.f32 1e-05, %v287_v4 }
 0x211   :  { %v277_v6 = vpop.xlane.xlu0 %276 }
 0x212   :  { %4628 = vrsqrt.f32 %v292_v5  ;;  %v288_v7 = vmul.f32 0.03125, %v277_v6 }
 0x214   :  { %v293_v8 = vadd.f32 1e-05, %v288_v7 }
 0x215   :  { %v280_v9 = vpop.xlane.xlu1 %279 }
 0x216   :  { %4630 = vrsqrt.f32 %v293_v8  ;;  %v289_v10 = vmul.f32 0.03125, %v280_v9  ;;  %v4589_v8 = vld [vmem:[%s6680_s26 + $0x8] sm:$0xff]   ;;  %v4590_v9 = vld [vmem:[%s6680_s26 + $0x10] sm:$0xff]  }
 0x218   :  { %v294_v11 = vadd.f32 1e-05, %v289_v10  ;;  %v4591_v10 = vld [vmem:[%s6680_s26 + $0x18] sm:$0xff]  }
 0x219   :  { %v283_v12 = vpop.xlane.xlu0 %282 }
 0x21a   :  { %4632 = vrsqrt.f32 %v294_v11  ;;  %v290_v13 = vmul.f32 0.03125, %v283_v12  ;;  %v4592_v11 = vld [vmem:[%s6680_s26 + $0x20] sm:$0xff]   ;;  %v4593_v12 = vld [vmem:[%s6680_s26 + $0x28] sm:$0xff]  }
 0x21c   :  { %v4629_v14 = vpop.eup %4628  ;;  %v295_v16 = vadd.f32 1e-05, %v290_v13  ;;  %v4594_v13 = vld [vmem:[%s6680_s26 + $0x30] sm:$0xff]  }
 0x21d   :  { %v286_v17 = vpop.xlane.xlu1 %285  ;;  %v302_v19 = vmul.f32 %v4629_v14, %v262_v41  ;;  %v4595_v14 = vld [vmem:[%s6680_s26 + $0x38] sm:$0xff]  }
 0x21e   :  { %4634 = vrsqrt.f32 %v295_v16  ;;  %v291_v20 = vmul.f32 0.03125, %v286_v17  ;;  %v4596_v16 = vld [vmem:[%s6680_s26 + $0x40] sm:$0xff]   ;;  %v4597_v17 = vld [vmem:[%s6680_s26 + $0x48] sm:$0xff]  }
 0x21f   :  { %v313_v26 = vmul.f32 %v3793_v21, %v302_v19 }
 0x220   :  { %v4631_v22 = vpop.eup %4630  ;;  %v296_v23 = vadd.f32 1e-05, %v291_v20 }
 0x221   :  { %v303_v24 = vmul.f32 %v4631_v22, %v263_v45  ;;  %v324_v31 = vadd.f32 %v3794_v27, %v313_v26  ;;  %v5217_v26 = vld [vmem:[%s6643_s4 + $0x10] sm:$0xff] }
 0x222   :  { %4636 = vrsqrt.f32 %v296_v23 }
 0x223   :  { %v314_v29 = vmul.f32 %v3793_v21, %v303_v24 }
 0x224   :  { %v4633_v30 = vpop.eup %4632 }
 0x225   :  { %v325_v32 = vadd.f32 %v3794_v27, %v314_v29  ;;  %v304_v33 = vmul.f32 %v4633_v30, %v264_v50  ;;  %v5222_v29 = vld [vmem:[%s6643_s4 + $0x18] sm:$0xff]  ;;  %v5227_v30 = vld [vmem:[%s6643_s4] sm:$0xff] }
 0x227   :  { %v329_v35 = vpack.c.bf16 %v325_v32, %v324_v31  ;;  %v315_v38 = vmul.f32 %v3793_v21, %v304_v33  ;;  %v5232_v32 = vld [vmem:[%s6643_s4 + $0x8] sm:$0xff] }
 0x228   :  { %v4635_v36 = vpop.eup %4634 }
 0x229   :  { %4178 = vmatmul.mubr.msk.bf16.vlgmr.msra.gmra.mrb[0].mxu1 %vm239_vm2, %v329_v35  ;;  %v305_v37 = vmul.f32 %v4635_v36, %v265_v55  ;;  %v326_v41 = vadd.f32 %v3794_v27, %v315_v38 }
 0x22a   :  { %4181 = vmatprep.mubr.msk.bf16.mxu1 %vm4925_vm0, %v4924_v0 }
 0x22b   :  { %v316_v39 = vmul.f32 %v3793_v21, %v305_v37 }
 0x22c   :  { %v4637_v40 = vpop.eup %4636 }
 0x22d   :  { %v327_v42 = vadd.f32 %v3794_v27, %v316_v39  ;;  %v306_v43 = vmul.f32 %v4637_v40, %v266_v60 }
 0x22f   :  { %v330_v44 = vpack.c.bf16 %v327_v42, %v326_v41  ;;  %v317_v45 = vmul.f32 %v3793_v21, %v306_v43  ;;  %v5241_v42 = vld [vmem:[%s6643_s4 + $0x30] sm:$0xff] }
 0x231   :  { %4182 = vmatmul.mubr.msk.bf16.gmra.mrb[4].mxu1 %vm239_vm2, %v330_v44  ;;  %v328_v46 = vadd.f32 %v3794_v27, %v317_v45  ;;  %v101_v44 = vld [vmem:[%s6643_s4 + $0x38] sm:$0xff] }
 0x232   :  { %4185 = vmatprep.mubr.msk.bf16.mxu1 %vm4925_vm0, %v4924_v0 }
 0x233   :  { %v331_v47 = vpack.c.bf16 %v328_v46, %v328_v46  ;;  %v5251_v46 = vld [vmem:[%s6643_s4 + $0x20] sm:$0xff] }
 0x239   :  { %4186 = vmatmul.mubr.msk.bf16.gmra.mrb[8].mxu1 %vm239_vm2, %v331_v47 }
 0x23a   :  { %4195 = vmatprep.mubr.msk.bf16.mxu1 %vm473_vm4, %v4588_v48  ;;  %v5257_v48 = vld [vmem:[%s6643_s4 + $0x28] sm:$0xff] }
 0x2fc   :  { %v398_v50 = vpop.f32.mrb[0].mxu1 }
 0x2fd   :  { %v4179_v51 = vpop.f32.mrb[1].mxu1  ;;  %v399_v53 = vadd.f32 %v3795_v49, %v398_v50 }
 0x2fe   :  { %v401_v52 = vpop.f32.mrb[2].mxu1 }
 0x2ff   :  { %v402_v54 = vadd.f32 %v3795_v49, %v401_v52  ;;  %v4180_v55 = vpop.f32.mrb[3].mxu1 }
 0x301   :  { %v5152_v56 = vpack.c.bf16 %v402_v54, %v399_v53 }
 0x303   :  { %654 = vrot.lane.b32.xlu0 %v5152_v56, %s4926_s8  ;;  %4189 = vmatprep.subr.bf16.mxu1 %v5152_v56 }
 0x304   :  { %v406_v57 = vpop.f32.mrb[4].mxu1  ;;  %4190 = vmatpush3.bf16.msra.mxu1 %v5152_v56 }
 0x305   :  { %v4183_v58 = vpop.f32.mrb[5].mxu1  ;;  %v407_v60 = vadd.f32 %v3795_v49, %v406_v57  ;;  %v5264_v57 = vld [vmem:[%s6643_s4 + $0x50] sm:$0xff] }
 0x306   :  { %v409_v59 = vpop.f32.mrb[6].mxu1  ;;  %v5269_v58 = vld [vmem:[%s6643_s4 + $0x40] sm:$0xff] }
 0x307   :  { %v410_v61 = vadd.f32 %v3795_v49, %v409_v59  ;;  %v4184_v62 = vpop.f32.mrb[7].mxu1 }
 0x309   :  { %v5158_v63 = vpack.c.bf16 %v410_v61, %v407_v60  ;;  %v5275_v60 = vld [vmem:[%s6643_s4 + $0x58] sm:$0xff] }
 0x30b   :  { %656 = vrot.lane.b32.xlu1 %v5158_v63, %s4926_s8  ;;  %4191 = vmatprep.subr.bf16.mxu1 %v5158_v63 }
 0x30c   :  { %v414_v1 = vpop.f32.mrb[8].mxu1  ;;  %4192 = vmatpush3.bf16.msra.mxu1 %v5158_v63 }
 0x30d   :  { %v415_v2 = vadd.f32 %v3795_v49, %v414_v1  ;;  %v4187_v3 = vpop.f32.mrb[9].mxu1  ;;  %v5282_v1 = vld [vmem:[%s6643_s4 + $0x48] sm:$0xff] }
 0x30e   :  { %v417_v4 = vpop.f32.mrb[10].mxu1 }
 0x30f   :  { %v5164_v5 = vpack.c.bf16 %v415_v2, %v415_v2  ;;  %v4188_v6 = vpop.f32.mrb[11].mxu1 }
 0x311   :  { %658 = vrot.lane.b32.xlu1 %v5164_v5, %s4926_s8  ;;  %4567 = vmatprep.subr.msk.bf16.mxu1 %vm504_vm5, %v5164_v5  ;;  %v506_v7 = vsel %vm504_vm5, %v5164_v5, 0 }
 0x312   :  { %4194 = vmatpush3.bf16.msra.mxu1 %v506_v7 }
 0x315   :  { %4196 = vmatmul.mubr.msk.bf16.vlgmr.msra.gmra.mrb[12].mxu1 %vm473_vm4, %v4589_v8 }
 0x316   :  { %4199 = vmatprep.mubr.msk.bf16.mxu1 %vm473_vm4, %v4590_v9 }
 0x31d   :  { %4200 = vmatmul.mubr.msk.bf16.gmra.mrb[16].mxu1 %vm473_vm4, %v4591_v10  ;;  %v108_v10 = vld [vmem:[%s6643_s4 + $0x70] sm:$0xff] }
 0x31e   :  { %4203 = vmatprep.mubr.msk.bf16.mxu1 %vm473_vm4, %v4592_v11  ;;  %v5293_v11 = vld [vmem:[%s6643_s4 + $0x60] sm:$0xff] }
 0x325   :  { %4204 = vmatmul.mubr.msk.bf16.gmra.mrb[20].mxu1 %vm473_vm4, %v4593_v12 }
 0x326   :  { %4207 = vmatprep.mubr.msk.bf16.mxu1 %vm473_vm4, %v4594_v13  ;;  %v5299_v13 = vld [vmem:[%s6643_s4 + $0x78] sm:$0xff] }
 0x32d   :  { %4208 = vmatmul.mubr.msk.bf16.gmra.mrb[24].mxu1 %vm473_vm4, %v4595_v14 }
 0x32e   :  { %4211 = vmatprep.mubr.msk.bf16.mxu1 %vm473_vm4, %v4596_v16 }
 0x335   :  { %4212 = vmatmul.mubr.msk.bf16.gmra.mrb[28].mxu1 %vm473_vm4, %v4597_v17  ;;  %v5305_v17 = vld [vmem:[%s6643_s4 + $0x68] sm:$0xff] }
 0x375   :  { %v655_v19 = vpop.permute.xlu0 %654 }
 0x376   :  { %4568 = vmatprep.subr.msk.bf16.mxu0 %vm239_vm2, %v655_v19  ;;  %v691_v20 = vsel %vm239_vm2, %v655_v19, 0 }
 0x377   :  { %4216 = vmatpush3.bf16.xpose.msra.mxu0 %v691_v20 }
 0x37d   :  { %v657_v21 = vpop.permute.xlu1 %656 }
 0x37e   :  { %4569 = vmatprep.subr.msk.bf16.mxu0 %vm239_vm2, %v657_v21  ;;  %v694_v22 = vsel %vm239_vm2, %v657_v21, 0 }
 0x37f   :  { %4218 = vmatpush3.bf16.xpose.msra.mxu0 %v694_v22 }
 0x383   :  { %v659_v23 = vpop.permute.xlu1 %658 }
 0x384   :  { %4570 = vmatprep.subr.msk.bf16.mxu0 %vm239_vm2, %v659_v23  ;;  %v697_v24 = vsel %vm239_vm2, %v659_v23, 0 }
 0x387   :  { %4220 = vmatpush3.bf16.xpose.msra.mxu0 %v697_v24 }
 0x3e8   :  { %v4197_v27 = vpop.f32.mrb[12].mxu1 }
 0x3e9   :  { %v542_v31 = vpop.f32.mrb[13].mxu1  ;;  %v623_v35 = vmul.f32 %v4197_v27, %v5217_v26 }
 0x3ea   :  { %v4198_v33 = vpop.f32.mrb[14].mxu1  ;;  %v621_v38 = vmul.f32 %v542_v31, %v5227_v30  ;;  %v5313_v31 = vld [vmem:[%s6643_s4 + $0x90] sm:$0xff] }
 0x3eb   :  { %v624_v36 = vmul.f32 %v4198_v33, %v5222_v29  ;;  %v545_v37 = vpop.f32.mrb[15].mxu1  ;;  %v5318_v33 = vld [vmem:[%s6643_s4 + $0x80] sm:$0xff] }
 0x3ec   :  { %v622_v39 = vmul.f32 %v545_v37, %v5232_v32 }
 0x3ed   :  { %v642_v40 = vpack.c.bf16 %v624_v36, %v623_v35  ;;  %v5324_v36 = vld [vmem:[%s6643_s4 + $0x98] sm:$0xff] }
 0x3ee   :  { %v641_v41 = vpack.c.bf16 %v622_v39, %v621_v38  ;;  %v5331_v39 = vld [vmem:[%s6643_s4 + $0x88] sm:$0xff] }
 0x3f0   :  { %v4201_v43 = vpop.f32.mrb[16].mxu1  ;;  %4221 = vmatprep.mubr.msk.bf16.mxu0 %vm239_vm2, %v641_v41 }
 0x3f1   :  { %v627_v45 = vmul.f32 %v4201_v43, %v5241_v42  ;;  %v558_v47 = vpop.f32.mrb[17].mxu1  ;;  %4222 = vmatmul.mubr.msk.bf16.vlgmr.msra.gmra.mrb[12].mxu0 %vm239_vm2, %v642_v40 }
 0x3f2   :  { %v4202_v49 = vpop.f32.mrb[18].mxu1  ;;  %v625_v52 = vmul.f32 %v558_v47, %v5251_v46 }
 0x3f3   :  { %v628_v50 = vmul.f32 %v4202_v49, %v101_v44  ;;  %v561_v51 = vpop.f32.mrb[19].mxu1 }
 0x3f4   :  { %v626_v53 = vmul.f32 %v561_v51, %v5257_v48  ;;  %v114_v51 = vld [vmem:[%s6644_s5] sm:$0xff] }
 0x3f5   :  { %v644_v54 = vpack.c.bf16 %v628_v50, %v627_v45  ;;  %v116_v50 = vld [vmem:[%s6644_s5 + $0x10] sm:$0xff] }
 0x3f6   :  { %v643_v55 = vpack.c.bf16 %v626_v53, %v625_v52 }
 0x3f8   :  { %4225 = vmatprep.mubr.msk.bf16.mxu0 %vm239_vm2, %v643_v55  ;;  %v4205_v59 = vpop.f32.mrb[20].mxu1  ;;  %v115_v55 = vld [vmem:[%s6644_s5 + $0x8] sm:$0xff] }
 0x3f9   :  { %4226 = vmatmul.mubr.msk.bf16.gmra.mrb[16].mxu0 %vm239_vm2, %v644_v54  ;;  %v631_v61 = vmul.f32 %v4205_v59, %v5264_v57  ;;  %v574_v62 = vpop.f32.mrb[21].mxu1 }
 0x3fa   :  { %v629_v2 = vmul.f32 %v574_v62, %v5269_v58  ;;  %v4206_v3 = vpop.f32.mrb[22].mxu1 }
 0x3fb   :  { %v632_v4 = vmul.f32 %v4206_v3, %v5275_v60  ;;  %v577_v6 = vpop.f32.mrb[23].mxu1  ;;  %v117_v3 = vld [vmem:[%s6644_s5 + $0x18] sm:$0xff] }
 0x3fc   :  { %v630_v7 = vmul.f32 %v577_v6, %v5282_v1 }
 0x3fd   :  { %v646_v8 = vpack.c.bf16 %v632_v4, %v631_v61 }
 0x3fe   :  { %v645_v9 = vpack.c.bf16 %v630_v7, %v629_v2  ;;  %v120_v7 = vld [vmem:[%s6644_s5 + $0x30] sm:$0xff] }
 0x400   :  { %v4209_v12 = vpop.f32.mrb[24].mxu1  ;;  %4229 = vmatprep.mubr.msk.bf16.mxu0 %vm239_vm2, %v645_v9 }
 0x401   :  { %v635_v14 = vmul.f32 %v4209_v12, %v108_v10  ;;  %v590_v16 = vpop.f32.mrb[25].mxu1  ;;  %4230 = vmatmul.mubr.msk.bf16.gmra.mrb[20].mxu0 %vm239_vm2, %v646_v8  ;;  %v118_v12 = vld [vmem:[%s6644_s5 + $0x20] sm:$0xff] }
 0x402   :  { %v633_v19 = vmul.f32 %v590_v16, %v5293_v11  ;;  %v4210_v20 = vpop.f32.mrb[26].mxu1 }
 0x403   :  { %v636_v21 = vmul.f32 %v4210_v20, %v5299_v13  ;;  %v593_v22 = vpop.f32.mrb[27].mxu1 }
 0x404   :  { %v634_v23 = vmul.f32 %v593_v22, %v5305_v17 }
 0x405   :  { %v648_v24 = vpack.c.bf16 %v636_v21, %v635_v14 }
 0x406   :  { %v647_v27 = vpack.c.bf16 %v634_v23, %v633_v19  ;;  %v119_v19 = vld [vmem:[%s6644_s5 + $0x28] sm:$0xff] }
 0x408   :  { %v4213_v35 = vpop.f32.mrb[28].mxu1  ;;  %4233 = vmatprep.mubr.msk.bf16.mxu0 %vm239_vm2, %v647_v27  ;;  %v121_v27 = vld [vmem:[%s6644_s5 + $0x38] sm:$0xff] }
 0x409   :  { %v639_v37 = vmul.f32 %v4213_v35, %v5313_v31  ;;  %v606_v38 = vpop.f32.mrb[29].mxu1  ;;  %4234 = vmatmul.mubr.msk.bf16.gmra.mrb[24].mxu0 %vm239_vm2, %v648_v24 }
 0x40a   :  { %v637_v40 = vmul.f32 %v606_v38, %v5318_v33  ;;  %v4214_v41 = vpop.f32.mrb[30].mxu1 }
 0x40b   :  { %v640_v43 = vmul.f32 %v4214_v41, %v5324_v36  ;;  %v609_v44 = vpop.f32.mrb[31].mxu1 }
 0x40c   :  { %v638_v45 = vmul.f32 %v609_v44, %v5331_v39 }
 0x40d   :  { %v650_v47 = vpack.c.bf16 %v640_v43, %v639_v37  ;;  %v125_v43 = vld [vmem:[%s6644_s5 + $0x58] sm:$0xff] }
 0x40e   :  { %v649_v49 = vpack.c.bf16 %v638_v45, %v637_v40 }
 0x410   :  { %4237 = vmatprep.mubr.msk.bf16.mxu0 %vm239_vm2, %v649_v49 }
 0x411   :  { %4238 = vmatmul.mubr.msk.bf16.gmra.mrb[28].mxu0 %vm239_vm2, %v650_v47  ;;  %v123_v47 = vld [vmem:[%s6644_s5 + $0x48] sm:$0xff] }
 0x4c4   :  { %v4223_v52 = vpop.f32.mrb[12].mxu0 }
 0x4c5   :  { %v5344_v53 = vadd.f32 %v4223_v52, %v116_v50  ;;  %v733_v54 = vpop.f32.mrb[13].mxu0 }
 0x4c6   :  { %v5349_v59 = vadd.f32 %v733_v54, %v114_v51  ;;  %v4224_v61 = vpop.f32.mrb[14].mxu0 }
 0x4c7   :  { %v736_v62 = vpop.f32.mrb[15].mxu0  ;;  %v818_v2 = vsel %vm473_vm4, %v5344_v53, -inf  ;;  %v5365_v9 = vadd.f32 %v4224_v61, %v117_v3  ;;  %v129_v61 = vld [vmem:[%s6644_s5 + $0x78] sm:$0xff] }
 0x4c8   :  { %v5356_v4 = vadd.f32 %v736_v62, %v115_v55  ;;  %819 = vmax.xlane.f32.xlu0 %v818_v2  ;;  %v812_v6 = vsel %vm473_vm4, %v5349_v59, -inf }
 0x4c9   :  { %813 = vmax.xlane.f32.xlu1 %v812_v6  ;;  %v821_v23 = vsel %vm473_vm4, %v5365_v9, -inf  ;;  %v127_v6 = vld [vmem:[%s6644_s5 + $0x68] sm:$0xff] }
 0x4ca   :  { %v815_v8 = vsel %vm473_vm4, %v5356_v4, -inf }
 0x4cc   :  { %v4227_v10 = vpop.f32.mrb[16].mxu0  ;;  %816 = vmax.xlane.f32.xlu0 %v815_v8 }
 0x4cd   :  { %v5370_v14 = vadd.f32 %v4227_v10, %v120_v7  ;;  %v749_v16 = vpop.f32.mrb[17].mxu0 }
 0x4ce   :  { %v4228_v20 = vpop.f32.mrb[18].mxu0  ;;  %v5375_v21 = vadd.f32 %v749_v16, %v118_v12 }
 0x4cf   :  { %v752_v22 = vpop.f32.mrb[19].mxu0  ;;  %v830_v24 = vsel %vm473_vm4, %v5370_v14, -inf  ;;  %v5388_v38 = vadd.f32 %v4228_v20, %v121_v27 }
 0x4d0   :  { %v5384_v35 = vadd.f32 %v752_v22, %v119_v19  ;;  %822 = vmax.xlane.f32.xlu0 %v821_v23  ;;  %831 = vmax.xlane.f32.xlu1 %v830_v24  ;;  %v824_v40 = vsel %vm473_vm4, %v5375_v21, -inf  ;;  %v133_v19 = vld [vmem:[%s6644_s5 + $0x98] sm:$0xff]  ;;  %v131_v24 = vld [vmem:[%s6644_s5 + $0x88] sm:$0xff] }
 0x4d1   :  { %v833_v50 = vsel %vm473_vm4, %v5388_v38, -inf }
 0x4d2   :  { %v827_v37 = vsel %vm473_vm4, %v5384_v35, -inf }
 0x4d4   :  { %828 = vmax.xlane.f32.xlu0 %v827_v37  ;;  %825 = vmax.xlane.f32.xlu1 %v824_v40  ;;  %v4231_v41 = vpop.f32.mrb[20].mxu0 }
 0x4d5   :  { %v765_v44 = vpop.f32.mrb[21].mxu0 }
 0x4d6   :  { %v4232_v45 = vpop.f32.mrb[22].mxu0 }
 0x4d7   :  { %v5398_v49 = vadd.f32 %v4232_v45, %v125_v43  ;;  %v768_v51 = vpop.f32.mrb[23].mxu0  ;;  %v124_v45 = vld [vmem:[%s6644_s5 + $0x50] sm:$0xff] }
 0x4d8   :  { %834 = vmax.xlane.f32.xlu0 %v833_v50  ;;  %v5402_v52 = vadd.f32 %v768_v51, %v123_v47  ;;  %v5441_v47 = vadd.f32 %v4231_v41, %v124_v45  ;;  %v122_v50 = vld [vmem:[%s6644_s5 + $0x40] sm:$0xff]  ;;  %v128_v51 = vld [vmem:[%s6644_s5 + $0x70] sm:$0xff] }
 0x4d9   :  { %v845_v54 = vsel %vm473_vm4, %v5398_v49, -inf }
 0x4da   :  { %v839_v2 = vsel %vm473_vm4, %v5402_v52, -inf }
 0x4dc   :  { %846 = vmax.xlane.f32.xlu0 %v845_v54  ;;  %v4235_v55 = vpop.f32.mrb[24].mxu0  ;;  %v5449_v54 = vadd.f32 %v765_v44, %v122_v50  ;;  %v132_v44 = vld [vmem:[%s6644_s5 + $0x90] sm:$0xff] }
 0x4dd   :  { %v781_v62 = vpop.f32.mrb[25].mxu0 }
 0x4de   :  { %v4236_v3 = vpop.f32.mrb[26].mxu0  ;;  %v836_v41 = vsel %vm473_vm4, %v5449_v54, -inf }
 0x4df   :  { %v5414_v7 = vadd.f32 %v4236_v3, %v129_v61  ;;  %v784_v8 = vpop.f32.mrb[27].mxu0  ;;  %v842_v61 = vsel %vm473_vm4, %v5441_v47, -inf  ;;  %v126_v3 = vld [vmem:[%s6644_s5 + $0x60] sm:$0xff] }
 0x4e0   :  { %840 = vmax.xlane.f32.xlu0 %v839_v2  ;;  %v5416_v10 = vadd.f32 %v784_v8, %v127_v6  ;;  %v5453_v2 = vadd.f32 %v4235_v55, %v128_v51  ;;  %v5465_v8 = vadd.f32 %v781_v62, %v126_v3 }
 0x4e1   :  { %v857_v12 = vsel %vm473_vm4, %v5414_v7, -inf }
 0x4e2   :  { %v851_v22 = vsel %vm473_vm4, %v5416_v10, -inf  ;;  %v854_v6 = vsel %vm473_vm4, %v5453_v2, -inf }
 0x4e4   :  { %858 = vmax.xlane.f32.xlu0 %v857_v12  ;;  %v4239_v16 = vpop.f32.mrb[28].mxu0  ;;  %v848_v12 = vsel %vm473_vm4, %v5465_v8, -inf }
 0x4e5   :  { %1042 = vrot.lane.b32.xlu1 %v5152_v56, %s4927_s0  ;;  %v797_v20 = vpop.f32.mrb[29].mxu0  ;;  %v5467_v55 = vadd.f32 %v4239_v16, %v132_v44 }
 0x4e6   :  { %v4240_v23 = vpop.f32.mrb[30].mxu0 }
 0x4e7   :  { %v5430_v27 = vadd.f32 %v4240_v23, %v133_v19  ;;  %v800_v37 = vpop.f32.mrb[31].mxu0  ;;  %v130_v19 = vld [vmem:[%s6644_s5 + $0x80] sm:$0xff] }
 0x4e8   :  { %852 = vmax.xlane.f32.xlu0 %v851_v22  ;;  %v5432_v40 = vadd.f32 %v800_v37, %v131_v24  ;;  %v866_v22 = vsel %vm473_vm4, %v5467_v55, -inf  ;;  %v5476_v23 = vadd.f32 %v797_v20, %v130_v19 }
 0x4e9   :  { %v869_v43 = vsel %vm473_vm4, %v5430_v27, -inf }
 0x4ea   :  { %v863_v56 = vsel %vm473_vm4, %v5432_v40, -inf  ;;  %v860_v62 = vsel %vm473_vm4, %v5476_v23, -inf }
 0x4ec   :  { %870 = vmax.xlane.f32.xlu0 %v869_v43 }
 0x4f0   :  { %864 = vmax.xlane.f32.xlu0 %v863_v56 }
 0x509   :  { %843 = vmax.xlane.f32.xlu1 %v842_v61 }
 0x50d   :  { %837 = vmax.xlane.f32.xlu1 %v836_v41 }
 0x511   :  { %855 = vmax.xlane.f32.xlu1 %v854_v6 }
 0x515   :  { %849 = vmax.xlane.f32.xlu1 %v848_v12 }
 0x519   :  { %867 = vmax.xlane.f32.xlu1 %v866_v22 }
 0x51d   :  { %861 = vmax.xlane.f32.xlu1 %v860_v62 }
 0x555   :  { %v820_v16 = vpop.xlane.xlu0 %819 }
 0x556   :  { %v874_v24 = vsub.f32 %v5344_v53, %v820_v16  ;;  %v814_v37 = vpop.xlane.xlu1 %813 }
 0x557   :  { %v872_v43 = vsub.f32 %v5349_v59, %v814_v37 }
 0x558   :  { %v896_v56 = vmul.f32 1.442695, %v874_v24 }
 0x559   :  { %v892_v45 = vmul.f32 1.442695, %v872_v43  ;;  %v817_v50 = vpop.xlane.xlu0 %816 }
 0x55a   :  { %4638 = vpow2.f32 %v896_v56  ;;  %v873_v51 = vsub.f32 %v5356_v4, %v817_v50 }
 0x55b   :  { %4640 = vpow2.f32 %v892_v45 }
 0x55c   :  { %v894_v3 = vmul.f32 1.442695, %v873_v51 }
 0x55d   :  { %v823_v20 = vpop.xlane.xlu0 %822  ;;  %v832_v61 = vpop.xlane.xlu1 %831 }
 0x55e   :  { %v875_v41 = vsub.f32 %v5365_v9, %v823_v20  ;;  %v878_v44 = vsub.f32 %v5370_v14, %v832_v61 }
 0x560   :  { %v898_v6 = vmul.f32 1.442695, %v875_v41  ;;  %v904_v22 = vmul.f32 1.442695, %v878_v44 }
 0x561   :  { %v829_v12 = vpop.xlane.xlu0 %828  ;;  %v826_v53 = vpop.xlane.xlu1 %825 }
 0x562   :  { %4642 = vpow2.f32 %v898_v6  ;;  %v876_v59 = vsub.f32 %v5375_v21, %v826_v53  ;;  %v877_v14 = vsub.f32 %v5384_v35, %v829_v12 }
 0x563   :  { %4644 = vpow2.f32 %v894_v3 }
 0x564   :  { %v5486_v19 = vpop.eup %4638  ;;  %v900_v62 = vmul.f32 1.442695, %v876_v59  ;;  %v902_v45 = vmul.f32 1.442695, %v877_v14 }
 0x565   :  { %v835_v16 = vpop.xlane.xlu0 %834  ;;  %v1043_v4 = vpop.permute.xlu1 %1042  ;;  %v938_v24 = vsel %vm473_vm4, %v5486_v19, 0.0 }
 0x566   :  { %v5490_v9 = vpop.eup %4640  ;;  %v879_v37 = vsub.f32 %v5388_v38, %v835_v16  ;;  %939 = vadd.xlane.f32.xlu1 %v938_v24  ;;  %4241 = vmatprep.subr.bf16.mxu0 %v1043_v4  ;;  %4646 = vpow2.f32 %v900_v62 }
 0x567   :  { %4561 = vmatprep.subr.bf16.mxu1 %v1043_v4  ;;  %4242 = vmatpush3.bf16.msra.mxu0 %v1043_v4  ;;  %4648 = vpow2.f32 %v904_v22  ;;  %v932_v43 = vsel %vm473_vm4, %v5490_v9, 0.0 }
 0x568   :  { %v906_v21 = vmul.f32 1.442695, %v879_v37  ;;  %4564 = vmatpush3.bf16.msra.mxu1 %v1043_v4 }
 0x569   :  { %v847_v53 = vpop.xlane.xlu0 %846 }
 0x56a   :  { %933 = vadd.xlane.f32.xlu1 %v932_v43  ;;  %4650 = vpow2.f32 %v906_v21  ;;  %v883_v14 = vsub.f32 %v5398_v49, %v847_v53 }
 0x56b   :  { %4652 = vpow2.f32 %v902_v45 }
 0x56c   :  { %v5496_v56 = vpop.eup %4642 }
 0x56d   :  { %v941_v38 = vsel %vm473_vm4, %v5496_v56, 0.0  ;;  %v5500_v50 = vpop.eup %4644  ;;  %v841_v59 = vpop.xlane.xlu0 %840 }
 0x56e   :  { %942 = vadd.xlane.f32.xlu0 %v941_v38  ;;  %v935_v35 = vsel %vm473_vm4, %v5500_v50, 0.0  ;;  %v881_v21 = vsub.f32 %v5402_v52, %v841_v59 }
 0x570   :  { %v5502_v51 = vpop.eup %4646 }
 0x571   :  { %v5506_v20 = vpop.eup %4648  ;;  %v944_v61 = vsel %vm473_vm4, %v5502_v51, 0.0  ;;  %v859_v22 = vpop.xlane.xlu0 %858 }
 0x572   :  { %936 = vadd.xlane.f32.xlu0 %v935_v35  ;;  %945 = vadd.xlane.f32.xlu1 %v944_v61  ;;  %v950_v41 = vsel %vm473_vm4, %v5506_v20, 0.0  ;;  %v914_v35 = vmul.f32 1.442695, %v883_v14 }
 0x574   :  { %v5512_v3 = vpop.eup %4650 }
 0x575   :  { %v953_v6 = vsel %vm473_vm4, %v5512_v3, 0.0  ;;  %v5516_v44 = vpop.eup %4652  ;;  %v853_v16 = vpop.xlane.xlu0 %852 }
 0x576   :  { %951 = vadd.xlane.f32.xlu0 %v950_v41  ;;  %v947_v12 = vsel %vm473_vm4, %v5516_v44, 0.0  ;;  %v885_v61 = vsub.f32 %v5416_v10, %v853_v16 }
 0x579   :  { %v871_v38 = vpop.xlane.xlu0 %870 }
 0x57a   :  { %954 = vadd.xlane.f32.xlu0 %v953_v6  ;;  %v918_v6 = vmul.f32 1.442695, %v885_v61 }
 0x57d   :  { %v865_v49 = vpop.xlane.xlu0 %864 }
 0x57e   :  { %948 = vadd.xlane.f32.xlu0 %v947_v12 }
 0x583   :  { %1046 = vrot.lane.b32.xlu1 %v5164_v5, %s4927_s0 }
 0x594   :  { %1044 = vrot.lane.b32.xlu0 %v5158_v63, %s4927_s0  ;;  %v910_v63 = vmul.f32 1.442695, %v881_v21 }
 0x596   :  { %v844_v62 = vpop.xlane.xlu1 %843 }
 0x597   :  { %v882_v4 = vsub.f32 %v5441_v47, %v844_v62  ;;  %v889_v62 = vsub.f32 %v5432_v40, %v865_v49 }
 0x599   :  { %v912_v43 = vmul.f32 1.442695, %v882_v4 }
 0x59a   :  { %v838_v24 = vpop.xlane.xlu1 %837 }
 0x59b   :  { %v880_v37 = vsub.f32 %v5449_v54, %v838_v24  ;;  %v887_v54 = vsub.f32 %v5414_v7, %v859_v22  ;;  %v926_v24 = vmul.f32 1.442695, %v889_v62 }
 0x59d   :  { %v908_v45 = vmul.f32 1.442695, %v880_v37  ;;  %v922_v59 = vmul.f32 1.442695, %v887_v54 }
 0x59e   :  { %v856_v5 = vpop.xlane.xlu1 %855 }
 0x59f   :  { %4654 = vpow2.f32 %v908_v45  ;;  %v886_v52 = vsub.f32 %v5453_v2, %v856_v5  ;;  %v891_v2 = vsub.f32 %v5430_v27, %v871_v38 }
 0x5a0   :  { %4656 = vpow2.f32 %v912_v43 }
 0x5a1   :  { %4658 = vpow2.f32 %v914_v35  ;;  %v920_v16 = vmul.f32 1.442695, %v886_v52  ;;  %v930_v45 = vmul.f32 1.442695, %v891_v2 }
 0x5a2   :  { %v850_v41 = vpop.xlane.xlu1 %849  ;;  %4660 = vpow2.f32 %v910_v63 }
 0x5a3   :  { %v884_v47 = vsub.f32 %v5465_v8, %v850_v41  ;;  %4662 = vpow2.f32 %v918_v6 }
 0x5a5   :  { %v916_v12 = vmul.f32 1.442695, %v884_v47 }
 0x5a6   :  { %v868_v53 = vpop.xlane.xlu1 %867 }
 0x5a7   :  { %4664 = vpow2.f32 %v916_v12  ;;  %v890_v40 = vsub.f32 %v5467_v55, %v868_v53 }
 0x5a8   :  { %4666 = vpow2.f32 %v922_v59 }
 0x5a9   :  { %v5533_v10 = vpop.eup %4654  ;;  %4668 = vpow2.f32 %v920_v16 }
 0x5aa   :  { %v862_v4 = vpop.xlane.xlu1 %861  ;;  %v956_v8 = vsel %vm473_vm4, %v5533_v10, 0.0  ;;  %v5537_v7 = vpop.eup %4656  ;;  %4670 = vpow2.f32 %v926_v24 }
 0x5ab   :  { %v888_v22 = vsub.f32 %v5476_v23, %v862_v4  ;;  %957 = vadd.xlane.f32.xlu1 %v956_v8  ;;  %v5542_v14 = vpop.eup %4658  ;;  %v962_v21 = vsel %vm473_vm4, %v5537_v7, 0.0  ;;  %v928_v23 = vmul.f32 1.442695, %v890_v40 }
 0x5ac   :  { %v5546_v43 = vpop.eup %4660  ;;  %v965_v55 = vsel %vm473_vm4, %v5542_v14, 0.0 }
 0x5ad   :  { %v924_v37 = vmul.f32 1.442695, %v888_v22  ;;  %v5548_v5 = vpop.eup %4662  ;;  %v959_v27 = vsel %vm473_vm4, %v5546_v43, 0.0 }
 0x5ae   :  { %v971_v61 = vsel %vm473_vm4, %v5548_v5, 0.0 }
 0x5af   :  { %963 = vadd.xlane.f32.xlu1 %v962_v21  ;;  %4672 = vpow2.f32 %v924_v37 }
 0x5b0   :  { %4674 = vpow2.f32 %v930_v45 }
 0x5b1   :  { %v5554_v38 = vpop.eup %4664  ;;  %4676 = vpow2.f32 %v928_v23 }
 0x5b2   :  { %v5556_v35 = vpop.eup %4666  ;;  %v968_v63 = vsel %vm473_vm4, %v5554_v38, 0.0 }
 0x5b3   :  { %960 = vadd.xlane.f32.xlu0 %v959_v27  ;;  %966 = vadd.xlane.f32.xlu1 %v965_v55  ;;  %v5562_v41 = vpop.eup %4668  ;;  %v977_v54 = vsel %vm473_vm4, %v5556_v35, 0.0 }
 0x5b4   :  { %v5564_v47 = vpop.eup %4670  ;;  %v974_v6 = vsel %vm473_vm4, %v5562_v41, 0.0 }
 0x5b5   :  { %v983_v12 = vsel %vm473_vm4, %v5564_v47, 0.0 }
 0x5b7   :  { %972 = vadd.xlane.f32.xlu1 %v971_v61  ;;  %969 = vadd.xlane.f32.xlu0 %v968_v63 }
 0x5b9   :  { %v5570_v49 = vpop.eup %4672 }
 0x5ba   :  { %v5572_v52 = vpop.eup %4674  ;;  %v980_v53 = vsel %vm473_vm4, %v5570_v49, 0.0 }
 0x5bb   :  { %978 = vadd.xlane.f32.xlu1 %v977_v54  ;;  %975 = vadd.xlane.f32.xlu0 %v974_v6  ;;  %v5578_v59 = vpop.eup %4676  ;;  %v989_v62 = vsel %vm473_vm4, %v5572_v52, 0.0 }
 0x5bc   :  { %v986_v16 = vsel %vm473_vm4, %v5578_v59, 0.0 }
 0x5bf   :  { %984 = vadd.xlane.f32.xlu1 %v983_v12  ;;  %981 = vadd.xlane.f32.xlu0 %v980_v53 }
 0x5c3   :  { %990 = vadd.xlane.f32.xlu1 %v989_v62  ;;  %987 = vadd.xlane.f32.xlu0 %v986_v16 }
 0x5f3   :  { %v940_v4 = vpop.xlane.xlu1 %939 }
 0x5f7   :  { %v934_v8 = vpop.xlane.xlu1 %933 }
 0x5f8   :  { %4678 = vrcp.f32 %v934_v8 }
 0x5fb   :  { %v943_v22 = vpop.xlane.xlu0 %942 }
 0x5ff   :  { %v937_v2 = vpop.xlane.xlu0 %936  ;;  %v946_v40 = vpop.xlane.xlu1 %945 }
 0x600   :  { %4680 = vrcp.f32 %v937_v2 }
 0x601   :  { %4682 = vrcp.f32 %v943_v22 }
 0x602   :  { %4684 = vrcp.f32 %v940_v4  ;;  %v4679_v21 = vpop.eup %4678 }
 0x603   :  { %v952_v24 = vpop.xlane.xlu0 %951  ;;  %v1012_v27 = vmul.f32 %v4679_v21, %v5490_v9  ;;  %v1047_v12 = vpop.permute.xlu1 %1046 }
 0x604   :  { %v1081_v16 = vsel %vm504_vm5, %v1047_v12, 0 }
 0x607   :  { %v955_v37 = vpop.xlane.xlu0 %954 }
 0x608   :  { %4686 = vrcp.f32 %v955_v37 }
 0x609   :  { %4688 = vrcp.f32 %v946_v40 }
 0x60a   :  { %v4681_v45 = vpop.eup %4680  ;;  %4690 = vrcp.f32 %v952_v24 }
 0x60b   :  { %v949_v23 = vpop.xlane.xlu0 %948  ;;  %v1013_v55 = vmul.f32 %v4681_v45, %v5500_v50  ;;  %v4683_v63 = vpop.eup %4682 }
 0x60c   :  { %4692 = vrcp.f32 %v949_v23  ;;  %v4685_v6 = vpop.eup %4684  ;;  %v1015_v53 = vmul.f32 %v4683_v63, %v5496_v56 }
 0x60d   :  { %v1032_v61 = vpack.c.bf16 %v1013_v55, %v1012_v27  ;;  %v1014_v62 = vmul.f32 %v4685_v6, %v5486_v19 }
 0x60f   :  { %v1045_v54 = vpop.permute.xlu0 %1044  ;;  %4247 = vmatprep.mubr.msk.bf16.mxu0 %vm473_vm4, %v1032_v61  ;;  %v1033_v22 = vpack.c.bf16 %v1015_v53, %v1014_v62 }
 0x610   :  { %4243 = vmatprep.subr.bf16.mxu0 %v1045_v54  ;;  %4562 = vmatprep.subr.bf16.mxu1 %v1045_v54 }
 0x611   :  { %4244 = vmatpush3.bf16.msra.mxu0 %v1045_v54  ;;  %4565 = vmatpush3.bf16.msra.mxu1 %v1045_v54 }
 0x612   :  { %4571 = vmatprep.subr.msk.bf16.mxu0 %vm504_vm5, %v1047_v12  ;;  %4572 = vmatprep.subr.msk.bf16.mxu1 %vm504_vm5, %v1047_v12  ;;  %v4687_v9 = vpop.eup %4686 }
 0x613   :  { %v4689_v50 = vpop.eup %4688  ;;  %v1019_v2 = vmul.f32 %v4687_v9, %v5512_v3 }
 0x614   :  { %v4691_v4 = vpop.eup %4690  ;;  %v1016_v56 = vmul.f32 %v4689_v50, %v5502_v51 }
 0x615   :  { %4246 = vmatpush3.bf16.msra.mxu0 %v1081_v16  ;;  %4566 = vmatpush3.bf16.msra.mxu1 %v1081_v16  ;;  %v1018_v40 = vmul.f32 %v4691_v4, %v5506_v20 }
 0x616   :  { %v4693_v8 = vpop.eup %4692  ;;  %4267 = vmatprep.subr.bf16.mxu0 %v4924_v0  ;;  %4299 = vmatprep.subr.bf16.mxu1 %v4924_v0 }
 0x617   :  { %v1017_v24 = vmul.f32 %v4693_v8, %v5516_v44  ;;  %v1035_v37 = vpack.c.bf16 %v1019_v2, %v1018_v40 }
 0x618   :  { %4248 = vmatmul.mubr.msk.bf16.vlgmr.msra.gmra.mrb[32].mxu0 %vm473_vm4, %v1033_v22 }
 0x619   :  { %v1034_v19 = vpack.c.bf16 %v1017_v24, %v1016_v56  ;;  %4271 = vmatprep.mubr.msk.bf16.mxu0 %vm4925_vm0, %v4924_v0 }
 0x61b   :  { %4251 = vmatprep.mubr.msk.bf16.mxu1 %vm473_vm4, %v1034_v19 }
 0x61c   :  { %4252 = vmatmul.mubr.msk.bf16.vlgmr.msra.gmra.mrb[32].mxu1 %vm473_vm4, %v1035_v37 }
 0x638   :  { %v958_v3 = vpop.xlane.xlu1 %957 }
 0x639   :  { %4694 = vrcp.f32 %v958_v3 }
 0x63c   :  { %v964_v21 = vpop.xlane.xlu1 %963 }
 0x63d   :  { %4696 = vrcp.f32 %v964_v21 }
 0x640   :  { %v961_v51 = vpop.xlane.xlu0 %960  ;;  %v967_v45 = vpop.xlane.xlu1 %966 }
 0x641   :  { %4698 = vrcp.f32 %v961_v51 }
 0x642   :  { %4700 = vrcp.f32 %v967_v45 }
 0x643   :  { %v4695_v55 = vpop.eup %4694 }
 0x644   :  { %v970_v20 = vpop.xlane.xlu0 %969  ;;  %v973_v44 = vpop.xlane.xlu1 %972  ;;  %v1020_v53 = vmul.f32 %v4695_v55, %v5533_v10 }
 0x645   :  { %4702 = vrcp.f32 %v970_v20 }
 0x646   :  { %4704 = vrcp.f32 %v973_v44 }
 0x647   :  { %v4697_v61 = vpop.eup %4696 }
 0x648   :  { %v976_v23 = vpop.xlane.xlu0 %975  ;;  %v979_v27 = vpop.xlane.xlu1 %978  ;;  %v1022_v50 = vmul.f32 %v4697_v61, %v5537_v7 }
 0x649   :  { %4706 = vrcp.f32 %v976_v23 }
 0x64a   :  { %4708 = vrcp.f32 %v979_v27 }
 0x64b   :  { %v4699_v63 = vpop.eup %4698 }
 0x64c   :  { %v4701_v54 = vpop.eup %4700  ;;  %v982_v6 = vpop.xlane.xlu0 %981  ;;  %v1021_v9 = vmul.f32 %v4699_v63, %v5546_v43 }
 0x64d   :  { %v985_v12 = vpop.xlane.xlu1 %984  ;;  %4710 = vrcp.f32 %v982_v6  ;;  %v1023_v62 = vmul.f32 %v4701_v54, %v5542_v14 }
 0x64e   :  { %4712 = vrcp.f32 %v985_v12  ;;  %v1036_v16 = vpack.c.bf16 %v1021_v9, %v1020_v53 }
 0x64f   :  { %v4703_v4 = vpop.eup %4702  ;;  %v1037_v8 = vpack.c.bf16 %v1023_v62, %v1022_v50  ;;  %v4600_v62 = vld [vmem:[%s6645_s10 + $0x10] sm:$0xff]  }
 0x650   :  { %v4705_v22 = vpop.eup %4704  ;;  %v988_v2 = vpop.xlane.xlu0 %987  ;;  %4255 = vmatprep.mubr.msk.bf16.mxu1 %vm473_vm4, %v1036_v16  ;;  %v1024_v24 = vmul.f32 %v4703_v4, %v5554_v38 }
 0x651   :  { %v991_v56 = vpop.xlane.xlu1 %990  ;;  %4714 = vrcp.f32 %v988_v2  ;;  %4256 = vmatmul.mubr.msk.bf16.gmra.mrb[36].mxu1 %vm473_vm4, %v1037_v8  ;;  %v1025_v10 = vmul.f32 %v4705_v22, %v5548_v5 }
 0x652   :  { %4716 = vrcp.f32 %v991_v56 }
 0x653   :  { %v4707_v7 = vpop.eup %4706  ;;  %v1038_v43 = vpack.c.bf16 %v1025_v10, %v1024_v24  ;;  %v4872_v24 = vld [vmem:[%s6643_s4 + $0x38] sm:$0xff] }
 0x654   :  { %v4709_v14 = vpop.eup %4708  ;;  %v1026_v40 = vmul.f32 %v4707_v7, %v5562_v41 }
 0x655   :  { %4259 = vmatprep.mubr.msk.bf16.mxu1 %vm473_vm4, %v1038_v43  ;;  %v1027_v19 = vmul.f32 %v4709_v14, %v5556_v35  ;;  %v4598_v35 = vld [vmem:[%s6645_s10] sm:$0xff]  }
 0x656   :  { %4268 = vmatpush3.bf16.msra.mxu0 %v4598_v35 }
 0x657   :  { %v4711_v37 = vpop.eup %4710  ;;  %v1039_v3 = vpack.c.bf16 %v1027_v19, %v1026_v40  ;;  %4269 = vmatprep.subr.bf16.mxu0 %v4924_v0 }
 0x658   :  { %v4713_v21 = vpop.eup %4712  ;;  %v1028_v38 = vmul.f32 %v4711_v37, %v5570_v49  ;;  %v4602_v49 = vld [vmem:[%s6645_s10 + $0x20] sm:$0xff]  }
 0x659   :  { %4260 = vmatmul.mubr.msk.bf16.gmra.mrb[40].mxu1 %vm473_vm4, %v1039_v3  ;;  %v1029_v51 = vmul.f32 %v4713_v21, %v5564_v47  ;;  %v4599_v47 = vld [vmem:[%s6645_s10 + $0x8] sm:$0xff]  }
 0x65a   :  { %4270 = vmatpush3.bf16.msra.mxu0 %v4599_v47  ;;  %4300 = vmatpush3.bf16.msra.mxu1 %v4602_v49 }
 0x65b   :  { %v4715_v5 = vpop.eup %4714  ;;  %v1040_v45 = vpack.c.bf16 %v1029_v51, %v1028_v38  ;;  %4283 = vmatprep.subr.bf16.mxu0 %v4924_v0  ;;  %4301 = vmatprep.subr.bf16.mxu1 %v4924_v0 }
 0x65c   :  { %v4717_v20 = vpop.eup %4716  ;;  %v1030_v44 = vmul.f32 %v4715_v5, %v5578_v59 }
 0x65d   :  { %4263 = vmatprep.mubr.msk.bf16.mxu1 %vm473_vm4, %v1040_v45  ;;  %v1031_v41 = vmul.f32 %v4717_v20, %v5572_v52  ;;  %v4603_v52 = vld [vmem:[%s6645_s10 + $0x28] sm:$0xff]  }
 0x65e   :  { %4302 = vmatpush3.bf16.msra.mxu1 %v4603_v52 }
 0x65f   :  { %v1041_v23 = vpack.c.bf16 %v1031_v41, %v1030_v44  ;;  %4331 = vmatprep.subr.bf16.mxu1 %v4924_v0  ;;  %v4873_v41 = vld [vmem:[%s6643_s4 + $0x70] sm:$0xff] }
 0x661   :  { %4264 = vmatmul.mubr.msk.bf16.gmra.mrb[44].mxu1 %vm473_vm4, %v1041_v23 }
 0x662   :  { %4303 = vmatprep.mubr.msk.bf16.mxu1 %vm4925_vm0, %v4924_v0 }
 0x6eb   :  { %v4249_v59 = vpop.f32.mrb[32].mxu0 }
 0x6ec   :  { %v1117_v27 = vpop.f32.mrb[33].mxu0  ;;  %v1198_v61 = vmul.f32 %v4249_v59, %v5217_v26 }
 0x6ed   :  { %v4250_v55 = vpop.f32.mrb[34].mxu0  ;;  %v1196_v6 = vmul.f32 %v1117_v27, %v5227_v30 }
 0x6ee   :  { %v1199_v63 = vmul.f32 %v4250_v55, %v5222_v29  ;;  %v1120_v54 = vpop.f32.mrb[35].mxu0  ;;  %v4601_v29 = vld [vmem:[%s6645_s10 + $0x18] sm:$0xff]  }
 0x6ef   :  { %v1197_v12 = vmul.f32 %v1120_v54, %v5232_v32  ;;  %v4253_v53 = vpop.f32.mrb[32].mxu1 }
 0x6f0   :  { %v1234_v9 = vpack.c.bf16 %v1199_v63, %v1198_v61  ;;  %v1133_v50 = vpop.f32.mrb[33].mxu1  ;;  %v1202_v22 = vmul.f32 %v4253_v53, %v5241_v42 }
 0x6f1   :  { %v1233_v16 = vpack.c.bf16 %v1197_v12, %v1196_v6  ;;  %v4254_v4 = vpop.f32.mrb[34].mxu1  ;;  %v1200_v32 = vmul.f32 %v1133_v50, %v5251_v46  ;;  %v4605_v46 = vld [vmem:[%s6645_s10 + $0x38] sm:$0xff]  }
 0x6f2   :  { %v1136_v8 = vpop.f32.mrb[35].mxu1  ;;  %v1203_v10 = vmul.f32 %v4872_v24, %v4254_v4 }
 0x6f3   :  { %v1201_v26 = vmul.f32 %v1136_v8, %v5257_v48  ;;  %4272 = vmatmul.mubr.msk.bf16.vlgmr.msra.gmra.mrb[36].mxu0 %vm239_vm2, %v1233_v16  ;;  %v1235_v42 = vpack.c.bf16 %v1200_v32, %v1200_v32  ;;  %v4604_v48 = vld [vmem:[%s6645_s10 + $0x30] sm:$0xff]  }
 0x6f4   :  { %4275 = vmatprep.mubr.msk.bf16.mxu0 %vm4925_vm0, %v4924_v0  ;;  %4284 = vmatpush3.bf16.msra.mxu0 %v4600_v62 }
 0x6f5   :  { %v1324_v30 = vpack.c.bf16 %v1202_v22, %v1201_v26  ;;  %4285 = vmatprep.subr.bf16.mxu0 %v4924_v0 }
 0x6f8   :  { %4286 = vmatpush3.bf16.msra.mxu0 %v4601_v29 }
 0x6f9   :  { %4315 = vmatprep.subr.bf16.mxu0 %v4924_v0 }
 0x6fb   :  { %4276 = vmatmul.mubr.msk.bf16.gmra.mrb[40].mxu0 %vm239_vm2, %v1234_v9 }
 0x6fc   :  { %4279 = vmatprep.mubr.msk.bf16.mxu0 %vm4925_vm0, %v4924_v0 }
 0x703   :  { %4280 = vmatmul.mubr.msk.bf16.gmra.mrb[44].mxu0 %vm239_vm2, %v1235_v42 }
 0x704   :  { %4287 = vmatprep.mubr.msk.bf16.mxu0 %vm4925_vm0, %v4924_v0 }
 0x70b   :  { %4288 = vmatmul.mubr.msk.bf16.vlgmr.msra.gmra.mrb[48].mxu0 %vm239_vm2, %v1324_v30 }
 0x70c   :  { %4291 = vmatprep.mubr.msk.bf16.mxu0 %vm4925_vm0, %v4924_v0  ;;  %4316 = vmatpush3.bf16.msra.mxu0 %v4604_v48 }
 0x70d   :  { %4317 = vmatprep.subr.bf16.mxu0 %v4924_v0 }
 0x710   :  { %4318 = vmatpush3.bf16.msra.mxu0 %v4605_v46 }
 0x711   :  { %4347 = vmatprep.subr.bf16.mxu0 %v4924_v0 }
 0x724   :  { %v4257_v2 = vpop.f32.mrb[36].mxu1 }
 0x725   :  { %v1149_v56 = vpop.f32.mrb[37].mxu1  ;;  %v1206_v14 = vmul.f32 %v4257_v2, %v5264_v57 }
 0x726   :  { %v1204_v7 = vmul.f32 %v1149_v56, %v5269_v58  ;;  %v4258_v43 = vpop.f32.mrb[38].mxu1 }
 0x727   :  { %v1207_v40 = vmul.f32 %v4258_v43, %v5275_v60  ;;  %v1152_v19 = vpop.f32.mrb[39].mxu1 }
 0x728   :  { %v1325_v37 = vpack.c.bf16 %v1204_v7, %v1203_v10  ;;  %v1205_v21 = vmul.f32 %v1152_v19, %v5282_v1 }
 0x729   :  { %v1409_v3 = vpack.c.bf16 %v1207_v40, %v1206_v14 }
 0x72a   :  { %4292 = vmatmul.mubr.msk.bf16.gmra.mrb[52].mxu0 %vm239_vm2, %v1325_v37  ;;  %v1326_v60 = vpack.c.bf16 %v1205_v21, %v1205_v21 }
 0x72b   :  { %4304 = vmatmul.mubr.msk.bf16.vlgmr.msra.gmra.mrb[48].mxu1 %vm239_vm2, %v1409_v3  ;;  %4295 = vmatprep.mubr.msk.bf16.mxu0 %vm4925_vm0, %v4924_v0 }
 0x72c   :  { %v4261_v38 = vpop.f32.mrb[40].mxu1  ;;  %4307 = vmatprep.mubr.msk.bf16.mxu1 %vm4925_vm0, %v4924_v0 }
 0x72d   :  { %v1165_v58 = vpop.f32.mrb[41].mxu1 }
 0x72e   :  { %v4262_v57 = vpop.f32.mrb[42].mxu1  ;;  %v1208_v5 = vmul.f32 %v1165_v58, %v5293_v11  ;;  %v1210_v11 = vmul.f32 %v4873_v41, %v4261_v38 }
 0x72f   :  { %v1168_v51 = vpop.f32.mrb[43].mxu1 }
 0x730   :  { %v1209_v45 = vmul.f32 %v1168_v51, %v5305_v17  ;;  %v1211_v17 = vmul.f32 %v4262_v57, %v5299_v13  ;;  %v1411_v27 = vpack.c.bf16 %v1210_v11, %v1210_v11 }
 0x732   :  { %v1410_v20 = vpack.c.bf16 %v1209_v45, %v1208_v5  ;;  %4296 = vmatmul.mubr.msk.bf16.gmra.mrb[56].mxu0 %vm239_vm2, %v1326_v60 }
 0x733   :  { %4319 = vmatprep.mubr.msk.bf16.mxu0 %vm4925_vm0, %v4924_v0 }
 0x734   :  { %v4265_v44 = vpop.f32.mrb[44].mxu1  ;;  %4308 = vmatmul.mubr.msk.bf16.gmra.mrb[52].mxu1 %vm239_vm2, %v1410_v20 }
 0x735   :  { %v1181_v1 = vpop.f32.mrb[45].mxu1  ;;  %4311 = vmatprep.mubr.msk.bf16.mxu1 %vm4925_vm0, %v4924_v0  ;;  %v1214_v49 = vmul.f32 %v4265_v44, %v5313_v31 }
 0x736   :  { %v1212_v23 = vmul.f32 %v1181_v1, %v5318_v33  ;;  %v4266_v35 = vpop.f32.mrb[46].mxu1 }
 0x737   :  { %v1184_v47 = vpop.f32.mrb[47].mxu1  ;;  %v1215_v13 = vmul.f32 %v4266_v35, %v5324_v36  ;;  %v3846_v36 = vld [vmem:[%s6646_s11] ss:$0 sm:$0xff] }
 0x738   :  { %v1494_v52 = vpack.c.bf16 %v1212_v23, %v1211_v17  ;;  %v1213_v59 = vmul.f32 %v1184_v47, %v5331_v39 }
 0x739   :  { %v1496_v31 = vpack.c.bf16 %v1215_v13, %v1215_v13 }
 0x73a   :  { %v1495_v55 = vpack.c.bf16 %v1214_v49, %v1213_v59  ;;  %4320 = vmatmul.mubr.msk.bf16.vlgmr.msra.gmra.mrb[60].mxu0 %vm239_vm2, %v1494_v52 }
 0x73b   :  { %4323 = vmatprep.mubr.msk.bf16.mxu0 %vm4925_vm0, %v4924_v0 }
 0x73c   :  { %4312 = vmatmul.mubr.msk.bf16.gmra.mrb[56].mxu1 %vm239_vm2, %v1411_v27 }
 0x73d   :  { %4335 = vmatprep.mubr.msk.bf16.mxu1 %vm4925_vm0, %v4924_v0 }
 0x742   :  { %4324 = vmatmul.mubr.msk.bf16.gmra.mrb[64].mxu0 %vm239_vm2, %v1495_v55 }
 0x743   :  { %4327 = vmatprep.mubr.msk.bf16.mxu0 %vm4925_vm0, %v4924_v0 }
 0x74a   :  { %4328 = vmatmul.mubr.msk.bf16.gmra.mrb[68].mxu0 %vm239_vm2, %v1496_v31 }
 0x74b   :  { %4355 = vmatprep.mubr.msk.bf16.mxu0 %vm4925_vm0, %v4924_v0 }
 0x7c6   :  { %v1291_v33 = vpop.f32.mrb[36].mxu0 }
 0x7c7   :  { %v4273_v39 = vpop.f32.mrb[37].mxu0  ;;  %v1319_v4 = vadd.f32 %v3846_v36, %v1291_v33 }
 0x7c8   :  { %v1294_v61 = vpop.f32.mrb[38].mxu0 }
 0x7c9   :  { %v4274_v63 = vpop.f32.mrb[39].mxu0  ;;  %v1320_v22 = vadd.f32 %v3846_v36, %v1294_v61 }
 0x7ce   :  { %v1299_v54 = vpop.f32.mrb[40].mxu0 }
 0x7cf   :  { %v4277_v6 = vpop.f32.mrb[41].mxu0  ;;  %v1321_v48 = vadd.f32 %v3846_v36, %v1299_v54 }
 0x7d0   :  { %v1302_v12 = vpop.f32.mrb[42].mxu0 }
 0x7d1   :  { %v4278_v53 = vpop.f32.mrb[43].mxu0  ;;  %v1322_v2 = vadd.f32 %v3846_v36, %v1302_v12 }
 0x7d6   :  { %v1307_v9 = vpop.f32.mrb[44].mxu0 }
 0x7d7   :  { %v4281_v50 = vpop.f32.mrb[45].mxu0  ;;  %v1323_v38 = vadd.f32 %v3846_v36, %v1307_v9 }
 0x7d8   :  { %v1310_v62 = vpop.f32.mrb[46].mxu0 }
 0x7d9   :  { %v4282_v16 = vpop.f32.mrb[47].mxu0 }
 0x7de   :  { %v1382_v8 = vpop.f32.mrb[48].mxu0 }
 0x7df   :  { %v1404_v26 = vadd.f32 %v1382_v8, %v1319_v4  ;;  %v4289_v29 = vpop.f32.mrb[49].mxu0 }
 0x7e0   :  { %v1385_v30 = vpop.f32.mrb[50].mxu0 }
 0x7e1   :  { %v1405_v32 = vadd.f32 %v1385_v30, %v1320_v22  ;;  %v4290_v42 = vpop.f32.mrb[51].mxu0 }
 0x7fd   :  { %v1390_v46 = vpop.f32.mrb[52].mxu0 }
 0x7fe   :  { %v1406_v56 = vadd.f32 %v1390_v46, %v1321_v48  ;;  %v4293_v24 = vpop.f32.mrb[53].mxu0  ;;  %v1467_v10 = vpop.f32.mrb[48].mxu1 }
 0x7ff   :  { %v1489_v7 = vadd.f32 %v1467_v10, %v1404_v26  ;;  %v1393_v43 = vpop.f32.mrb[54].mxu0  ;;  %v4305_v14 = vpop.f32.mrb[49].mxu1 }
 0x800   :  { %v1407_v40 = vadd.f32 %v1393_v43, %v1322_v2  ;;  %v4294_v19 = vpop.f32.mrb[55].mxu0  ;;  %v1470_v37 = vpop.f32.mrb[50].mxu1 }
 0x801   :  { %v1490_v3 = vadd.f32 %v1470_v37, %v1405_v32  ;;  %v4306_v21 = vpop.f32.mrb[51].mxu1 }
 0x805   :  { %v1398_v58 = vpop.f32.mrb[56].mxu0 }
 0x806   :  { %v1408_v57 = vadd.f32 %v1398_v58, %v1323_v38  ;;  %v4297_v51 = vpop.f32.mrb[57].mxu0 }
 0x807   :  { %v1401_v60 = vpop.f32.mrb[58].mxu0  ;;  %v1475_v5 = vpop.f32.mrb[52].mxu1 }
 0x808   :  { %v1491_v45 = vadd.f32 %v1475_v5, %v1406_v56  ;;  %v4298_v20 = vpop.f32.mrb[59].mxu0  ;;  %v4309_v44 = vpop.f32.mrb[53].mxu1 }
 0x809   :  { %v1478_v1 = vpop.f32.mrb[54].mxu1  ;;  %v4607_v20 = vld [vmem:[%s6647_s14 + $0x8] sm:$0xff]  }
 0x80a   :  { %v1492_v41 = vadd.f32 %v1478_v1, %v1407_v40  ;;  %v4310_v11 = vpop.f32.mrb[55].mxu1 }
 0x80d   :  { %v1552_v17 = vpop.f32.mrb[60].mxu0 }
 0x80e   :  { %v1574_v23 = vadd.f32 %v1552_v17, %v1489_v7  ;;  %v4321_v35 = vpop.f32.mrb[61].mxu0 }
 0x80f   :  { %v1483_v47 = vpop.f32.mrb[56].mxu1  ;;  %v1555_v49 = vpop.f32.mrb[62].mxu0 }
 0x810   :  { %v5719_v52 = vadd.f32 %v1574_v23, %v5086_v15  ;;  %v1493_v59 = vadd.f32 %v1483_v47, %v1408_v57  ;;  %v1575_v27 = vadd.f32 %v1555_v49, %v1490_v3  ;;  %v4313_v55 = vpop.f32.mrb[57].mxu1  ;;  %v4322_v13 = vpop.f32.mrb[63].mxu0 }
 0x811   :  { %v1486_v31 = vpop.f32.mrb[58].mxu1 }
 0x812   :  { %v5722_v33 = vadd.f32 %v1575_v27, %v5088_v18  ;;  %v4314_v39 = vpop.f32.mrb[59].mxu1  ;;  %v1586_v61 = vsel %vm239_vm2, %v5719_v52, 0.0  ;;  %v3862_v31 = vld [vmem:[%s6648_s12] ss:$0 sm:$0xff] }
 0x813   :  { %1587 = vadd.xlane.f32.xlu0 %v1586_v61 }
 0x814   :  { %v1589_v63 = vsel %vm239_vm2, %v5722_v33, 0.0 }
 0x815   :  { %1590 = vadd.xlane.f32.xlu1 %v1589_v63  ;;  %v1560_v54 = vpop.f32.mrb[64].mxu0 }
 0x816   :  { %v1576_v15 = vadd.f32 %v1560_v54, %v1491_v45  ;;  %v4325_v6 = vpop.f32.mrb[65].mxu0  ;;  %v4606_v45 = vld [vmem:[%s6647_s14] sm:$0xff]  }
 0x817   :  { %v1563_v12 = vpop.f32.mrb[66].mxu0  ;;  %4332 = vmatpush3.bf16.msra.mxu1 %v4606_v45 }
 0x818   :  { %v5729_v53 = vadd.f32 %v1576_v15, %v5100_v25  ;;  %v1577_v9 = vadd.f32 %v1563_v12, %v1492_v41  ;;  %v4326_v50 = vpop.f32.mrb[67].mxu0  ;;  %4333 = vmatprep.subr.bf16.mxu1 %v4924_v0  ;;  %v3863_v12 = vld [vmem:[%s6649_s13] ss:$0 sm:$0xff] }
 0x81a   :  { %v5732_v18 = vadd.f32 %v1577_v9, %v5102_v28  ;;  %v1592_v62 = vsel %vm239_vm2, %v5729_v53, 0.0 }
 0x81b   :  { %1593 = vadd.xlane.f32.xlu0 %v1592_v62  ;;  %4334 = vmatpush3.bf16.msra.mxu1 %v4607_v20 }
 0x81c   :  { %v1595_v16 = vsel %vm239_vm2, %v5732_v18, 0.0  ;;  %4367 = vmatprep.subr.bf16.mxu1 %v4924_v0 }
 0x81d   :  { %1596 = vadd.xlane.f32.xlu1 %v1595_v16  ;;  %v1568_v36 = vpop.f32.mrb[68].mxu0 }
 0x81e   :  { %v1578_v4 = vadd.f32 %v1568_v36, %v1493_v59  ;;  %v4329_v8 = vpop.f32.mrb[69].mxu0 }
 0x81f   :  { %v1571_v22 = vpop.f32.mrb[70].mxu0 }
 0x820   :  { %v5739_v25 = vadd.f32 %v1578_v4, %v5111_v34  ;;  %v4330_v26 = vpop.f32.mrb[71].mxu0 }
 0x822   :  { %v1598_v28 = vsel %vm252_vm3, %v5739_v25, 0.0 }
 0x823   :  { %1599 = vadd.xlane.f32.xlu0 %v1598_v28 }
 0x8a0   :  { %v1588_v29 = vpop.xlane.xlu0 %1587 }
 0x8a1   :  { %v1601_v30 = vmul.f32 0.03125, %v1588_v29 }
 0x8a2   :  { %v1591_v32 = vpop.xlane.xlu1 %1590 }
 0x8a3   :  { %v1606_v42 = vsub.f32 %v5719_v52, %v1601_v30  ;;  %v1602_v48 = vmul.f32 0.03125, %v1591_v32 }
 0x8a5   :  { %v1607_v46 = vsub.f32 %v5722_v33, %v1602_v48  ;;  %v1611_v2 = vmul.f32 %v1606_v42, %v1606_v42 }
 0x8a7   :  { %v1616_v56 = vsel %vm239_vm2, %v1611_v2, 0.0  ;;  %v1612_v24 = vmul.f32 %v1607_v46, %v1607_v46 }
 0x8a8   :  { %v1594_v10 = vpop.xlane.xlu0 %1593  ;;  %1617 = vadd.xlane.f32.xlu1 %v1616_v56 }
 0x8a9   :  { %v1603_v34 = vmul.f32 0.03125, %v1594_v10  ;;  %v1619_v7 = vsel %vm239_vm2, %v1612_v24, 0.0  ;;  %v4608_v10 = vld [vmem:[%s6650_s16] sm:$0xff]  }
 0x8aa   :  { %v1597_v43 = vpop.xlane.xlu1 %1596  ;;  %1620 = vadd.xlane.f32.xlu0 %v1619_v7  ;;  %4348 = vmatpush3.bf16.msra.mxu0 %v4608_v10  ;;  %v4610_v7 = vld [vmem:[%s6650_s16 + $0x10] sm:$0xff]  }
 0x8ab   :  { %v1608_v14 = vsub.f32 %v5729_v53, %v1603_v34  ;;  %v1604_v40 = vmul.f32 0.03125, %v1597_v43  ;;  %4349 = vmatprep.subr.bf16.mxu0 %v4924_v0  ;;  %v4609_v34 = vld [vmem:[%s6650_s16 + $0x8] sm:$0xff]   ;;  %v4611_v43 = vld [vmem:[%s6650_s16 + $0x18] sm:$0xff]  }
 0x8ad   :  { %v1609_v19 = vsub.f32 %v5732_v18, %v1604_v40  ;;  %v1613_v37 = vmul.f32 %v1608_v14, %v1608_v14 }
 0x8ae   :  { %4350 = vmatpush3.bf16.msra.mxu0 %v4609_v34 }
 0x8af   :  { %v1622_v3 = vsel %vm239_vm2, %v1613_v37, 0.0  ;;  %v1614_v21 = vmul.f32 %v1609_v19, %v1609_v19  ;;  %4351 = vmatprep.subr.bf16.mxu0 %v4924_v0 }
 0x8b0   :  { %1623 = vadd.xlane.f32.xlu1 %v1622_v3  ;;  %v1600_v38 = vpop.xlane.xlu0 %1599 }
 0x8b1   :  { %v1605_v58 = vmul.f32 0.03125, %v1600_v38  ;;  %v1625_v57 = vsel %vm239_vm2, %v1614_v21, 0.0 }
 0x8b2   :  { %1626 = vadd.xlane.f32.xlu0 %v1625_v57  ;;  %4352 = vmatpush3.bf16.msra.mxu0 %v4610_v7 }
 0x8b3   :  { %v1610_v51 = vsub.f32 %v5739_v25, %v1605_v58  ;;  %4353 = vmatprep.subr.bf16.mxu0 %v4924_v0 }
 0x8b5   :  { %v1615_v60 = vmul.f32 %v1610_v51, %v1610_v51 }
 0x8b6   :  { %4354 = vmatpush3.bf16.msra.mxu0 %v4611_v43 }
 0x8b7   :  { %v1628_v5 = vsel %vm252_vm3, %v1615_v60, 0.0 }
 0x8b8   :  { %1629 = vadd.xlane.f32.xlu1 %v1628_v5 }
 0x935   :  { %v1618_v44 = vpop.xlane.xlu1 %1617 }
 0x936   :  { %v1631_v1 = vmul.f32 0.03125, %v1618_v44 }
 0x937   :  { %v1621_v41 = vpop.xlane.xlu0 %1620 }
 0x938   :  { %v1636_v11 = vadd.f32 1e-05, %v1631_v1  ;;  %v1632_v17 = vmul.f32 0.03125, %v1621_v41 }
 0x93a   :  { %4718 = vrsqrt.f32 %v1636_v11  ;;  %v1637_v23 = vadd.f32 1e-05, %v1632_v17 }
 0x93c   :  { %4720 = vrsqrt.f32 %v1637_v23 }
 0x93d   :  { %v1624_v35 = vpop.xlane.xlu1 %1623 }
 0x93e   :  { %v1633_v47 = vmul.f32 0.03125, %v1624_v35 }
 0x93f   :  { %v1627_v49 = vpop.xlane.xlu0 %1626 }
 0x940   :  { %v1638_v59 = vadd.f32 1e-05, %v1633_v47  ;;  %v1634_v27 = vmul.f32 0.03125, %v1627_v49 }
 0x942   :  { %4722 = vrsqrt.f32 %v1638_v59  ;;  %v1639_v55 = vadd.f32 1e-05, %v1634_v27 }
 0x944   :  { %v4719_v13 = vpop.eup %4718  ;;  %4724 = vrsqrt.f32 %v1639_v55 }
 0x945   :  { %v1646_v39 = vmul.f32 %v4719_v13, %v1606_v42  ;;  %v1630_v61 = vpop.xlane.xlu1 %1629 }
 0x946   :  { %v4721_v63 = vpop.eup %4720  ;;  %v1635_v54 = vmul.f32 0.03125, %v1630_v61 }
 0x947   :  { %v1657_v15 = vmul.f32 %v3862_v31, %v1646_v39  ;;  %v1647_v6 = vmul.f32 %v4721_v63, %v1607_v46 }
 0x948   :  { %v1640_v9 = vadd.f32 1e-05, %v1635_v54 }
 0x949   :  { %v1658_v50 = vmul.f32 %v3862_v31, %v1647_v6  ;;  %v1668_v62 = vadd.f32 %v3863_v12, %v1657_v15 }
 0x94a   :  { %4726 = vrsqrt.f32 %v1640_v9 }
 0x94b   :  { %v1669_v16 = vadd.f32 %v3863_v12, %v1658_v50 }
 0x94c   :  { %v4723_v36 = vpop.eup %4722 }
 0x94d   :  { %v1648_v4 = vmul.f32 %v4723_v36, %v1608_v14  ;;  %v1673_v8 = vpack.c.bf16 %v1669_v16, %v1668_v62  ;;  %v3864_v14 = vld [vmem:[%s6651_s15] ss:$0 sm:$0xff] }
 0x94e   :  { %v4725_v22 = vpop.eup %4724 }
 0x94f   :  { %v1649_v26 = vmul.f32 %v4725_v22, %v1609_v19  ;;  %4336 = vmatmul.mubr.msk.bf16.vlgmr.msra.gmra.mrb[60].mxu1 %vm239_vm2, %v1673_v8  ;;  %v1659_v28 = vmul.f32 %v3862_v31, %v1648_v4 }
 0x950   :  { %4339 = vmatprep.mubr.msk.bf16.mxu1 %vm4925_vm0, %v4924_v0 }
 0x951   :  { %v1660_v29 = vmul.f32 %v3862_v31, %v1649_v26  ;;  %v1670_v30 = vadd.f32 %v3863_v12, %v1659_v28 }
 0x953   :  { %v1671_v32 = vadd.f32 %v3863_v12, %v1660_v29 }
 0x954   :  { %v4727_v42 = vpop.eup %4726 }
 0x955   :  { %v1674_v48 = vpack.c.bf16 %v1671_v32, %v1670_v30  ;;  %v1650_v46 = vmul.f32 %v4727_v42, %v1610_v51 }
 0x957   :  { %4340 = vmatmul.mubr.msk.bf16.gmra.mrb[64].mxu1 %vm239_vm2, %v1674_v48  ;;  %v1661_v2 = vmul.f32 %v3862_v31, %v1650_v46 }
 0x958   :  { %4343 = vmatprep.mubr.msk.bf16.mxu1 %vm4925_vm0, %v4924_v0 }
 0x959   :  { %v1672_v56 = vadd.f32 %v3863_v12, %v1661_v2 }
 0x95b   :  { %v1675_v24 = vpack.c.bf16 %v1672_v56, %v1672_v56 }
 0x95f   :  { %4344 = vmatmul.mubr.msk.bf16.gmra.mrb[68].mxu1 %vm239_vm2, %v1675_v24 }
 0x960   :  { %4371 = vmatprep.mubr.msk.bf16.mxu1 %vm4925_vm0, %v4924_v0 }
 0xa22   :  { %v1742_v40 = vpop.f32.mrb[60].mxu1 }
 0xa23   :  { %v5794_v19 = vadd.f32 %v3864_v14, %v1742_v40  ;;  %v4337_v37 = vpop.f32.mrb[61].mxu1 }
 0xa24   :  { %v1745_v3 = vpop.f32.mrb[62].mxu1 }
 0xa25   :  { %v5797_v21 = vmul.f32 0.70710677, %v5794_v19  ;;  %v5799_v38 = vadd.f32 %v3864_v14, %v1745_v3  ;;  %v4338_v58 = vpop.f32.mrb[63].mxu1 }
 0xa27   :  { %v1785_v57 = vand.u32 2147483647, %v5797_v21  ;;  %v5803_v51 = vmul.f32 0.70710677, %v5799_v38  ;;  %vm1775_vm6 = vcmp.ge.f32.partialorder %v5797_v21, 0.0 }
 0xa29   :  { %v1790_v60 = vmul.f32 0.3275911, %v1785_v57  ;;  %v1786_v5 = vand.u32 2147483647, %v5803_v51  ;;  %v1850_v13 = vsub.f32 0.0, %v1785_v57  ;;  %vm1776_vm7 = vcmp.ge.f32.partialorder %v5803_v51, 0.0 }
 0xa2a   :  { %v1750_v45 = vpop.f32.mrb[64].mxu1 }
 0xa2b   :  { %v1795_v20 = vadd.f32 1.0, %v1790_v60  ;;  %v1791_v44 = vmul.f32 0.3275911, %v1786_v5  ;;  %v4341_v1 = vpop.f32.mrb[65].mxu1  ;;  %v5806_v41 = vadd.f32 %v3864_v14, %v1750_v45  ;;  %v1851_v12 = vsub.f32 0.0, %v1786_v5 }
 0xa2c   :  { %v1753_v11 = vpop.f32.mrb[66].mxu1  ;;  %v1855_v62 = vmul.f32 %v1850_v13, %v1785_v57 }
 0xa2d   :  { %4728 = vrcp.f32 %v1795_v20  ;;  %v1796_v17 = vadd.f32 1.0, %v1791_v44  ;;  %v4342_v23 = vpop.f32.mrb[67].mxu1  ;;  %v5809_v35 = vmul.f32 0.70710677, %v5806_v41  ;;  %v5811_v47 = vadd.f32 %v3864_v14, %v1753_v11 }
 0xa2e   :  { %v1856_v28 = vmul.f32 %v1851_v12, %v1786_v5  ;;  %v1860_v29 = vmul.f32 1.442695, %v1855_v62 }
 0xa2f   :  { %4730 = vrcp.f32 %v1796_v17  ;;  %v1787_v49 = vand.u32 2147483647, %v5809_v35  ;;  %v5815_v59 = vmul.f32 0.70710677, %v5811_v47  ;;  %vm1777_vm8 = vcmp.ge.f32.partialorder %v5809_v35, 0.0 }
 0xa30   :  { %v1862_v56 = vmul.f32 1.442695, %v1856_v28 }
 0xa31   :  { %v1792_v27 = vmul.f32 0.3275911, %v1787_v49  ;;  %v1788_v31 = vand.u32 2147483647, %v5815_v59  ;;  %v1852_v48 = vsub.f32 0.0, %v1787_v49  ;;  %vm1778_vm10 = vcmp.ge.f32.partialorder %v5815_v59, 0.0 }
 0xa32   :  { %v1758_v55 = vpop.f32.mrb[68].mxu1  ;;  %v1766_v59 = vmul.f32 0.5, %v5806_v41 }
 0xa33   :  { %v5818_v39 = vadd.f32 %v3864_v14, %v1758_v55  ;;  %v4345_v61 = vpop.f32.mrb[69].mxu1  ;;  %v1797_v63 = vadd.f32 1.0, %v1792_v27  ;;  %v1793_v15 = vmul.f32 0.3275911, %v1788_v31  ;;  %v1853_v10 = vsub.f32 0.0, %v1788_v31 }
 0xa34   :  { %v1761_v54 = vpop.f32.mrb[70].mxu1  ;;  %v1857_v43 = vmul.f32 %v1852_v48, %v1787_v49 }
 0xa35   :  { %v5821_v6 = vmul.f32 0.70710677, %v5818_v39  ;;  %4732 = vrcp.f32 %v1797_v63  ;;  %v4346_v9 = vpop.f32.mrb[71].mxu1  ;;  %v1798_v16 = vadd.f32 1.0, %v1793_v15  ;;  %v1858_v60 = vmul.f32 %v1853_v10, %v1788_v31 }
 0xa36   :  { %v1864_v20 = vmul.f32 1.442695, %v1857_v43 }
 0xa37   :  { %v4729_v50 = vpop.eup %4728  ;;  %v1789_v36 = vand.u32 2147483647, %v5821_v6  ;;  %4734 = vrcp.f32 %v1798_v16  ;;  %v1866_v13 = vmul.f32 1.442695, %v1858_v60  ;;  %vm1779_vm11 = vcmp.ge.f32.partialorder %v5821_v6, 0.0 }
 0xa38   :  { %v1805_v4 = vmul.f32 1.0614054, %v4729_v50 }
 0xa39   :  { %v1794_v8 = vmul.f32 0.3275911, %v1789_v36  ;;  %v4731_v22 = vpop.eup %4730  ;;  %v1854_v5 = vsub.f32 0.0, %v1789_v36 }
 0xa3a   :  { %v1810_v26 = vadd.f32 -1.4531521, %v1805_v4  ;;  %v1806_v30 = vmul.f32 1.0614054, %v4731_v22 }
 0xa3b   :  { %v1799_v32 = vadd.f32 1.0, %v1794_v8  ;;  %v1859_v61 = vmul.f32 %v1854_v5, %v1789_v36  ;;  %v1765_v5 = vmul.f32 0.5, %v5799_v38 }
 0xa3c   :  { %v1815_v42 = vmul.f32 %v4729_v50, %v1810_v26  ;;  %v1811_v46 = vadd.f32 -1.4531521, %v1806_v30 }
 0xa3d   :  { %4736 = vrcp.f32 %v1799_v32  ;;  %v1868_v28 = vmul.f32 1.442695, %v1859_v61  ;;  %v6665_v32 = vmov -1.0  }
 0xa3e   :  { %v1820_v2 = vadd.f32 1.4214138, %v1815_v42  ;;  %4738 = vpow2.f32 %v1860_v29  ;;  %v1816_v24 = vmul.f32 %v4731_v22, %v1811_v46  ;;  %v1780_v42 = vsel %vm1775_vm6, 1.0, %v6665_v32 }
 0xa3f   :  { %v4733_v34 = vpop.eup %4732  ;;  %4740 = vpow2.f32 %v1862_v56  ;;  %v1781_v10 = vsel %vm1776_vm7, 1.0, %v6665_v32 }
 0xa40   :  { %v1825_v7 = vmul.f32 %v4729_v50, %v1820_v2  ;;  %v1821_v14 = vadd.f32 1.4214138, %v1816_v24  ;;  %v1807_v40 = vmul.f32 1.0614054, %v4733_v34  ;;  %4742 = vpow2.f32 %v1864_v20 }
 0xa41   :  { %v4735_v3 = vpop.eup %4734  ;;  %4744 = vpow2.f32 %v1866_v13 }
 0xa42   :  { %v1830_v37 = vadd.f32 -0.28449672, %v1825_v7  ;;  %v1826_v58 = vmul.f32 %v4731_v22, %v1821_v14  ;;  %v1812_v57 = vadd.f32 -1.4531521, %v1807_v40  ;;  %v1808_v44 = vmul.f32 1.0614054, %v4735_v3 }
 0xa43   :  { %4746 = vpow2.f32 %v1868_v28 }
 0xa44   :  { %v1835_v45 = vmul.f32 %v4729_v50, %v1830_v37  ;;  %v1831_v1 = vadd.f32 -0.28449672, %v1826_v58  ;;  %v1817_v11 = vmul.f32 %v4733_v34, %v1812_v57  ;;  %v1813_v23 = vadd.f32 -1.4531521, %v1808_v44 }
 0xa45   :  { %v1764_v57 = vmul.f32 0.5, %v5794_v19 }
 0xa46   :  { %v1840_v17 = vadd.f32 0.2548296, %v1835_v45  ;;  %v1836_v55 = vmul.f32 %v4731_v22, %v1831_v1  ;;  %v1822_v49 = vadd.f32 1.4214138, %v1817_v11  ;;  %v1818_v54 = vmul.f32 %v4735_v3, %v1813_v23 }
 0xa47   :  { %v5824_v27 = vpop.eup %4736 }
 0xa48   :  { %v1845_v63 = vmul.f32 %v4729_v50, %v1840_v17  ;;  %v1809_v15 = vmul.f32 1.0614054, %v5824_v27  ;;  %v4739_v31 = vpop.eup %4738  ;;  %v1841_v12 = vadd.f32 0.2548296, %v1836_v55  ;;  %v1827_v9 = vmul.f32 %v4733_v34, %v1822_v49 }
 0xa49   :  { %v1823_v16 = vadd.f32 1.4214138, %v1818_v54  ;;  %v4741_v29 = vpop.eup %4740 }
 0xa4a   :  { %v1870_v62 = vmul.f32 %v4739_v31, %v1845_v63  ;;  %v1814_v4 = vadd.f32 -1.4531521, %v1809_v15  ;;  %v1846_v8 = vmul.f32 %v4731_v22, %v1841_v12  ;;  %v1832_v26 = vadd.f32 -0.28449672, %v1827_v9  ;;  %v4743_v58 = vpop.eup %4742 }
 0xa4b   :  { %v1828_v36 = vmul.f32 %v4735_v3, %v1823_v16  ;;  %v4745_v11 = vpop.eup %4744  ;;  %v1767_v12 = vmul.f32 0.5, %v5811_v47  ;;  %v4874_v47 = vld [vmem:[%s6680_s26] sm:$0xff]  }
 0xa4c   :  { %v1875_v30 = vsub.f32 1.0, %v1870_v62  ;;  %v1819_v50 = vmul.f32 %v5824_v27, %v1814_v4  ;;  %v1871_v48 = vmul.f32 %v4741_v29, %v1846_v8  ;;  %v1837_v46 = vmul.f32 %v4733_v34, %v1832_v26 }
 0xa4d   :  { %v1833_v2 = vadd.f32 -0.28449672, %v1828_v36  ;;  %v4747_v63 = vpop.eup %4746  ;;  %v1768_v29 = vmul.f32 0.5, %v5818_v39  ;;  %v3877_v39 = vld [vmem:[%s6652_s17] ss:$0 sm:$0xff] }
 0xa4e   :  { %v1880_v21 = vmul.f32 %v1875_v30, %v1780_v42  ;;  %v1824_v56 = vadd.f32 1.4214138, %v1819_v50  ;;  %v1876_v24 = vsub.f32 1.0, %v1871_v48  ;;  %v1842_v22 = vadd.f32 0.2548296, %v1837_v46 }
 0xa4f   :  { %v1838_v7 = vmul.f32 %v4735_v3, %v1833_v2 }
 0xa50   :  { %v1829_v43 = vmul.f32 %v5824_v27, %v1824_v56  ;;  %v1885_v14 = vadd.f32 1.0, %v1880_v21  ;;  %v1881_v40 = vmul.f32 %v1876_v24, %v1781_v10  ;;  %v1847_v37 = vmul.f32 %v4733_v34, %v1842_v22 }
 0xa51   :  { %v1843_v51 = vadd.f32 0.2548296, %v1838_v7  ;;  %v1782_v34 = vsel %vm1777_vm8, 1.0, %v6665_v32 }
 0xa52   :  { %v1834_v60 = vadd.f32 -0.28449672, %v1829_v43  ;;  %v1886_v45 = vadd.f32 1.0, %v1881_v40  ;;  %v1872_v20 = vmul.f32 %v4743_v58, %v1847_v37  ;;  %v1890_v17 = vmul.f32 %v1885_v14, %v1764_v57 }
 0xa53   :  { %v1848_v44 = vmul.f32 %v4735_v3, %v1843_v51  ;;  %v1783_v3 = vsel %vm1778_vm10, 1.0, %v6665_v32 }
 0xa54   :  { %v1839_v1 = vmul.f32 %v5824_v27, %v1834_v60  ;;  %v1891_v23 = vmul.f32 %v1886_v45, %v1765_v5  ;;  %v1877_v55 = vsub.f32 1.0, %v1872_v20 }
 0xa55   :  { %v1873_v19 = vmul.f32 %v4745_v11, %v1848_v44 }
 0xa56   :  { %v1844_v49 = vadd.f32 0.2548296, %v1839_v1  ;;  %v1895_v13 = vpack.c.bf16 %v1891_v23, %v1890_v17  ;;  %v1882_v38 = vmul.f32 %v1877_v55, %v1782_v34 }
 0xa57   :  { %v1878_v61 = vsub.f32 1.0, %v1873_v19 }
 0xa58   :  { %v1849_v35 = vmul.f32 %v5824_v27, %v1844_v49  ;;  %4356 = vmatmul.mubr.msk.bf16.vlgmr.msra.gmra.mrb[72].mxu0 %vm1930_vm9, %v1895_v13  ;;  %v1887_v54 = vadd.f32 1.0, %v1882_v38  ;;  %v1784_v27 = vsel %vm1779_vm11, 1.0, %v6665_v32 }
 0xa59   :  { %v1883_v15 = vmul.f32 %v1878_v61, %v1783_v3  ;;  %4359 = vmatprep.mubr.msk.bf16.mxu0 %vm4925_vm0, %v4924_v0 }
 0xa5a   :  { %v1874_v31 = vmul.f32 %v4747_v63, %v1849_v35  ;;  %v1892_v16 = vmul.f32 %v1887_v54, %v1766_v59 }
 0xa5b   :  { %v1888_v9 = vadd.f32 1.0, %v1883_v15 }
 0xa5c   :  { %v1879_v62 = vsub.f32 1.0, %v1874_v31 }
 0xa5d   :  { %v1893_v4 = vmul.f32 %v1888_v9, %v1767_v12 }
 0xa5e   :  { %v1884_v8 = vmul.f32 %v1879_v62, %v1784_v27 }
 0xa5f   :  { %v1896_v26 = vpack.c.bf16 %v1893_v4, %v1892_v16  ;;  %v4612_v16 = vld [vmem:[%s6677_s28 + $0x10] sm:$0xff]   ;;  %v4613_v4 = vld [vmem:[%s6677_s28 + $0x18] sm:$0xff]  }
 0xa60   :  { %v1889_v28 = vadd.f32 1.0, %v1884_v8  ;;  %4368 = vmatpush3.bf16.msra.mxu1 %v4612_v16 }
 0xa61   :  { %4360 = vmatmul.mubr.msk.bf16.gmra.mrb[76].mxu0 %vm1930_vm9, %v1896_v26  ;;  %4369 = vmatprep.subr.bf16.mxu1 %v4924_v0 }
 0xa62   :  { %4363 = vmatprep.mubr.msk.bf16.mxu0 %vm4925_vm0, %v4924_v0  ;;  %v1894_v6 = vmul.f32 %v1889_v28, %v1768_v29 }
 0xa64   :  { %v1897_v41 = vpack.c.bf16 %v1894_v6, %v1894_v6  ;;  %4370 = vmatpush3.bf16.msra.mxu1 %v4613_v4 }
 0xa69   :  { %4364 = vmatmul.mubr.msk.bf16.gmra.mrb[80].mxu0 %vm1930_vm9, %v1897_v41 }
 0xa6a   :  { %4389 = vmatprep.mubr.msk.bf16.mxu0 %vm473_vm4, %v4874_v47 }
 0xb2b   :  { %v1974_v30 = vpop.f32.mrb[72].mxu0 }
 0xb2c   :  { %v1996_v36 = vadd.f32 %v1974_v30, %v5719_v52  ;;  %v4357_v50 = vpop.f32.mrb[73].mxu0 }
 0xb2d   :  { %v1977_v42 = vpop.f32.mrb[74].mxu0 }
 0xb2e   :  { %v5861_v48 = vadd.f32 %v3877_v39, %v1996_v36  ;;  %v1997_v46 = vadd.f32 %v1977_v42, %v5722_v33  ;;  %v4358_v21 = vpop.f32.mrb[75].mxu0 }
 0xb2f   :  { %v3880_v21 = vld [vmem:[%s6678_s23 + $0x1] ss:$0 sm:$0xff] }
 0xb30   :  { %v5864_v2 = vadd.f32 %v3877_v39, %v1997_v46  ;;  %v2017_v56 = vsel %vm239_vm2, %v5861_v48, 0.0 }
 0xb31   :  { %2018 = vadd.xlane.f32.xlu0 %v2017_v56 }
 0xb32   :  { %v2020_v24 = vsel %vm239_vm2, %v5864_v2, 0.0 }
 0xb33   :  { %2021 = vadd.xlane.f32.xlu1 %v2020_v24 }
 0xb34   :  { %v1982_v22 = vpop.f32.mrb[76].mxu0 }
 0xb35   :  { %v1998_v52 = vadd.f32 %v1982_v22, %v5729_v53  ;;  %v4361_v10 = vpop.f32.mrb[77].mxu0  ;;  %v3881_v22 = vld [vmem:[%s6679_s24 + $0x1] ss:$0 sm:$0xff] }
 0xb36   :  { %v1985_v7 = vpop.f32.mrb[78].mxu0 }
 0xb37   :  { %v5871_v43 = vadd.f32 %v3877_v39, %v1998_v52  ;;  %v1999_v33 = vadd.f32 %v1985_v7, %v5732_v18  ;;  %v4362_v14 = vpop.f32.mrb[79].mxu0 }
 0xb39   :  { %v5874_v40 = vadd.f32 %v3877_v39, %v1999_v33  ;;  %v2023_v37 = vsel %vm239_vm2, %v5871_v43, 0.0 }
 0xb3a   :  { %2024 = vadd.xlane.f32.xlu0 %v2023_v37 }
 0xb3b   :  { %v2026_v58 = vsel %vm239_vm2, %v5874_v40, 0.0 }
 0xb3c   :  { %2027 = vadd.xlane.f32.xlu1 %v2026_v58  ;;  %v1990_v57 = vpop.f32.mrb[80].mxu0 }
 0xb3d   :  { %v2000_v53 = vadd.f32 %v1990_v57, %v5739_v25  ;;  %v4365_v51 = vpop.f32.mrb[81].mxu0 }
 0xb3e   :  { %v1993_v60 = vpop.f32.mrb[82].mxu0 }
 0xb3f   :  { %v5881_v5 = vadd.f32 %v3877_v39, %v2000_v53  ;;  %v4366_v45 = vpop.f32.mrb[83].mxu0 }
 0xb41   :  { %v2029_v18 = vsel %vm252_vm3, %v5881_v5, 0.0 }
 0xb42   :  { %2030 = vadd.xlane.f32.xlu0 %v2029_v18 }
 0xbbe   :  { %v2019_v20 = vpop.xlane.xlu0 %2018 }
 0xbbf   :  { %v2032_v44 = vmul.f32 0.03125, %v2019_v20 }
 0xbc0   :  { %v2022_v1 = vpop.xlane.xlu1 %2021 }
 0xbc1   :  { %v2037_v11 = vsub.f32 %v5861_v48, %v2032_v44  ;;  %v2033_v17 = vmul.f32 0.03125, %v2022_v1 }
 0xbc3   :  { %v2038_v23 = vsub.f32 %v5864_v2, %v2033_v17  ;;  %v2042_v55 = vmul.f32 %v2037_v11, %v2037_v11 }
 0xbc5   :  { %v2047_v25 = vsel %vm239_vm2, %v2042_v55, 0.0  ;;  %v2043_v34 = vmul.f32 %v2038_v23, %v2038_v23 }
 0xbc6   :  { %2048 = vadd.xlane.f32.xlu1 %v2047_v25 }
 0xbc7   :  { %v2025_v19 = vpop.xlane.xlu0 %2024  ;;  %v2050_v49 = vsel %vm239_vm2, %v2043_v34, 0.0 }
 0xbc8   :  { %v2034_v13 = vmul.f32 0.03125, %v2025_v19  ;;  %2051 = vadd.xlane.f32.xlu0 %v2050_v49  ;;  %v3887_v49 = vld [vmem:[%s6642_s9 + $0x1] ss:$0 sm:$0xff] }
 0xbc9   :  { %v2028_v38 = vpop.xlane.xlu1 %2027 }
 0xbca   :  { %v2039_v61 = vsub.f32 %v5871_v43, %v2034_v13  ;;  %v2035_v35 = vmul.f32 0.03125, %v2028_v38 }
 0xbcc   :  { %v2040_v63 = vsub.f32 %v5874_v40, %v2035_v35  ;;  %v2044_v3 = vmul.f32 %v2039_v61, %v2039_v61 }
 0xbce   :  { %v2053_v54 = vsel %vm239_vm2, %v2044_v3, 0.0  ;;  %v2045_v15 = vmul.f32 %v2040_v63, %v2040_v63 }
 0xbcf   :  { %2054 = vadd.xlane.f32.xlu1 %v2053_v54  ;;  %v2031_v31 = vpop.xlane.xlu0 %2030 }
 0xbd0   :  { %v2036_v59 = vmul.f32 0.03125, %v2031_v31  ;;  %v2056_v12 = vsel %vm239_vm2, %v2045_v15, 0.0 }
 0xbd1   :  { %2057 = vadd.xlane.f32.xlu0 %v2056_v12 }
 0xbd2   :  { %v2041_v9 = vsub.f32 %v5881_v5, %v2036_v59 }
 0xbd4   :  { %v2046_v62 = vmul.f32 %v2041_v9, %v2041_v9 }
 0xbd6   :  { %v2059_v27 = vsel %vm252_vm3, %v2046_v62, 0.0 }
 0xbd7   :  { %2060 = vadd.xlane.f32.xlu1 %v2059_v27 }
 0xc53   :  { %v2049_v8 = vpop.xlane.xlu1 %2048 }
 0xc54   :  { %v2062_v26 = vmul.f32 0.03125, %v2049_v8 }
 0xc55   :  { %v2052_v28 = vpop.xlane.xlu0 %2051 }
 0xc56   :  { %v2067_v29 = vadd.f32 1e-05, %v2062_v26  ;;  %v2063_v6 = vmul.f32 0.03125, %v2052_v28 }
 0xc58   :  { %4748 = vrsqrt.f32 %v2067_v29  ;;  %v2068_v41 = vadd.f32 1e-05, %v2063_v6 }
 0xc5a   :  { %4750 = vrsqrt.f32 %v2068_v41  ;;  %v4875_v41 = vld [vmem:[%s6680_s26 + $0x8] sm:$0xff]  }
 0xc5c   :  { %v2055_v47 = vpop.xlane.xlu1 %2054 }
 0xc5d   :  { %v2064_v30 = vmul.f32 0.03125, %v2055_v47  ;;  %v4876_v47 = vld [vmem:[%s6680_s26 + $0x10] sm:$0xff]  }
 0xc5e   :  { %v2058_v39 = vpop.xlane.xlu0 %2057 }
 0xc5f   :  { %v2069_v36 = vadd.f32 1e-05, %v2064_v30  ;;  %v2065_v50 = vmul.f32 0.03125, %v2058_v39  ;;  %v4877_v30 = vld [vmem:[%s6680_s26 + $0x18] sm:$0xff]   ;;  %v4878_v39 = vld [vmem:[%s6680_s26 + $0x20] sm:$0xff]  }
 0xc61   :  { %4752 = vrsqrt.f32 %v2069_v36  ;;  %v2070_v42 = vadd.f32 1e-05, %v2065_v50  ;;  %v4879_v36 = vld [vmem:[%s6680_s26 + $0x28] sm:$0xff]   ;;  %v4880_v50 = vld [vmem:[%s6680_s26 + $0x30] sm:$0xff]  }
 0xc62   :  { %v4749_v46 = vpop.eup %4748 }
 0xc63   :  { %v2077_v56 = vmul.f32 %v4749_v46, %v2037_v11  ;;  %4754 = vrsqrt.f32 %v2070_v42  ;;  %v4881_v42 = vld [vmem:[%s6680_s26 + $0x38] sm:$0xff]   ;;  %v4882_v46 = vld [vmem:[%s6680_s26 + $0x40] sm:$0xff]  }
 0xc64   :  { %v4751_v24 = vpop.eup %4750  ;;  %v2061_v52 = vpop.xlane.xlu1 %2060 }
 0xc65   :  { %v2088_v10 = vmul.f32 %v3880_v21, %v2077_v56  ;;  %v2078_v7 = vmul.f32 %v4751_v24, %v2038_v23  ;;  %v2066_v33 = vmul.f32 0.03125, %v2061_v52 }
 0xc67   :  { %v2099_v14 = vadd.f32 %v3881_v22, %v2088_v10  ;;  %v2089_v37 = vmul.f32 %v3880_v21, %v2078_v7  ;;  %v2071_v58 = vadd.f32 1e-05, %v2066_v33 }
 0xc69   :  { %v2100_v57 = vadd.f32 %v3881_v22, %v2089_v37  ;;  %4756 = vrsqrt.f32 %v2071_v58  ;;  %v5984_v58 = vld [vmem:[%s6643_s4 + $0x10] sm:$0xff] }
 0xc6b   :  { %v4753_v53 = vpop.eup %4752  ;;  %v2104_v51 = vpack.c.bf16 %v2100_v57, %v2099_v14 }
 0xc6c   :  { %v2079_v60 = vmul.f32 %v4753_v53, %v2039_v61  ;;  %v5990_v53 = vld [vmem:[%s6643_s4 + $0x18] sm:$0xff] }
 0xc6d   :  { %v4755_v45 = vpop.eup %4754  ;;  %4372 = vmatmul.mubr.msk.bf16.vlgmr.msra.gmra.mrb[72].mxu1 %vm239_vm2, %v2104_v51 }
 0xc6e   :  { %v2080_v18 = vmul.f32 %v4755_v45, %v2040_v63  ;;  %4375 = vmatprep.mubr.msk.bf16.mxu1 %vm4925_vm0, %v4924_v0  ;;  %v2090_v20 = vmul.f32 %v3880_v21, %v2079_v60  ;;  %v5996_v45 = vld [vmem:[%s6643_s4] sm:$0xff] }
 0xc70   :  { %v2091_v44 = vmul.f32 %v3880_v21, %v2080_v18  ;;  %v2101_v1 = vadd.f32 %v3881_v22, %v2090_v20  ;;  %v6002_v20 = vld [vmem:[%s6643_s4 + $0x8] sm:$0xff] }
 0xc72   :  { %v2102_v11 = vadd.f32 %v3881_v22, %v2091_v44 }
 0xc73   :  { %v4757_v17 = vpop.eup %4756 }
 0xc74   :  { %v2105_v23 = vpack.c.bf16 %v2102_v11, %v2101_v1  ;;  %v2081_v55 = vmul.f32 %v4757_v17, %v2041_v9 }
 0xc76   :  { %4376 = vmatmul.mubr.msk.bf16.gmra.mrb[76].mxu1 %vm239_vm2, %v2105_v23  ;;  %v2092_v25 = vmul.f32 %v3880_v21, %v2081_v55  ;;  %v4883_v21 = vld [vmem:[%s6680_s26 + $0x48] sm:$0xff]   ;;  %v6009_v23 = vld [vmem:[%s6643_s4 + $0x30] sm:$0xff] }
 0xc77   :  { %4379 = vmatprep.mubr.msk.bf16.mxu1 %vm4925_vm0, %v4924_v0 }
 0xc78   :  { %v2103_v34 = vadd.f32 %v3881_v22, %v2092_v25 }
 0xc7a   :  { %v2106_v19 = vpack.c.bf16 %v2103_v34, %v2103_v34 }
 0xc7e   :  { %4380 = vmatmul.mubr.msk.bf16.gmra.mrb[80].mxu1 %vm239_vm2, %v2106_v19  ;;  %v6016_v19 = vld [vmem:[%s6643_s4 + $0x38] sm:$0xff] }
 0xd40   :  { %v2175_v13 = vpop.f32.mrb[72].mxu1 }
 0xd41   :  { %v4373_v38 = vpop.f32.mrb[73].mxu1  ;;  %v2176_v35 = vadd.f32 %v3887_v49, %v2175_v13 }
 0xd42   :  { %v2178_v61 = vpop.f32.mrb[74].mxu1  ;;  %v6022_v38 = vld [vmem:[%s6643_s4 + $0x20] sm:$0xff] }
 0xd43   :  { %v2179_v63 = vadd.f32 %v3887_v49, %v2178_v61  ;;  %v4374_v3 = vpop.f32.mrb[75].mxu1 }
 0xd45   :  { %v5918_v54 = vpack.c.bf16 %v2179_v63, %v2176_v35  ;;  %v6028_v35 = vld [vmem:[%s6643_s4 + $0x28] sm:$0xff] }
 0xd47   :  { %2349 = vrot.lane.b32.xlu0 %v5918_v54, %s4926_s8  ;;  %4383 = vmatprep.subr.bf16.mxu0 %v5918_v54 }
 0xd48   :  { %4384 = vmatpush3.bf16.msra.mxu0 %v5918_v54 }
 0xd49   :  { %v2183_v15 = vpop.f32.mrb[76].mxu1 }
 0xd4a   :  { %v4377_v31 = vpop.f32.mrb[77].mxu1  ;;  %v2184_v12 = vadd.f32 %v3887_v49, %v2183_v15 }
 0xd4b   :  { %v2186_v59 = vpop.f32.mrb[78].mxu1 }
 0xd4c   :  { %v2187_v9 = vadd.f32 %v3887_v49, %v2186_v59  ;;  %v4378_v62 = vpop.f32.mrb[79].mxu1  ;;  %v6036_v59 = vld [vmem:[%s6643_s4 + $0x50] sm:$0xff] }
 0xd4d   :  { %v6042_v62 = vld [vmem:[%s6643_s4 + $0x40] sm:$0xff] }
 0xd4e   :  { %v5924_v27 = vpack.c.bf16 %v2187_v9, %v2184_v12 }
 0xd50   :  { %2351 = vrot.lane.b32.xlu1 %v5924_v27, %s4926_s8  ;;  %4385 = vmatprep.subr.bf16.mxu0 %v5924_v27 }
 0xd51   :  { %v2191_v16 = vpop.f32.mrb[80].mxu1  ;;  %4386 = vmatpush3.bf16.msra.mxu0 %v5924_v27 }
 0xd52   :  { %v2192_v4 = vadd.f32 %v3887_v49, %v2191_v16  ;;  %v4381_v8 = vpop.f32.mrb[81].mxu1 }
 0xd53   :  { %v2194_v26 = vpop.f32.mrb[82].mxu1  ;;  %v6048_v8 = vld [vmem:[%s6643_s4 + $0x58] sm:$0xff] }
 0xd54   :  { %v5930_v28 = vpack.c.bf16 %v2192_v4, %v2192_v4  ;;  %v4382_v29 = vpop.f32.mrb[83].mxu1 }
 0xd56   :  { %2353 = vrot.lane.b32.xlu1 %v5930_v28, %s4926_s8  ;;  %4573 = vmatprep.subr.msk.bf16.mxu0 %vm504_vm5, %v5930_v28  ;;  %v2201_v6 = vsel %vm504_vm5, %v5930_v28, 0 }
 0xd57   :  { %4388 = vmatpush3.bf16.msra.mxu0 %v2201_v6  ;;  %v6054_v6 = vld [vmem:[%s6643_s4 + $0x48] sm:$0xff] }
 0xd5a   :  { %4390 = vmatmul.mubr.msk.bf16.vlgmr.msra.gmra.mrb[84].mxu0 %vm473_vm4, %v4875_v41 }
 0xd5b   :  { %4393 = vmatprep.mubr.msk.bf16.mxu0 %vm473_vm4, %v4876_v47 }
 0xd62   :  { %4394 = vmatmul.mubr.msk.bf16.gmra.mrb[88].mxu0 %vm473_vm4, %v4877_v30 }
 0xd63   :  { %4397 = vmatprep.mubr.msk.bf16.mxu0 %vm473_vm4, %v4878_v39 }
 0xd6a   :  { %4398 = vmatmul.mubr.msk.bf16.gmra.mrb[92].mxu0 %vm473_vm4, %v4879_v36  ;;  %v6061_v36 = vld [vmem:[%s6643_s4 + $0x70] sm:$0xff] }
 0xd6b   :  { %4401 = vmatprep.mubr.msk.bf16.mxu0 %vm473_vm4, %v4880_v50 }
 0xd72   :  { %4402 = vmatmul.mubr.msk.bf16.gmra.mrb[96].mxu0 %vm473_vm4, %v4881_v42 }
 0xd73   :  { %4405 = vmatprep.mubr.msk.bf16.mxu0 %vm473_vm4, %v4882_v46  ;;  %v6068_v46 = vld [vmem:[%s6643_s4 + $0x60] sm:$0xff] }
 0xd7a   :  { %4406 = vmatmul.mubr.msk.bf16.gmra.mrb[100].mxu0 %vm473_vm4, %v4883_v21 }
 0xdb9   :  { %v2350_v56 = vpop.permute.xlu0 %2349 }
 0xdba   :  { %v2386_v24 = vsel %vm239_vm2, %v2350_v56, 0  ;;  %4574 = vmatprep.subr.msk.bf16.mxu1 %vm239_vm2, %v2350_v56 }
 0xdbb   :  { %4410 = vmatpush3.bf16.xpose.msra.mxu1 %v2386_v24  ;;  %v6074_v24 = vld [vmem:[%s6643_s4 + $0x78] sm:$0xff] }
 0xdc2   :  { %v2352_v22 = vpop.permute.xlu1 %2351 }
 0xdc3   :  { %v2389_v52 = vsel %vm239_vm2, %v2352_v22, 0  ;;  %4575 = vmatprep.subr.msk.bf16.mxu1 %vm239_vm2, %v2352_v22 }
 0xdc4   :  { %4412 = vmatpush3.bf16.xpose.msra.mxu1 %v2389_v52 }
 0xdc8   :  { %v2354_v10 = vpop.permute.xlu1 %2353 }
 0xdc9   :  { %4576 = vmatprep.subr.msk.bf16.mxu1 %vm239_vm2, %v2354_v10  ;;  %v2392_v7 = vsel %vm239_vm2, %v2354_v10, 0  ;;  %v6080_v10 = vld [vmem:[%s6643_s4 + $0x68] sm:$0xff] }
 0xdcc   :  { %4414 = vmatpush3.bf16.xpose.msra.mxu1 %v2392_v7 }
 0xdcd   :  { %4461 = vmatprep.subr.bf16.mxu1 %v4924_v0 }
 0xe2d   :  { %v4391_v33 = vpop.f32.mrb[84].mxu0 }
 0xe2e   :  { %v2237_v14 = vpop.f32.mrb[85].mxu0  ;;  %v2318_v57 = vmul.f32 %v5984_v58, %v4391_v33 }
 0xe2f   :  { %v4392_v37 = vpop.f32.mrb[86].mxu0  ;;  %v2316_v18 = vmul.f32 %v5996_v45, %v2237_v14 }
 0xe30   :  { %v2319_v51 = vmul.f32 %v5990_v53, %v4392_v37  ;;  %v2240_v60 = vpop.f32.mrb[87].mxu0 }
 0xe31   :  { %v2317_v44 = vmul.f32 %v6002_v20, %v2240_v60 }
 0xe32   :  { %v2337_v1 = vpack.c.bf16 %v2319_v51, %v2318_v57  ;;  %v6087_v57 = vld [vmem:[%s6643_s4 + $0x90] sm:$0xff] }
 0xe33   :  { %v2336_v11 = vpack.c.bf16 %v2317_v44, %v2316_v18  ;;  %v6094_v18 = vld [vmem:[%s6643_s4 + $0x80] sm:$0xff] }
 0xe35   :  { %v4395_v17 = vpop.f32.mrb[88].mxu0  ;;  %4415 = vmatprep.mubr.msk.bf16.mxu1 %vm239_vm2, %v2336_v11  ;;  %v6100_v11 = vld [vmem:[%s6643_s4 + $0x98] sm:$0xff] }
 0xe36   :  { %v2322_v55 = vmul.f32 %v6009_v23, %v4395_v17  ;;  %v2253_v25 = vpop.f32.mrb[89].mxu0  ;;  %4416 = vmatmul.mubr.msk.bf16.vlgmr.msra.gmra.mrb[84].mxu1 %vm239_vm2, %v2337_v1 }
 0xe37   :  { %v4396_v34 = vpop.f32.mrb[90].mxu0  ;;  %v2320_v61 = vmul.f32 %v6022_v38, %v2253_v25  ;;  %v6106_v25 = vld [vmem:[%s6643_s4 + $0x88] sm:$0xff] }
 0xe38   :  { %v2323_v49 = vmul.f32 %v6016_v19, %v4396_v34  ;;  %v2256_v13 = vpop.f32.mrb[91].mxu0 }
 0xe39   :  { %v2321_v63 = vmul.f32 %v6028_v35, %v2256_v13 }
 0xe3a   :  { %v2339_v3 = vpack.c.bf16 %v2323_v49, %v2322_v55 }
 0xe3b   :  { %v2338_v15 = vpack.c.bf16 %v2321_v63, %v2320_v61  ;;  %v4904_v63 = vld [vmem:[%s6644_s5 + $0x10] sm:$0xff] }
 0xe3d   :  { %4419 = vmatprep.mubr.msk.bf16.mxu1 %vm239_vm2, %v2338_v15  ;;  %v4399_v31 = vpop.f32.mrb[92].mxu0 }
 0xe3e   :  { %4420 = vmatmul.mubr.msk.bf16.gmra.mrb[88].mxu1 %vm239_vm2, %v2339_v3  ;;  %v2326_v12 = vmul.f32 %v6036_v59, %v4399_v31  ;;  %v2269_v9 = vpop.f32.mrb[93].mxu0  ;;  %v4905_v31 = vld [vmem:[%s6644_s5] sm:$0xff] }
 0xe3f   :  { %v2324_v16 = vmul.f32 %v6042_v62, %v2269_v9  ;;  %v4400_v4 = vpop.f32.mrb[94].mxu0 }
 0xe40   :  { %v2327_v26 = vmul.f32 %v6048_v8, %v4400_v4  ;;  %v2272_v29 = vpop.f32.mrb[95].mxu0 }
 0xe41   :  { %v2325_v41 = vmul.f32 %v6054_v6, %v2272_v29 }
 0xe42   :  { %v2341_v47 = vpack.c.bf16 %v2327_v26, %v2326_v12  ;;  %v4906_v26 = vld [vmem:[%s6644_s5 + $0x8] sm:$0xff] }
 0xe43   :  { %v2340_v30 = vpack.c.bf16 %v2325_v41, %v2324_v16 }
 0xe45   :  { %v4403_v39 = vpop.f32.mrb[96].mxu0  ;;  %4423 = vmatprep.mubr.msk.bf16.mxu1 %vm239_vm2, %v2340_v30  ;;  %v4907_v30 = vld [vmem:[%s6644_s5 + $0x18] sm:$0xff] }
 0xe46   :  { %v2330_v50 = vmul.f32 %v6061_v36, %v4403_v39  ;;  %v2285_v42 = vpop.f32.mrb[97].mxu0  ;;  %4424 = vmatmul.mubr.msk.bf16.gmra.mrb[92].mxu1 %vm239_vm2, %v2341_v47 }
 0xe47   :  { %v2328_v21 = vmul.f32 %v6068_v46, %v2285_v42  ;;  %v4404_v56 = vpop.f32.mrb[98].mxu0  ;;  %v4908_v42 = vld [vmem:[%s6644_s5 + $0x30] sm:$0xff] }
 0xe48   :  { %v2331_v22 = vmul.f32 %v6074_v24, %v4404_v56  ;;  %v2288_v52 = vpop.f32.mrb[99].mxu0 }
 0xe49   :  { %v2329_v7 = vmul.f32 %v6080_v10, %v2288_v52  ;;  %v4909_v52 = vld [vmem:[%s6644_s5 + $0x20] sm:$0xff] }
 0xe4a   :  { %v2343_v33 = vpack.c.bf16 %v2331_v22, %v2330_v50 }
 0xe4b   :  { %v2342_v14 = vpack.c.bf16 %v2329_v7, %v2328_v21 }
 0xe4d   :  { %v4407_v37 = vpop.f32.mrb[100].mxu0  ;;  %4427 = vmatprep.mubr.msk.bf16.mxu1 %vm239_vm2, %v2342_v14 }
 0xe4e   :  { %v2334_v51 = vmul.f32 %v6087_v57, %v4407_v37  ;;  %v2301_v60 = vpop.f32.mrb[101].mxu0  ;;  %4428 = vmatmul.mubr.msk.bf16.gmra.mrb[96].mxu1 %vm239_vm2, %v2343_v33 }
 0xe4f   :  { %v2332_v44 = vmul.f32 %v6094_v18, %v2301_v60  ;;  %v4408_v1 = vpop.f32.mrb[102].mxu0 }
 0xe50   :  { %v2335_v17 = vmul.f32 %v6100_v11, %v4408_v1  ;;  %v2304_v55 = vpop.f32.mrb[103].mxu0  ;;  %v4911_v1 = vld [vmem:[%s6644_s5 + $0x38] sm:$0xff] }
 0xe51   :  { %v2333_v34 = vmul.f32 %v6106_v25, %v2304_v55 }
 0xe52   :  { %v2345_v49 = vpack.c.bf16 %v2335_v17, %v2334_v51  ;;  %v4910_v51 = vld [vmem:[%s6644_s5 + $0x28] sm:$0xff] }
 0xe53   :  { %v2344_v13 = vpack.c.bf16 %v2333_v34, %v2332_v44 }
 0xe55   :  { %4431 = vmatprep.mubr.msk.bf16.mxu1 %vm239_vm2, %v2344_v13 }
 0xe56   :  { %4432 = vmatmul.mubr.msk.bf16.gmra.mrb[100].mxu1 %vm239_vm2, %v2345_v49 }
 0xe57   :  { %4465 = vmatprep.mubr.msk.bf16.mxu1 %vm4925_vm0, %v4924_v0 }
 0xf09   :  { %v4417_v61 = vpop.f32.mrb[84].mxu1 }
 0xf0a   :  { %v6116_v3 = vadd.f32 %v4904_v63, %v4417_v61  ;;  %v2428_v15 = vpop.f32.mrb[85].mxu1  ;;  %v4912_v63 = vld [vmem:[%s6644_s5 + $0x58] sm:$0xff] }
 0xf0b   :  { %v6121_v12 = vadd.f32 %v4905_v31, %v2428_v15  ;;  %v4418_v9 = vpop.f32.mrb[86].mxu1 }
 0xf0c   :  { %v2431_v16 = vpop.f32.mrb[87].mxu1  ;;  %v2513_v4 = vsel %vm473_vm4, %v6116_v3, -inf  ;;  %v6137_v39 = vadd.f32 %v4907_v30, %v4418_v9 }
 0xf0d   :  { %v6128_v29 = vadd.f32 %v4906_v26, %v2431_v16  ;;  %2514 = vmax.xlane.f32.xlu0 %v2513_v4  ;;  %v2507_v41 = vsel %vm473_vm4, %v6121_v12, -inf  ;;  %v4913_v16 = vld [vmem:[%s6644_s5 + $0x48] sm:$0xff] }
 0xf0e   :  { %2508 = vmax.xlane.f32.xlu1 %v2507_v41  ;;  %v2516_v33 = vsel %vm473_vm4, %v6137_v39, -inf }
 0xf0f   :  { %v2510_v47 = vsel %vm473_vm4, %v6128_v29, -inf }
 0xf11   :  { %2511 = vmax.xlane.f32.xlu0 %v2510_v47  ;;  %v4421_v50 = vpop.f32.mrb[88].mxu1 }
 0xf12   :  { %v6142_v21 = vadd.f32 %v4908_v42, %v4421_v50  ;;  %v2444_v56 = vpop.f32.mrb[89].mxu1  ;;  %v4914_v50 = vld [vmem:[%s6644_s5 + $0x78] sm:$0xff] }
 0xf13   :  { %v4422_v22 = vpop.f32.mrb[90].mxu1  ;;  %v6147_v7 = vadd.f32 %v4909_v52, %v2444_v56  ;;  %v4915_v52 = vld [vmem:[%s6644_s5 + $0x68] sm:$0xff] }
 0xf14   :  { %v2525_v14 = vsel %vm473_vm4, %v6142_v21, -inf  ;;  %v2447_v37 = vpop.f32.mrb[91].mxu1  ;;  %v6163_v17 = vadd.f32 %v4911_v1, %v4422_v22  ;;  %v4916_v1 = vld [vmem:[%s6644_s5 + $0x98] sm:$0xff] }
 0xf15   :  { %2517 = vmax.xlane.f32.xlu0 %v2516_v33  ;;  %2526 = vmax.xlane.f32.xlu1 %v2525_v14  ;;  %v6156_v60 = vadd.f32 %v4910_v51, %v2447_v37  ;;  %v2519_v55 = vsel %vm473_vm4, %v6147_v7, -inf }
 0xf16   :  { %v2528_v61 = vsel %vm473_vm4, %v6163_v17, -inf }
 0xf17   :  { %v2522_v44 = vsel %vm473_vm4, %v6156_v60, -inf }
 0xf19   :  { %2523 = vmax.xlane.f32.xlu0 %v2522_v44  ;;  %2520 = vmax.xlane.f32.xlu1 %v2519_v55  ;;  %v4425_v34 = vpop.f32.mrb[92].mxu1 }
 0xf1a   :  { %v2460_v49 = vpop.f32.mrb[93].mxu1 }
 0xf1b   :  { %v4426_v13 = vpop.f32.mrb[94].mxu1 }
 0xf1c   :  { %v6172_v15 = vadd.f32 %v4912_v63, %v4426_v13  ;;  %v2463_v31 = vpop.f32.mrb[95].mxu1 }
 0xf1d   :  { %2529 = vmax.xlane.f32.xlu0 %v2528_v61  ;;  %v6179_v4 = vadd.f32 %v4913_v16, %v2463_v31 }
 0xf1e   :  { %v2540_v9 = vsel %vm473_vm4, %v6172_v15, -inf }
 0xf1f   :  { %v2534_v47 = vsel %vm473_vm4, %v6179_v4, -inf }
 0xf21   :  { %2541 = vmax.xlane.f32.xlu0 %v2540_v9  ;;  %v4429_v26 = vpop.f32.mrb[96].mxu1  ;;  %v4918_v9 = vld [vmem:[%s6644_s5 + $0x50] sm:$0xff] }
 0xf22   :  { %v2476_v41 = vpop.f32.mrb[97].mxu1  ;;  %v6216_v16 = vadd.f32 %v4918_v9, %v4425_v34 }
 0xf23   :  { %v4430_v30 = vpop.f32.mrb[98].mxu1 }
 0xf24   :  { %v6186_v42 = vadd.f32 %v4914_v50, %v4430_v30  ;;  %v2479_v56 = vpop.f32.mrb[99].mxu1  ;;  %v2537_v50 = vsel %vm473_vm4, %v6216_v16, -inf }
 0xf25   :  { %2535 = vmax.xlane.f32.xlu0 %v2534_v47  ;;  %v6193_v33 = vadd.f32 %v4915_v52, %v2479_v56  ;;  %v4919_v47 = vld [vmem:[%s6644_s5 + $0x40] sm:$0xff]  ;;  %v4920_v56 = vld [vmem:[%s6644_s5 + $0x70] sm:$0xff] }
 0xf26   :  { %v2552_v22 = vsel %vm473_vm4, %v6186_v42, -inf  ;;  %v6221_v30 = vadd.f32 %v4919_v47, %v2460_v49  ;;  %v4921_v49 = vld [vmem:[%s6644_s5 + $0x60] sm:$0xff] }
 0xf27   :  { %v2546_v51 = vsel %vm473_vm4, %v6193_v33, -inf }
 0xf28   :  { %v2531_v34 = vsel %vm473_vm4, %v6221_v30, -inf }
 0xf29   :  { %2553 = vmax.xlane.f32.xlu0 %v2552_v22  ;;  %v4433_v14 = vpop.f32.mrb[100].mxu1  ;;  %v6228_v22 = vadd.f32 %v4920_v56, %v4429_v26 }
 0xf2a   :  { %2737 = vrot.lane.b32.xlu1 %v5918_v54, %s4927_s0  ;;  %v2492_v37 = vpop.f32.mrb[101].mxu1  ;;  %v4917_v54 = vld [vmem:[%s6644_s5 + $0x88] sm:$0xff] }
 0xf2b   :  { %v4434_v44 = vpop.f32.mrb[102].mxu1  ;;  %v2549_v52 = vsel %vm473_vm4, %v6228_v22, -inf }
 0xf2c   :  { %v6202_v55 = vadd.f32 %v4916_v1, %v4434_v44  ;;  %v2495_v13 = vpop.f32.mrb[103].mxu1  ;;  %v4922_v44 = vld [vmem:[%s6644_s5 + $0x90] sm:$0xff] }
 0xf2d   :  { %2547 = vmax.xlane.f32.xlu0 %v2546_v51  ;;  %v6209_v63 = vadd.f32 %v4917_v54, %v2495_v13  ;;  %v6237_v51 = vadd.f32 %v4921_v49, %v2476_v41  ;;  %v6242_v26 = vadd.f32 %v4922_v44, %v4433_v14 }
 0xf2e   :  { %v2564_v61 = vsel %vm473_vm4, %v6202_v55, -inf }
 0xf2f   :  { %v2558_v31 = vsel %vm473_vm4, %v6209_v63, -inf  ;;  %v2543_v1 = vsel %vm473_vm4, %v6237_v51, -inf  ;;  %v2561_v13 = vsel %vm473_vm4, %v6242_v26, -inf }
 0xf31   :  { %2565 = vmax.xlane.f32.xlu0 %v2564_v61  ;;  %v4923_v61 = vld [vmem:[%s6644_s5 + $0x80] sm:$0xff] }
 0xf32   :  { %v6251_v41 = vadd.f32 %v4923_v61, %v2492_v37 }
 0xf34   :  { %v2555_v54 = vsel %vm473_vm4, %v6251_v41, -inf }
 0xf35   :  { %2559 = vmax.xlane.f32.xlu0 %v2558_v31 }
 0xf4e   :  { %2538 = vmax.xlane.f32.xlu1 %v2537_v50 }
 0xf52   :  { %2532 = vmax.xlane.f32.xlu1 %v2531_v34 }
 0xf56   :  { %2550 = vmax.xlane.f32.xlu1 %v2549_v52 }
 0xf5a   :  { %2544 = vmax.xlane.f32.xlu1 %v2543_v1 }
 0xf5e   :  { %2562 = vmax.xlane.f32.xlu1 %v2561_v13 }
 0xf62   :  { %2556 = vmax.xlane.f32.xlu1 %v2555_v54 }
 0xf9a   :  { %v2515_v14 = vpop.xlane.xlu0 %2514 }
 0xf9b   :  { %v2569_v31 = vsub.f32 %v6116_v3, %v2515_v14  ;;  %v2509_v9 = vpop.xlane.xlu1 %2508 }
 0xf9c   :  { %v2567_v47 = vsub.f32 %v6121_v12, %v2509_v9 }
 0xf9d   :  { %v2591_v50 = vmul.f32 1.442695, %v2569_v31 }
 0xf9e   :  { %v2587_v56 = vmul.f32 1.442695, %v2567_v47  ;;  %v2512_v34 = vpop.xlane.xlu0 %2511 }
 0xf9f   :  { %4758 = vpow2.f32 %v2591_v50  ;;  %v2568_v52 = vsub.f32 %v6128_v29, %v2512_v34 }
 0xfa0   :  { %4760 = vpow2.f32 %v2587_v56 }
 0xfa1   :  { %v2589_v1 = vmul.f32 1.442695, %v2568_v52 }
 0xfa2   :  { %v2518_v37 = vpop.xlane.xlu0 %2517  ;;  %v2527_v49 = vpop.xlane.xlu1 %2526 }
 0xfa3   :  { %v2570_v44 = vsub.f32 %v6137_v39, %v2518_v37  ;;  %v2573_v61 = vsub.f32 %v6142_v21, %v2527_v49 }
 0xfa5   :  { %v2593_v13 = vmul.f32 1.442695, %v2570_v44  ;;  %v2599_v31 = vmul.f32 1.442695, %v2573_v61 }
 0xfa6   :  { %v2524_v54 = vpop.xlane.xlu0 %2523  ;;  %v2521_v3 = vpop.xlane.xlu1 %2520 }
 0xfa7   :  { %4762 = vpow2.f32 %v2593_v13  ;;  %v2571_v12 = vsub.f32 %v6147_v7, %v2521_v3  ;;  %v2572_v21 = vsub.f32 %v6156_v60, %v2524_v54 }
 0xfa8   :  { %4764 = vpow2.f32 %v2589_v1 }
 0xfa9   :  { %v6261_v14 = vpop.eup %4758  ;;  %v2595_v9 = vmul.f32 1.442695, %v2571_v12  ;;  %v2597_v37 = vmul.f32 1.442695, %v2572_v21 }
 0xfaa   :  { %v2530_v47 = vpop.xlane.xlu0 %2529  ;;  %v2738_v29 = vpop.permute.xlu1 %2737  ;;  %v2633_v50 = vsel %vm473_vm4, %v6261_v14, 0.0 }
 0xfab   :  { %v6265_v39 = vpop.eup %4760  ;;  %v2574_v56 = vsub.f32 %v6163_v17, %v2530_v47  ;;  %4435 = vmatprep.subr.bf16.mxu0 %v2738_v29  ;;  %2634 = vadd.xlane.f32.xlu1 %v2633_v50  ;;  %4766 = vpow2.f32 %v2595_v9 }
 0xfac   :  { %4436 = vmatpush3.bf16.msra.mxu0 %v2738_v29  ;;  %4768 = vpow2.f32 %v2599_v31  ;;  %v2627_v34 = vsel %vm473_vm4, %v6265_v39, 0.0 }
 0xfad   :  { %v2601_v7 = vmul.f32 1.442695, %v2574_v56 }
 0xfae   :  { %v2542_v9 = vpop.xlane.xlu0 %2541 }
 0xfaf   :  { %2628 = vadd.xlane.f32.xlu1 %v2627_v34  ;;  %4770 = vpow2.f32 %v2601_v7 }
 0xfb0   :  { %4772 = vpow2.f32 %v2597_v37  ;;  %v2578_v37 = vsub.f32 %v6172_v15, %v2542_v9 }
 0xfb1   :  { %v6271_v52 = vpop.eup %4762 }
 0xfb2   :  { %v2636_v49 = vsel %vm473_vm4, %v6271_v52, 0.0  ;;  %v6275_v17 = vpop.eup %4764  ;;  %v2536_v47 = vpop.xlane.xlu0 %2535 }
 0xfb3   :  { %2637 = vadd.xlane.f32.xlu0 %v2636_v49  ;;  %v2630_v60 = vsel %vm473_vm4, %v6275_v17, 0.0  ;;  %v2576_v49 = vsub.f32 %v6179_v4, %v2536_v47 }
 0xfb5   :  { %v6277_v44 = vpop.eup %4766 }
 0xfb6   :  { %v6281_v1 = vpop.eup %4768  ;;  %v2639_v13 = vsel %vm473_vm4, %v6277_v44, 0.0  ;;  %v2554_v29 = vpop.xlane.xlu0 %2553 }
 0xfb7   :  { %2631 = vadd.xlane.f32.xlu0 %v2630_v60  ;;  %2640 = vadd.xlane.f32.xlu1 %v2639_v13  ;;  %v2645_v61 = vsel %vm473_vm4, %v6281_v1, 0.0 }
 0xfb9   :  { %v6287_v54 = vpop.eup %4770 }
 0xfba   :  { %v2648_v3 = vsel %vm473_vm4, %v6287_v54, 0.0  ;;  %v6291_v12 = vpop.eup %4772  ;;  %v2548_v56 = vpop.xlane.xlu0 %2547 }
 0xfbb   :  { %2646 = vadd.xlane.f32.xlu0 %v2645_v61  ;;  %v2642_v31 = vsel %vm473_vm4, %v6291_v12, 0.0 }
 0xfbe   :  { %v2566_v61 = vpop.xlane.xlu0 %2565 }
 0xfbf   :  { %2649 = vadd.xlane.f32.xlu0 %v2648_v3  ;;  %v2609_v3 = vmul.f32 1.442695, %v2578_v37 }
 0xfc2   :  { %v2560_v15 = vpop.xlane.xlu0 %2559 }
 0xfc3   :  { %2643 = vadd.xlane.f32.xlu0 %v2642_v31  ;;  %v2580_v31 = vsub.f32 %v6193_v33, %v2548_v56 }
 0xfc8   :  { %2741 = vrot.lane.b32.xlu1 %v5930_v28, %s4927_s0 }
 0xfd9   :  { %2739 = vrot.lane.b32.xlu0 %v5924_v27, %s4927_s0  ;;  %v2605_v27 = vmul.f32 1.442695, %v2576_v49 }
 0xfdb   :  { %v2539_v50 = vpop.xlane.xlu1 %2538 }
 0xfdc   :  { %v2577_v21 = vsub.f32 %v6216_v16, %v2539_v50  ;;  %v2613_v50 = vmul.f32 1.442695, %v2580_v31 }
 0xfde   :  { %v2607_v60 = vmul.f32 1.442695, %v2577_v21 }
 0xfdf   :  { %v2533_v7 = vpop.xlane.xlu1 %2532 }
 0xfe0   :  { %v2575_v34 = vsub.f32 %v6221_v30, %v2533_v7  ;;  %v2582_v30 = vsub.f32 %v6186_v42, %v2554_v29  ;;  %v2584_v7 = vsub.f32 %v6209_v63, %v2560_v15 }
 0xfe2   :  { %v2603_v13 = vmul.f32 1.442695, %v2575_v34  ;;  %v2617_v21 = vmul.f32 1.442695, %v2582_v30  ;;  %v2621_v29 = vmul.f32 1.442695, %v2584_v7 }
 0xfe3   :  { %v2551_v28 = vpop.xlane.xlu1 %2550 }
 0xfe4   :  { %4774 = vpow2.f32 %v2603_v13  ;;  %v2581_v4 = vsub.f32 %v6228_v22, %v2551_v28  ;;  %v2586_v22 = vsub.f32 %v6202_v55, %v2566_v61 }
 0xfe5   :  { %4776 = vpow2.f32 %v2607_v60 }
 0xfe6   :  { %4778 = vpow2.f32 %v2609_v3  ;;  %v2615_v56 = vmul.f32 1.442695, %v2581_v4  ;;  %v2625_v28 = vmul.f32 1.442695, %v2586_v22 }
 0xfe7   :  { %v2545_v32 = vpop.xlane.xlu1 %2544  ;;  %4780 = vpow2.f32 %v2605_v27 }
 0xfe8   :  { %v2579_v16 = vsub.f32 %v6237_v51, %v2545_v32  ;;  %4782 = vpow2.f32 %v2613_v50 }
 0xfea   :  { %v2611_v9 = vmul.f32 1.442695, %v2579_v16 }
 0xfeb   :  { %v2563_v47 = vpop.xlane.xlu1 %2562 }
 0xfec   :  { %4784 = vpow2.f32 %v2611_v9  ;;  %v2585_v63 = vsub.f32 %v6242_v26, %v2563_v47 }
 0xfed   :  { %4786 = vpow2.f32 %v2617_v21 }
 0xfee   :  { %v6308_v33 = vpop.eup %4774  ;;  %4788 = vpow2.f32 %v2615_v56 }
 0xfef   :  { %v2557_v34 = vpop.xlane.xlu1 %2556  ;;  %v2651_v32 = vsel %vm473_vm4, %v6308_v33, 0.0  ;;  %v6312_v42 = vpop.eup %4776  ;;  %4790 = vpow2.f32 %v2621_v29 }
 0xff0   :  { %v2583_v51 = vsub.f32 %v6251_v41, %v2557_v34  ;;  %2652 = vadd.xlane.f32.xlu1 %v2651_v32  ;;  %v6317_v49 = vpop.eup %4778  ;;  %v2657_v60 = vsel %vm473_vm4, %v6312_v42, 0.0  ;;  %v2623_v41 = vmul.f32 1.442695, %v2585_v63 }
 0xff1   :  { %v6321_v13 = vpop.eup %4780  ;;  %v2660_v26 = vsel %vm473_vm4, %v6317_v49, 0.0 }
 0xff2   :  { %v2619_v37 = vmul.f32 1.442695, %v2583_v51  ;;  %v6323_v3 = vpop.eup %4782  ;;  %v2654_v55 = vsel %vm473_vm4, %v6321_v13, 0.0  ;;  %v4614_v51 = vld [vmem:[%s6645_s10 + $0x40] sm:$0xff]  }
 0xff3   :  { %v2666_v16 = vsel %vm473_vm4, %v6323_v3, 0.0  ;;  %4462 = vmatpush3.bf16.msra.mxu1 %v4614_v51 }
 0xff4   :  { %2658 = vadd.xlane.f32.xlu1 %v2657_v60  ;;  %4792 = vpow2.f32 %v2619_v37  ;;  %4463 = vmatprep.subr.bf16.mxu1 %v4924_v0 }
 0xff5   :  { %4794 = vpow2.f32 %v2625_v28 }
 0xff6   :  { %v6329_v61 = vpop.eup %4784  ;;  %4796 = vpow2.f32 %v2623_v41 }
 0xff7   :  { %v6331_v31 = vpop.eup %4786  ;;  %v2663_v27 = vsel %vm473_vm4, %v6329_v61, 0.0 }
 0xff8   :  { %2655 = vadd.xlane.f32.xlu0 %v2654_v55  ;;  %2661 = vadd.xlane.f32.xlu1 %v2660_v26  ;;  %v6337_v30 = vpop.eup %4788  ;;  %v2672_v4 = vsel %vm473_vm4, %v6331_v31, 0.0 }
 0xff9   :  { %v6339_v50 = vpop.eup %4790  ;;  %v2669_v15 = vsel %vm473_vm4, %v6337_v30, 0.0 }
 0xffa   :  { %v2678_v21 = vsel %vm473_vm4, %v6339_v50, 0.0 }
 0xffc   :  { %2664 = vadd.xlane.f32.xlu0 %v2663_v27  ;;  %2667 = vadd.xlane.f32.xlu1 %v2666_v16 }
 0xffe   :  { %v6345_v9 = vpop.eup %4792 }
 0xfff   :  { %v6347_v47 = vpop.eup %4794  ;;  %v2675_v7 = vsel %vm473_vm4, %v6345_v9, 0.0 }
0x1000   :  { %2670 = vadd.xlane.f32.xlu0 %v2669_v15  ;;  %2673 = vadd.xlane.f32.xlu1 %v2672_v4  ;;  %v6353_v56 = vpop.eup %4796  ;;  %v2684_v34 = vsel %vm473_vm4, %v6347_v47, 0.0 }
0x1001   :  { %v2681_v32 = vsel %vm473_vm4, %v6353_v56, 0.0 }
0x1004   :  { %2679 = vadd.xlane.f32.xlu1 %v2678_v21  ;;  %2676 = vadd.xlane.f32.xlu0 %v2675_v7 }
0x1008   :  { %2685 = vadd.xlane.f32.xlu1 %v2684_v34  ;;  %2682 = vadd.xlane.f32.xlu0 %v2681_v32 }
0x1038   :  { %v2635_v22 = vpop.xlane.xlu1 %2634 }
0x103c   :  { %v2629_v29 = vpop.xlane.xlu1 %2628 }
0x103d   :  { %4798 = vrcp.f32 %v2629_v29 }
0x1040   :  { %v2638_v63 = vpop.xlane.xlu0 %2637 }
0x1044   :  { %v2632_v37 = vpop.xlane.xlu0 %2631  ;;  %v2641_v28 = vpop.xlane.xlu1 %2640 }
0x1045   :  { %4800 = vrcp.f32 %v2632_v37 }
0x1046   :  { %4802 = vrcp.f32 %v2638_v63 }
0x1047   :  { %4804 = vrcp.f32 %v2635_v22  ;;  %v4799_v55 = vpop.eup %4798 }
0x1048   :  { %v2647_v60 = vpop.xlane.xlu0 %2646  ;;  %4806 = vrcp.f32 %v2641_v28  ;;  %v2707_v16 = vmul.f32 %v4799_v55, %v6265_v39  ;;  %v2742_v32 = vpop.permute.xlu1 %2741 }
0x104c   :  { %v2650_v41 = vpop.xlane.xlu0 %2649 }
0x104f   :  { %v4801_v26 = vpop.eup %4800 }
0x1050   :  { %v2644_v27 = vpop.xlane.xlu0 %2643  ;;  %v2708_v15 = vmul.f32 %v4801_v26, %v6275_v17  ;;  %v4803_v21 = vpop.eup %4802  ;;  %v2776_v17 = vsel %vm504_vm5, %v2742_v32, 0 }
0x1051   :  { %4808 = vrcp.f32 %v2644_v27  ;;  %v4805_v34 = vpop.eup %4804  ;;  %v2710_v51 = vmul.f32 %v4803_v21, %v6271_v52 }
0x1052   :  { %4810 = vrcp.f32 %v2650_v41  ;;  %v2727_v4 = vpack.c.bf16 %v2708_v15, %v2707_v16  ;;  %v4807_v22 = vpop.eup %4806  ;;  %v2709_v39 = vmul.f32 %v4805_v34, %v6261_v14 }
0x1053   :  { %4812 = vrcp.f32 %v2647_v60  ;;  %v2711_v60 = vmul.f32 %v4807_v22, %v6277_v44 }
0x1054   :  { %v2740_v7 = vpop.permute.xlu0 %2739  ;;  %4441 = vmatprep.mubr.msk.bf16.mxu0 %vm473_vm4, %v2727_v4  ;;  %v2728_v63 = vpack.c.bf16 %v2710_v51, %v2709_v39 }
0x1055   :  { %4437 = vmatprep.subr.bf16.mxu0 %v2740_v7 }
0x1056   :  { %4438 = vmatpush3.bf16.msra.mxu0 %v2740_v7 }
0x1057   :  { %4577 = vmatprep.subr.msk.bf16.mxu0 %vm504_vm5, %v2742_v32 }
0x105a   :  { %4440 = vmatpush3.bf16.msra.mxu0 %v2776_v17 }
0x105b   :  { %v4809_v29 = vpop.eup %4808  ;;  %4493 = vmatprep.subr.bf16.mxu0 %v4924_v0 }
0x105c   :  { %v4811_v37 = vpop.eup %4810  ;;  %v2712_v28 = vmul.f32 %v4809_v29, %v6291_v12 }
0x105d   :  { %4442 = vmatmul.mubr.msk.bf16.vlgmr.msra.gmra.mrb[104].mxu0 %vm473_vm4, %v2728_v63  ;;  %v4813_v52 = vpop.eup %4812  ;;  %v2714_v55 = vmul.f32 %v4811_v37, %v6287_v54 }
0x105e   :  { %v2729_v41 = vpack.c.bf16 %v2712_v28, %v2711_v60  ;;  %v2713_v14 = vmul.f32 %v4813_v52, %v6281_v1 }
0x1060   :  { %4445 = vmatprep.mubr.msk.bf16.mxu0 %vm473_vm4, %v2729_v41  ;;  %v2730_v26 = vpack.c.bf16 %v2714_v55, %v2713_v14 }
0x1065   :  { %4446 = vmatmul.mubr.msk.bf16.gmra.mrb[108].mxu0 %vm473_vm4, %v2730_v26 }
0x107d   :  { %v2653_v27 = vpop.xlane.xlu1 %2652 }
0x107e   :  { %4814 = vrcp.f32 %v2653_v27 }
0x1081   :  { %v2659_v16 = vpop.xlane.xlu1 %2658 }
0x1082   :  { %4816 = vrcp.f32 %v2659_v16 }
0x1085   :  { %v2656_v44 = vpop.xlane.xlu0 %2655  ;;  %v2662_v15 = vpop.xlane.xlu1 %2661 }
0x1086   :  { %4818 = vrcp.f32 %v2656_v44 }
0x1087   :  { %4820 = vrcp.f32 %v2662_v15 }
0x1088   :  { %v4815_v7 = vpop.eup %4814 }
0x1089   :  { %v2665_v12 = vpop.xlane.xlu0 %2664  ;;  %v2668_v4 = vpop.xlane.xlu1 %2667  ;;  %v2715_v39 = vmul.f32 %v4815_v7, %v6308_v33 }
0x108a   :  { %4822 = vrcp.f32 %v2665_v12 }
0x108b   :  { %4824 = vrcp.f32 %v2668_v4 }
0x108c   :  { %v4817_v1 = vpop.eup %4816 }
0x108d   :  { %v2671_v54 = vpop.xlane.xlu0 %2670  ;;  %v2674_v21 = vpop.xlane.xlu1 %2673  ;;  %v2717_v29 = vmul.f32 %v4817_v1, %v6312_v42 }
0x108e   :  { %4826 = vrcp.f32 %v2671_v54 }
0x108f   :  { %4828 = vrcp.f32 %v2674_v21 }
0x1090   :  { %v4819_v34 = vpop.eup %4818 }
0x1091   :  { %v4821_v32 = vpop.eup %4820  ;;  %v2677_v51 = vpop.xlane.xlu0 %2676  ;;  %v2716_v17 = vmul.f32 %v4819_v34, %v6321_v13 }
0x1092   :  { %v2680_v22 = vpop.xlane.xlu1 %2679  ;;  %4830 = vrcp.f32 %v2677_v51  ;;  %v2718_v63 = vmul.f32 %v4821_v32, %v6317_v49 }
0x1093   :  { %4832 = vrcp.f32 %v2680_v22  ;;  %v2731_v37 = vpack.c.bf16 %v2716_v17, %v2715_v39 }
0x1094   :  { %v4823_v60 = vpop.eup %4822  ;;  %v2732_v28 = vpack.c.bf16 %v2718_v63, %v2717_v29  ;;  %v4616_v29 = vld [vmem:[%s6645_s10 + $0x50] sm:$0xff]  }
0x1095   :  { %v4825_v52 = vpop.eup %4824  ;;  %v2683_v41 = vpop.xlane.xlu0 %2682  ;;  %4449 = vmatprep.mubr.msk.bf16.mxu0 %vm473_vm4, %v2731_v37  ;;  %v2719_v14 = vmul.f32 %v4823_v60, %v6329_v61 }
0x1096   :  { %v2686_v55 = vpop.xlane.xlu1 %2685  ;;  %4834 = vrcp.f32 %v2683_v41  ;;  %4450 = vmatmul.mubr.msk.bf16.gmra.mrb[112].mxu0 %vm473_vm4, %v2732_v28  ;;  %v2720_v33 = vmul.f32 %v4825_v52, %v6323_v3 }
0x1097   :  { %4836 = vrcp.f32 %v2686_v55 }
0x1098   :  { %v4827_v42 = vpop.eup %4826  ;;  %v2733_v13 = vpack.c.bf16 %v2720_v33, %v2719_v14 }
0x1099   :  { %v4829_v49 = vpop.eup %4828  ;;  %v2721_v26 = vmul.f32 %v4827_v42, %v6337_v30 }
0x109a   :  { %4453 = vmatprep.mubr.msk.bf16.mxu0 %vm473_vm4, %v2733_v13  ;;  %v2722_v27 = vmul.f32 %v4829_v49, %v6331_v31  ;;  %v4615_v31 = vld [vmem:[%s6645_s10 + $0x48] sm:$0xff]  }
0x109b   :  { %4464 = vmatpush3.bf16.msra.mxu1 %v4615_v31 }
0x109c   :  { %v4831_v16 = vpop.eup %4830  ;;  %v2734_v44 = vpack.c.bf16 %v2722_v27, %v2721_v26  ;;  %4477 = vmatprep.subr.bf16.mxu1 %v4924_v0 }
0x109d   :  { %v4833_v15 = vpop.eup %4832  ;;  %v2723_v61 = vmul.f32 %v4831_v16, %v6345_v9  ;;  %v4619_v9 = vld [vmem:[%s6645_s10 + $0x68] sm:$0xff]  }
0x109e   :  { %4454 = vmatmul.mubr.msk.bf16.gmra.mrb[116].mxu0 %vm473_vm4, %v2734_v44  ;;  %v2724_v12 = vmul.f32 %v4833_v15, %v6339_v50  ;;  %v4618_v50 = vld [vmem:[%s6645_s10 + $0x60] sm:$0xff]  }
0x109f   :  { %4494 = vmatpush3.bf16.msra.mxu0 %v4618_v50 }
0x10a0   :  { %v4835_v3 = vpop.eup %4834  ;;  %v2735_v4 = vpack.c.bf16 %v2724_v12, %v2723_v61  ;;  %4495 = vmatprep.subr.bf16.mxu0 %v4924_v0 }
0x10a1   :  { %v4837_v54 = vpop.eup %4836  ;;  %v2725_v21 = vmul.f32 %v4835_v3, %v6353_v56 }
0x10a2   :  { %4457 = vmatprep.mubr.msk.bf16.mxu0 %vm473_vm4, %v2735_v4  ;;  %v2726_v30 = vmul.f32 %v4837_v54, %v6347_v47 }
0x10a3   :  { %4496 = vmatpush3.bf16.msra.mxu0 %v4619_v9 }
0x10a4   :  { %v2736_v7 = vpack.c.bf16 %v2726_v30, %v2725_v21  ;;  %4525 = vmatprep.subr.bf16.mxu0 %v4924_v0 }
0x10a6   :  { %4458 = vmatmul.mubr.msk.bf16.gmra.mrb[120].mxu0 %vm473_vm4, %v2736_v7  ;;  %vm3781_vm4 = vcmask 1025  }
0x10a7   :  { %4497 = vmatprep.mubr.msk.bf16.mxu0 %vm4925_vm0, %v4924_v0 }
0x1130   :  { %v4443_v47 = vpop.f32.mrb[104].mxu0 }
0x1131   :  { %v2812_v56 = vpop.f32.mrb[105].mxu0  ;;  %v2893_v34 = vmul.f32 %v5984_v58, %v4443_v47  ;;  %v4617_v58 = vld [vmem:[%s6645_s10 + $0x58] sm:$0xff]  }
0x1132   :  { %v4444_v1 = vpop.f32.mrb[106].mxu0  ;;  %v2891_v22 = vmul.f32 %v5996_v45, %v2812_v56 }
0x1133   :  { %v2894_v32 = vmul.f32 %v5990_v53, %v4444_v1  ;;  %v2815_v51 = vpop.f32.mrb[107].mxu0 }
0x1134   :  { %v2892_v39 = vmul.f32 %v6002_v20, %v2815_v51 }
0x1135   :  { %v2931_v17 = vpack.c.bf16 %v2894_v32, %v2893_v34 }
0x1136   :  { %v2930_v63 = vpack.c.bf16 %v2892_v39, %v2891_v22  ;;  %v3945_v39 = vld [vmem:[%s6646_s11 + $0x1] ss:$0 sm:$0xff] }
0x1138   :  { %v4447_v37 = vpop.f32.mrb[108].mxu0  ;;  %4466 = vmatmul.mubr.msk.bf16.vlgmr.msra.gmra.mrb[104].mxu1 %vm239_vm2, %v2930_v63 }
0x1139   :  { %v2828_v60 = vpop.f32.mrb[109].mxu0  ;;  %4469 = vmatprep.mubr.msk.bf16.mxu1 %vm4925_vm0, %v4924_v0  ;;  %4478 = vmatpush3.bf16.msra.mxu1 %v4616_v29  ;;  %v2897_v20 = vmul.f32 %v6009_v23, %v4447_v37  ;;  %v4620_v23 = vld [vmem:[%s6645_s10 + $0x70] sm:$0xff]  }
0x113a   :  { %v4448_v53 = vpop.f32.mrb[110].mxu0  ;;  %4479 = vmatprep.subr.bf16.mxu1 %v4924_v0  ;;  %v2895_v41 = vmul.f32 %v6022_v38, %v2828_v60  ;;  %v4621_v38 = vld [vmem:[%s6645_s10 + $0x78] sm:$0xff]  }
0x113b   :  { %v2831_v45 = vpop.f32.mrb[111].mxu0  ;;  %v2898_v33 = vmul.f32 %v6016_v19, %v4448_v53 }
0x113c   :  { %v2896_v28 = vmul.f32 %v6028_v35, %v2831_v45  ;;  %v2932_v55 = vpack.c.bf16 %v2895_v41, %v2895_v41 }
0x113d   :  { %4480 = vmatpush3.bf16.msra.mxu1 %v4617_v58 }
0x113e   :  { %v3021_v52 = vpack.c.bf16 %v2897_v20, %v2896_v28  ;;  %4509 = vmatprep.subr.bf16.mxu1 %v4924_v0 }
0x1140   :  { %4470 = vmatmul.mubr.msk.bf16.gmra.mrb[108].mxu1 %vm239_vm2, %v2931_v17 }
0x1141   :  { %4473 = vmatprep.mubr.msk.bf16.mxu1 %vm4925_vm0, %v4924_v0 }
0x1148   :  { %4474 = vmatmul.mubr.msk.bf16.gmra.mrb[112].mxu1 %vm239_vm2, %v2932_v55 }
0x1149   :  { %4481 = vmatprep.mubr.msk.bf16.mxu1 %vm4925_vm0, %v4924_v0 }
0x1150   :  { %4482 = vmatmul.mubr.msk.bf16.vlgmr.msra.gmra.mrb[116].mxu1 %vm239_vm2, %v3021_v52 }
0x1151   :  { %4485 = vmatprep.mubr.msk.bf16.mxu1 %vm4925_vm0, %v4924_v0  ;;  %4510 = vmatpush3.bf16.msra.mxu1 %v4620_v23 }
0x1152   :  { %4511 = vmatprep.subr.bf16.mxu1 %v4924_v0 }
0x1155   :  { %4512 = vmatpush3.bf16.msra.mxu1 %v4621_v38 }
0x1156   :  { %4541 = vmatprep.subr.bf16.mxu1 %v4924_v0 }
0x1169   :  { %v4451_v35 = vpop.f32.mrb[112].mxu0 }
0x116a   :  { %v2844_v14 = vpop.f32.mrb[113].mxu0  ;;  %v2901_v49 = vmul.f32 %v6036_v59, %v4451_v35 }
0x116b   :  { %v2899_v42 = vmul.f32 %v6042_v62, %v2844_v14  ;;  %v4452_v13 = vpop.f32.mrb[114].mxu0 }
0x116c   :  { %v2902_v26 = vmul.f32 %v6048_v8, %v4452_v13  ;;  %v2847_v27 = vpop.f32.mrb[115].mxu0 }
0x116d   :  { %v3022_v16 = vpack.c.bf16 %v2899_v42, %v2898_v33  ;;  %v2900_v15 = vmul.f32 %v6054_v6, %v2847_v27 }
0x116e   :  { %v3106_v44 = vpack.c.bf16 %v2902_v26, %v2901_v49 }
0x116f   :  { %4486 = vmatmul.mubr.msk.bf16.gmra.mrb[120].mxu1 %vm239_vm2, %v3022_v16  ;;  %v3023_v8 = vpack.c.bf16 %v2900_v15, %v2900_v15 }
0x1170   :  { %4498 = vmatmul.mubr.msk.bf16.vlgmr.msra.gmra.mrb[124].mxu0 %vm239_vm2, %v3106_v44  ;;  %4489 = vmatprep.mubr.msk.bf16.mxu1 %vm4925_vm0, %v4924_v0 }
0x1171   :  { %v4455_v19 = vpop.f32.mrb[116].mxu0  ;;  %4501 = vmatprep.mubr.msk.bf16.mxu0 %vm4925_vm0, %v4924_v0 }
0x1172   :  { %v2860_v62 = vpop.f32.mrb[117].mxu0  ;;  %v2905_v21 = vmul.f32 %v6061_v36, %v4455_v19 }
0x1173   :  { %v4456_v59 = vpop.f32.mrb[118].mxu0  ;;  %v2903_v12 = vmul.f32 %v6068_v46, %v2860_v62 }
0x1174   :  { %v2863_v61 = vpop.f32.mrb[119].mxu0  ;;  %v2906_v30 = vmul.f32 %v6074_v24, %v4456_v59  ;;  %v3108_v47 = vpack.c.bf16 %v2905_v21, %v2905_v21 }
0x1175   :  { %v2904_v3 = vmul.f32 %v6080_v10, %v2863_v61 }
0x1177   :  { %v3107_v4 = vpack.c.bf16 %v2904_v3, %v2903_v12  ;;  %4490 = vmatmul.mubr.msk.bf16.gmra.mrb[124].mxu1 %vm239_vm2, %v3023_v8 }
0x1178   :  { %4513 = vmatprep.mubr.msk.bf16.mxu1 %vm4925_vm0, %v4924_v0 }
0x1179   :  { %v4459_v54 = vpop.f32.mrb[120].mxu0  ;;  %4502 = vmatmul.mubr.msk.bf16.gmra.mrb[128].mxu0 %vm239_vm2, %v3107_v4 }
0x117a   :  { %v2876_v6 = vpop.f32.mrb[121].mxu0  ;;  %4505 = vmatprep.mubr.msk.bf16.mxu0 %vm4925_vm0, %v4924_v0  ;;  %v2909_v31 = vmul.f32 %v6087_v57, %v4459_v54 }
0x117b   :  { %v2907_v46 = vmul.f32 %v6094_v18, %v2876_v6  ;;  %v4460_v10 = vpop.f32.mrb[122].mxu0 }
0x117c   :  { %v2879_v7 = vpop.f32.mrb[123].mxu0  ;;  %v2910_v36 = vmul.f32 %v6100_v11, %v4460_v10 }
0x117d   :  { %v3191_v50 = vpack.c.bf16 %v2907_v46, %v2906_v30  ;;  %v2908_v9 = vmul.f32 %v6106_v25, %v2879_v7 }
0x117e   :  { %v3193_v24 = vpack.c.bf16 %v2910_v36, %v2910_v36 }
0x117f   :  { %v3192_v56 = vpack.c.bf16 %v2909_v31, %v2908_v9  ;;  %4514 = vmatmul.mubr.msk.bf16.vlgmr.msra.gmra.mrb[128].mxu1 %vm239_vm2, %v3191_v50 }
0x1180   :  { %4517 = vmatprep.mubr.msk.bf16.mxu1 %vm4925_vm0, %v4924_v0 }
0x1181   :  { %4506 = vmatmul.mubr.msk.bf16.gmra.mrb[132].mxu0 %vm239_vm2, %v3108_v47 }
0x1182   :  { %4529 = vmatprep.mubr.msk.bf16.mxu0 %vm4925_vm0, %v4924_v0 }
0x1187   :  { %4518 = vmatmul.mubr.msk.bf16.gmra.mrb[132].mxu1 %vm239_vm2, %v3192_v56 }
0x1188   :  { %4521 = vmatprep.mubr.msk.bf16.mxu1 %vm4925_vm0, %v4924_v0 }
0x118f   :  { %4522 = vmatmul.mubr.msk.bf16.gmra.mrb[136].mxu1 %vm239_vm2, %v3193_v24 }
0x1190   :  { %4549 = vmatprep.mubr.msk.bf16.mxu1 %vm4925_vm0, %v4924_v0 }
0x120b   :  { %v2988_v57 = vpop.f32.mrb[104].mxu1 }
0x120c   :  { %v4467_v18 = vpop.f32.mrb[105].mxu1  ;;  %v3016_v60 = vadd.f32 %v3945_v39, %v2988_v57 }
0x120d   :  { %v2991_v25 = vpop.f32.mrb[106].mxu1 }
0x120e   :  { %v4468_v1 = vpop.f32.mrb[107].mxu1  ;;  %v3017_v53 = vadd.f32 %v3945_v39, %v2991_v25 }
0x1213   :  { %v2996_v34 = vpop.f32.mrb[108].mxu1 }
0x1214   :  { %v4471_v32 = vpop.f32.mrb[109].mxu1  ;;  %v3018_v55 = vadd.f32 %v3945_v39, %v2996_v34 }
0x1215   :  { %v2999_v51 = vpop.f32.mrb[110].mxu1 }
0x1216   :  { %v4472_v22 = vpop.f32.mrb[111].mxu1  ;;  %v3019_v38 = vadd.f32 %v3945_v39, %v2999_v51 }
0x121b   :  { %v3004_v17 = vpop.f32.mrb[112].mxu1 }
0x121c   :  { %v3020_v11 = vadd.f32 %v3945_v39, %v3004_v17  ;;  %v4475_v29 = vpop.f32.mrb[113].mxu1 }
0x121d   :  { %v3007_v63 = vpop.f32.mrb[114].mxu1 }
0x121e   :  { %v4476_v37 = vpop.f32.mrb[115].mxu1 }
0x1223   :  { %v3079_v58 = vpop.f32.mrb[116].mxu1 }
0x1224   :  { %v3101_v45 = vadd.f32 %v3079_v58, %v3016_v60  ;;  %v4483_v20 = vpop.f32.mrb[117].mxu1 }
0x1225   :  { %v3082_v28 = vpop.f32.mrb[118].mxu1 }
0x1226   :  { %v3102_v52 = vadd.f32 %v3082_v28, %v3017_v53  ;;  %v4484_v41 = vpop.f32.mrb[119].mxu1 }
0x1242   :  { %v3087_v23 = vpop.f32.mrb[120].mxu1 }
0x1243   :  { %v3103_v35 = vadd.f32 %v3087_v23, %v3018_v55  ;;  %v4487_v14 = vpop.f32.mrb[121].mxu1  ;;  %v3164_v33 = vpop.f32.mrb[124].mxu0 }
0x1244   :  { %v3186_v42 = vadd.f32 %v3164_v33, %v3101_v45  ;;  %v3090_v13 = vpop.f32.mrb[122].mxu1  ;;  %v4499_v49 = vpop.f32.mrb[125].mxu0 }
0x1245   :  { %v3104_v26 = vadd.f32 %v3090_v13, %v3019_v38  ;;  %v4488_v27 = vpop.f32.mrb[123].mxu1  ;;  %v3167_v16 = vpop.f32.mrb[126].mxu0 }
0x1246   :  { %v3187_v44 = vadd.f32 %v3167_v16, %v3102_v52  ;;  %v4500_v15 = vpop.f32.mrb[127].mxu0 }
0x124a   :  { %v3095_v19 = vpop.f32.mrb[124].mxu1 }
0x124b   :  { %v3105_v62 = vadd.f32 %v3095_v19, %v3020_v11  ;;  %v4491_v59 = vpop.f32.mrb[125].mxu1 }
0x124c   :  { %v3098_v61 = vpop.f32.mrb[126].mxu1  ;;  %v3172_v8 = vpop.f32.mrb[128].mxu0 }
0x124d   :  { %v3188_v12 = vadd.f32 %v3172_v8, %v3103_v35  ;;  %v4492_v3 = vpop.f32.mrb[127].mxu1  ;;  %v4503_v4 = vpop.f32.mrb[129].mxu0 }
0x124e   :  { %v3175_v54 = vpop.f32.mrb[130].mxu0 }
0x124f   :  { %v3189_v6 = vadd.f32 %v3175_v54, %v3104_v26  ;;  %v4504_v21 = vpop.f32.mrb[131].mxu0 }
0x1252   :  { %v3249_v30 = vpop.f32.mrb[128].mxu1 }
0x1253   :  { %v3271_v46 = vadd.f32 %v3249_v30, %v3186_v42  ;;  %v4515_v10 = vpop.f32.mrb[129].mxu1 }
0x1254   :  { %v3180_v7 = vpop.f32.mrb[132].mxu0  ;;  %v3252_v31 = vpop.f32.mrb[130].mxu1 }
0x1255   :  { %v6486_v50 = vadd.f32 %v3271_v46, %v5861_v48  ;;  %v3190_v9 = vadd.f32 %v3180_v7, %v3105_v62  ;;  %v3272_v47 = vadd.f32 %v3252_v31, %v3187_v44  ;;  %v4507_v56 = vpop.f32.mrb[133].mxu0  ;;  %v4516_v36 = vpop.f32.mrb[131].mxu1  ;;  %v4622_v62 = vld [vmem:[%s6647_s14 + $0x10] sm:$0xff]  }
0x1256   :  { %v3183_v24 = vpop.f32.mrb[134].mxu0  ;;  %4526 = vmatpush3.bf16.msra.mxu0 %v4622_v62 }
0x1257   :  { %v3277_v57 = vadd.f32 %v3272_v47, %v5864_v2  ;;  %v4508_v18 = vpop.f32.mrb[135].mxu0  ;;  %v3285_v25 = vsel %vm239_vm2, %v6486_v50, 0.0  ;;  %4527 = vmatprep.subr.bf16.mxu0 %v4924_v0  ;;  %v3963_v47 = vld [vmem:[%s6648_s12 + $0x1] ss:$0 sm:$0xff] }
0x1258   :  { %3286 = vadd.xlane.f32.xlu0 %v3285_v25 }
0x1259   :  { %v3288_v1 = vsel %vm239_vm2, %v3277_v57, 0.0 }
0x125a   :  { %3289 = vadd.xlane.f32.xlu1 %v3288_v1  ;;  %v3257_v34 = vpop.f32.mrb[132].mxu1  ;;  %v3964_v1 = vld [vmem:[%s6649_s13 + $0x1] ss:$0 sm:$0xff] }
0x125b   :  { %v3273_v32 = vadd.f32 %v3257_v34, %v3188_v12  ;;  %v4519_v51 = vpop.f32.mrb[133].mxu1 }
0x125c   :  { %v3260_v48 = vpop.f32.mrb[134].mxu1 }
0x125d   :  { %v6493_v22 = vadd.f32 %v3273_v32, %v5871_v43  ;;  %v3274_v39 = vadd.f32 %v3260_v48, %v3189_v6  ;;  %v4520_v17 = vpop.f32.mrb[135].mxu1 }
0x125f   :  { %v3279_v11 = vadd.f32 %v3274_v39, %v5874_v40  ;;  %v3291_v2 = vsel %vm239_vm2, %v6493_v22, 0.0 }
0x1260   :  { %3292 = vadd.xlane.f32.xlu0 %v3291_v2 }
0x1261   :  { %v3294_v29 = vsel %vm239_vm2, %v3279_v11, 0.0 }
0x1262   :  { %3295 = vadd.xlane.f32.xlu1 %v3294_v29  ;;  %v3265_v63 = vpop.f32.mrb[136].mxu1 }
0x1263   :  { %v3275_v37 = vadd.f32 %v3265_v63, %v3190_v9  ;;  %v4523_v60 = vpop.f32.mrb[137].mxu1 }
0x1264   :  { %v3268_v58 = vpop.f32.mrb[138].mxu1 }
0x1265   :  { %v4524_v53 = vpop.f32.mrb[139].mxu1  ;;  %v3280_v27 = vadd.f32 %v3275_v37, %v5881_v5  ;;  %v4623_v5 = vld [vmem:[%s6647_s14 + $0x18] sm:$0xff]  }
0x1266   :  { %4528 = vmatpush3.bf16.msra.mxu0 %v4623_v5 }
0x1267   :  { %v3297_v19 = vsel %vm252_vm3, %v3280_v27, 0.0 }
0x12e5   :  { %v3287_v45 = vpop.xlane.xlu0 %3286 }
0x12e6   :  { %v3300_v20 = vmul.f32 0.03125, %v3287_v45  ;;  %v4624_v45 = vld [vmem:[%s6650_s16 + $0x20] sm:$0xff]  }
0x12e7   :  { %v3290_v43 = vpop.xlane.xlu1 %3289  ;;  %4542 = vmatpush3.bf16.msra.mxu1 %v4624_v45 }
0x12e8   :  { %v3305_v28 = vsub.f32 %v6486_v50, %v3300_v20  ;;  %v3301_v52 = vmul.f32 0.03125, %v3290_v43  ;;  %4543 = vmatprep.subr.bf16.mxu1 %v4924_v0  ;;  %v4625_v20 = vld [vmem:[%s6650_s16 + $0x28] sm:$0xff]   ;;  %v4626_v43 = vld [vmem:[%s6650_s16 + $0x30] sm:$0xff]  }
0x12ea   :  { %v3306_v41 = vsub.f32 %v3277_v57, %v3301_v52  ;;  %v3310_v40 = vmul.f32 %v3305_v28, %v3305_v28 }
0x12eb   :  { %4544 = vmatpush3.bf16.msra.mxu1 %v4625_v20 }
0x12ec   :  { %v3315_v55 = vsel %vm239_vm2, %v3310_v40, 0.0  ;;  %v3311_v23 = vmul.f32 %v3306_v41, %v3306_v41  ;;  %4545 = vmatprep.subr.bf16.mxu1 %v4924_v0 }
0x12ed   :  { %3316 = vadd.xlane.f32.xlu0 %v3315_v55  ;;  %v3293_v38 = vpop.xlane.xlu0 %3292 }
0x12ee   :  { %v3302_v35 = vmul.f32 0.03125, %v3293_v38  ;;  %v3318_v14 = vsel %vm239_vm2, %v3311_v23, 0.0 }
0x12ef   :  { %3319 = vadd.xlane.f32.xlu1 %v3318_v14  ;;  %v3296_v33 = vpop.xlane.xlu1 %3295  ;;  %4546 = vmatpush3.bf16.msra.mxu1 %v4626_v43 }
0x12f0   :  { %v3307_v42 = vsub.f32 %v6493_v22, %v3302_v35  ;;  %v3303_v13 = vmul.f32 0.03125, %v3296_v33  ;;  %4547 = vmatprep.subr.bf16.mxu1 %v4924_v0  ;;  %v6546_v33 = vld [vmem:[%s6651_s15 + $0x1] ss:$0 sm:$0xff] }
0x12f2   :  { %v3308_v49 = vsub.f32 %v3279_v11, %v3303_v13  ;;  %v3312_v26 = vmul.f32 %v3307_v42, %v3307_v42 }
0x12f4   :  { %v3321_v16 = vsel %vm239_vm2, %v3312_v26, 0.0  ;;  %v3313_v44 = vmul.f32 %v3308_v49, %v3308_v49 }
0x12f5   :  { %3322 = vadd.xlane.f32.xlu0 %v3321_v16 }
0x12f6   :  { %v3324_v15 = vsel %vm239_vm2, %v3313_v44, 0.0 }
0x12f7   :  { %3325 = vadd.xlane.f32.xlu1 %v3324_v15 }
0x12f9   :  { %3298 = vadd.xlane.f32.xlu0 %v3297_v19 }
0x137a   :  { %v3317_v59 = vpop.xlane.xlu0 %3316 }
0x137b   :  { %v3330_v61 = vmul.f32 0.03125, %v3317_v59 }
0x137c   :  { %v3320_v8 = vpop.xlane.xlu1 %3319 }
0x137d   :  { %v3335_v12 = vadd.f32 1e-05, %v3330_v61  ;;  %v3331_v3 = vmul.f32 0.03125, %v3320_v8 }
0x137f   :  { %4838 = vrsqrt.f32 %v3335_v12  ;;  %v3336_v4 = vadd.f32 1e-05, %v3331_v3 }
0x1381   :  { %4840 = vrsqrt.f32 %v3336_v4 }
0x1382   :  { %v3323_v54 = vpop.xlane.xlu0 %3322 }
0x1383   :  { %v3332_v6 = vmul.f32 0.03125, %v3323_v54 }
0x1384   :  { %v3326_v21 = vpop.xlane.xlu1 %3325 }
0x1385   :  { %v3337_v30 = vadd.f32 1e-05, %v3332_v6  ;;  %v3333_v46 = vmul.f32 0.03125, %v3326_v21 }
0x1386   :  { %v3299_v10 = vpop.xlane.xlu0 %3298 }
0x1387   :  { %4842 = vrsqrt.f32 %v3337_v30  ;;  %v3338_v7 = vadd.f32 1e-05, %v3333_v46  ;;  %v3304_v31 = vmul.f32 0.03125, %v3299_v10 }
0x1389   :  { %v4839_v9 = vpop.eup %4838  ;;  %4844 = vrsqrt.f32 %v3338_v7  ;;  %v3309_v56 = vsub.f32 %v3280_v27, %v3304_v31 }
0x138a   :  { %v3345_v36 = vmul.f32 %v4839_v9, %v3305_v28  ;;  %v4627_v28 = vld [vmem:[%s6650_s16 + $0x38] sm:$0xff]  }
0x138b   :  { %v4841_v24 = vpop.eup %4840  ;;  %v3314_v57 = vmul.f32 %v3309_v56, %v3309_v56  ;;  %4548 = vmatpush3.bf16.msra.mxu1 %v4627_v28 }
0x138c   :  { %v3356_v18 = vmul.f32 %v3963_v47, %v3345_v36  ;;  %v3346_v25 = vmul.f32 %v4841_v24, %v3306_v41 }
0x138d   :  { %v3327_v34 = vsel %vm252_vm3, %v3314_v57, 0.0  ;;  %vm3730_vm3 = vcmask 0  }
0x138e   :  { %v3357_v32 = vmul.f32 %v3963_v47, %v3346_v25  ;;  %3328 = vadd.xlane.f32.xlu1 %v3327_v34  ;;  %v3367_v51 = vadd.f32 %v3964_v1, %v3356_v18 }
0x1390   :  { %v3368_v48 = vadd.f32 %v3964_v1, %v3357_v32 }
0x1391   :  { %v4843_v39 = vpop.eup %4842 }
0x1392   :  { %v3347_v17 = vmul.f32 %v4843_v39, %v3307_v42  ;;  %v3372_v11 = vpack.c.bf16 %v3368_v48, %v3367_v51 }
0x1393   :  { %v4845_v2 = vpop.eup %4844 }
0x1394   :  { %v3348_v29 = vmul.f32 %v4845_v2, %v3308_v49  ;;  %4530 = vmatmul.mubr.msk.bf16.vlgmr.msra.gmra.mrb[136].mxu0 %vm239_vm2, %v3372_v11  ;;  %v3358_v63 = vmul.f32 %v3963_v47, %v3347_v17 }
0x1395   :  { %4533 = vmatprep.mubr.msk.bf16.mxu0 %vm4925_vm0, %v4924_v0 }
0x1396   :  { %v3359_v37 = vmul.f32 %v3963_v47, %v3348_v29  ;;  %v3369_v60 = vadd.f32 %v3964_v1, %v3358_v63 }
0x1398   :  { %v3370_v58 = vadd.f32 %v3964_v1, %v3359_v37 }
0x139a   :  { %v3373_v53 = vpack.c.bf16 %v3370_v58, %v3369_v60 }
0x139c   :  { %4534 = vmatmul.mubr.msk.bf16.gmra.mrb[140].mxu0 %vm239_vm2, %v3373_v53 }
0x139d   :  { %4537 = vmatprep.mubr.msk.bf16.mxu0 %vm4925_vm0, %v4924_v0 }
0x141b   :  { %v3329_v52 = vpop.xlane.xlu1 %3328 }
0x141c   :  { %v3334_v41 = vmul.f32 0.03125, %v3329_v52 }
0x141e   :  { %v3339_v40 = vadd.f32 1e-05, %v3334_v41 }
0x1420   :  { %4846 = vrsqrt.f32 %v3339_v40 }
0x142a   :  { %v4847_v55 = vpop.eup %4846 }
0x142b   :  { %v3349_v23 = vmul.f32 %v4847_v55, %v3309_v56 }
0x142d   :  { %v3360_v38 = vmul.f32 %v3963_v47, %v3349_v23 }
0x142f   :  { %v3371_v35 = vadd.f32 %v3964_v1, %v3360_v38 }
0x1431   :  { %v3374_v14 = vpack.c.bf16 %v3371_v35, %v3371_v35 }
0x1433   :  { %4538 = vmatmul.mubr.msk.bf16.gmra.mrb[144].mxu0 %vm239_vm2, %v3374_v14  ;;  %vm3734_vm2 = vcmask 254977  }
0x1467   :  { %v3443_v42 = vpop.f32.mrb[136].mxu0 }
0x1468   :  { %v6549_v13 = vadd.f32 %v6546_v33, %v3443_v42  ;;  %v4531_v49 = vpop.f32.mrb[137].mxu0 }
0x1469   :  { %v3446_v26 = vpop.f32.mrb[138].mxu0 }
0x146a   :  { %v6552_v27 = vmul.f32 0.70710677, %v6549_v13  ;;  %v6555_v16 = vadd.f32 %v6546_v33, %v3446_v26  ;;  %v4532_v44 = vpop.f32.mrb[139].mxu0 }
0x146c   :  { %v3485_v15 = vand.u32 2147483647, %v6552_v27  ;;  %v6559_v19 = vmul.f32 0.70710677, %v6555_v16  ;;  %vm3475_vm12 = vcmp.ge.f32.partialorder %v6552_v27, 0.0 }
0x146e   :  { %v3490_v62 = vmul.f32 0.3275911, %v3485_v15  ;;  %v3486_v5 = vand.u32 2147483647, %v6559_v19  ;;  %v3550_v31 = vsub.f32 0.0, %v3485_v15  ;;  %vm3476_vm13 = vcmp.ge.f32.partialorder %v6559_v19, 0.0 }
0x146f   :  { %v3451_v59 = vpop.f32.mrb[140].mxu0 }
0x1470   :  { %v3495_v61 = vadd.f32 1.0, %v3490_v62  ;;  %v3491_v8 = vmul.f32 0.3275911, %v3486_v5  ;;  %v4535_v12 = vpop.f32.mrb[141].mxu0  ;;  %v6563_v3 = vadd.f32 %v6546_v33, %v3451_v59  ;;  %v3551_v36 = vsub.f32 0.0, %v3486_v5 }
0x1471   :  { %v3454_v4 = vpop.f32.mrb[142].mxu0  ;;  %v3555_v57 = vmul.f32 %v3550_v31, %v3485_v15 }
0x1472   :  { %4848 = vrcp.f32 %v3495_v61  ;;  %v3496_v54 = vadd.f32 1.0, %v3491_v8  ;;  %v4536_v6 = vpop.f32.mrb[143].mxu0  ;;  %v6566_v21 = vmul.f32 0.70710677, %v6563_v3  ;;  %v6569_v30 = vadd.f32 %v6546_v33, %v3454_v4 }
0x1473   :  { %v3556_v32 = vmul.f32 %v3551_v36, %v3486_v5  ;;  %v3560_v51 = vmul.f32 1.442695, %v3555_v57 }
0x1474   :  { %4850 = vrcp.f32 %v3496_v54  ;;  %v3487_v46 = vand.u32 2147483647, %v6566_v21  ;;  %v6573_v10 = vmul.f32 0.70710677, %v6569_v30  ;;  %vm3477_vm14 = vcmp.ge.f32.partialorder %v6566_v21, 0.0 }
0x1475   :  { %v3562_v29 = vmul.f32 1.442695, %v3556_v32 }
0x1476   :  { %v3492_v7 = vmul.f32 0.3275911, %v3487_v46  ;;  %v3488_v9 = vand.u32 2147483647, %v6573_v10  ;;  %v3552_v17 = vsub.f32 0.0, %v3487_v46  ;;  %vm3478_vm15 = vcmp.ge.f32.partialorder %v6573_v10, 0.0 }
0x1478   :  { %v3497_v47 = vadd.f32 1.0, %v3492_v7  ;;  %v3493_v56 = vmul.f32 0.3275911, %v3488_v9  ;;  %v3553_v37 = vsub.f32 0.0, %v3488_v9  ;;  %v3557_v53 = vmul.f32 %v3552_v17, %v3487_v46 }
0x147a   :  { %4852 = vrcp.f32 %v3497_v47  ;;  %v3498_v18 = vadd.f32 1.0, %v3493_v56  ;;  %v3558_v40 = vmul.f32 %v3553_v37, %v3488_v9  ;;  %v3564_v23 = vmul.f32 1.442695, %v3557_v53 }
0x147b   :  { %v6681_v9 = vmov -1.0  }
0x147c   :  { %v4849_v24 = vpop.eup %4848  ;;  %4854 = vrcp.f32 %v3498_v18  ;;  %v3566_v15 = vmul.f32 1.442695, %v3558_v40  ;;  %v3480_v47 = vsel %vm3475_vm12, 1.0, %v6681_v9  ;;  %v3481_v27 = vsel %vm3476_vm13, 1.0, %v6681_v9 }
0x147d   :  { %v3505_v25 = vmul.f32 1.0614054, %v4849_v24  ;;  %4856 = vpow2.f32 %v3560_v51 }
0x147e   :  { %v4851_v1 = vpop.eup %4850  ;;  %4858 = vpow2.f32 %v3562_v29 }
0x147f   :  { %v3510_v34 = vadd.f32 -1.4531521, %v3505_v25  ;;  %v3506_v48 = vmul.f32 1.0614054, %v4851_v1  ;;  %4860 = vpow2.f32 %v3564_v23 }
0x1480   :  { %4862 = vpow2.f32 %v3566_v15 }
0x1481   :  { %v3515_v39 = vmul.f32 %v4849_v24, %v3510_v34  ;;  %v3511_v11 = vadd.f32 -1.4531521, %v3506_v48 }
0x1483   :  { %v3520_v2 = vadd.f32 1.4214138, %v3515_v39  ;;  %v3516_v63 = vmul.f32 %v4851_v1, %v3511_v11  ;;  %v3465_v39 = vmul.f32 0.5, %v6549_v13  ;;  %v3466_v11 = vmul.f32 0.5, %v6555_v16 }
0x1484   :  { %v4853_v60 = vpop.eup %4852 }
0x1485   :  { %v3525_v58 = vmul.f32 %v4849_v24, %v3520_v2  ;;  %v3521_v45 = vadd.f32 1.4214138, %v3516_v63  ;;  %v3507_v20 = vmul.f32 1.0614054, %v4853_v60 }
0x1486   :  { %v4855_v28 = vpop.eup %4854 }
0x1487   :  { %v3530_v43 = vadd.f32 -0.28449672, %v3525_v58  ;;  %v3526_v52 = vmul.f32 %v4851_v1, %v3521_v45  ;;  %v3512_v41 = vadd.f32 -1.4531521, %v3507_v20  ;;  %v3508_v38 = vmul.f32 1.0614054, %v4855_v28  ;;  %v4857_v59 = vpop.eup %4856 }
0x1488   :  { %v4859_v46 = vpop.eup %4858  ;;  %v3482_v45 = vsel %vm3477_vm14, 1.0, %v6681_v9 }
0x1489   :  { %v3535_v55 = vmul.f32 %v4849_v24, %v3530_v43  ;;  %v3531_v35 = vadd.f32 -0.28449672, %v3526_v52  ;;  %v3517_v14 = vmul.f32 %v4853_v60, %v3512_v41  ;;  %v3513_v49 = vadd.f32 -1.4531521, %v3508_v38  ;;  %v4861_v48 = vpop.eup %4860 }
0x148a   :  { %v4863_v63 = vpop.eup %4862  ;;  %v3483_v52 = vsel %vm3478_vm15, 1.0, %v6681_v9  ;;  %v3468_v41 = vmul.f32 0.5, %v6569_v30 }
0x148b   :  { %v3540_v42 = vadd.f32 0.2548296, %v3535_v55  ;;  %v3536_v26 = vmul.f32 %v4851_v1, %v3531_v35  ;;  %v3522_v44 = vadd.f32 1.4214138, %v3517_v14  ;;  %v3518_v5 = vmul.f32 %v4855_v28, %v3513_v49 }
0x148d   :  { %v3545_v62 = vmul.f32 %v4849_v24, %v3540_v42  ;;  %v3541_v61 = vadd.f32 0.2548296, %v3536_v26  ;;  %v3527_v8 = vmul.f32 %v4853_v60, %v3522_v44  ;;  %v3523_v4 = vadd.f32 1.4214138, %v3518_v5 }
0x148f   :  { %v3570_v12 = vmul.f32 %v4857_v59, %v3545_v62  ;;  %v3546_v54 = vmul.f32 %v4851_v1, %v3541_v61  ;;  %v3532_v6 = vadd.f32 -0.28449672, %v3527_v8  ;;  %v3528_v31 = vmul.f32 %v4855_v28, %v3523_v4 }
0x1491   :  { %v3575_v7 = vsub.f32 1.0, %v3570_v12  ;;  %v3571_v56 = vmul.f32 %v4859_v46, %v3546_v54  ;;  %v3537_v36 = vmul.f32 %v4853_v60, %v3532_v6  ;;  %v3533_v57 = vadd.f32 -0.28449672, %v3528_v31 }
0x1493   :  { %v3580_v24 = vmul.f32 %v3575_v7, %v3480_v47  ;;  %v3576_v18 = vsub.f32 1.0, %v3571_v56  ;;  %v3542_v25 = vadd.f32 0.2548296, %v3537_v36  ;;  %v3538_v34 = vmul.f32 %v4855_v28, %v3533_v57 }
0x1495   :  { %v3585_v32 = vadd.f32 1.0, %v3580_v24  ;;  %v3581_v1 = vmul.f32 %v3576_v18, %v3481_v27  ;;  %v3547_v51 = vmul.f32 %v4853_v60, %v3542_v25  ;;  %v3543_v17 = vadd.f32 0.2548296, %v3538_v34  ;;  %v3992_v34 = vld [vmem:[%s6652_s17 + $0x1] ss:$0 sm:$0xff] }
0x1497   :  { %v3586_v2 = vadd.f32 1.0, %v3581_v1  ;;  %v3572_v19 = vmul.f32 %v4861_v48, %v3547_v51  ;;  %v3548_v29 = vmul.f32 %v4855_v28, %v3543_v17  ;;  %v3590_v37 = vmul.f32 %v3585_v32, %v3465_v39 }
0x1498   :  { %v3467_v28 = vmul.f32 0.5, %v6563_v3 }
0x1499   :  { %v3591_v58 = vmul.f32 %v3586_v2, %v3466_v11  ;;  %v3577_v53 = vsub.f32 1.0, %v3572_v19  ;;  %v3573_v60 = vmul.f32 %v4863_v63, %v3548_v29 }
0x149b   :  { %v3595_v20 = vpack.c.bf16 %v3591_v58, %v3590_v37  ;;  %v3582_v43 = vmul.f32 %v3577_v53, %v3482_v45  ;;  %v3578_v13 = vsub.f32 1.0, %v3573_v60 }
0x149d   :  { %4550 = vmatmul.mubr.msk.bf16.vlgmr.msra.gmra.mrb[140].mxu1 %vm1930_vm9, %v3595_v20  ;;  %v3587_v16 = vadd.f32 1.0, %v3582_v43  ;;  %v3583_v21 = vmul.f32 %v3578_v13, %v3483_v52 }
0x149e   :  { %4553 = vmatprep.mubr.msk.bf16.mxu1 %vm4925_vm0, %v4924_v0 }
0x149f   :  { %v3588_v40 = vadd.f32 1.0, %v3583_v21  ;;  %v3592_v55 = vmul.f32 %v3587_v16, %v3467_v28 }
0x14a1   :  { %v3593_v10 = vmul.f32 %v3588_v40, %v3468_v41  ;;  %v27_v40 = vstv %s6653_s21 }
0x14a2   :  { %28 = vst [vmem:[#allocation2] sm:$0x1] %v27_v40 }
0x14a3   :  { %v3596_v23 = vpack.c.bf16 %v3593_v10, %v3592_v55 }
0x14a5   :  { %4554 = vmatmul.mubr.msk.bf16.gmra.mrb[144].mxu1 %vm1930_vm9, %v3596_v23 }
0x14a6   :  { %4557 = vmatprep.mubr.msk.bf16.mxu1 %vm4925_vm0, %v4924_v0 }
0x1506   :  { %v3459_v38 = vpop.f32.mrb[144].mxu0 }
0x1507   :  { %v3460_v35 = vadd.f32 %v6546_v33, %v3459_v38  ;;  %v4539_v14 = vpop.f32.mrb[145].mxu0 }
0x1508   :  { %v3462_v42 = vpop.f32.mrb[146].mxu0 }
0x1509   :  { %v3474_v49 = vmul.f32 0.70710677, %v3460_v35  ;;  %v4540_v26 = vpop.f32.mrb[147].mxu0  ;;  %v3469_v24 = vmul.f32 0.5, %v3460_v35 }
0x150b   :  { %v3489_v44 = vand.u32 2147483647, %v3474_v49  ;;  %vm3479_vm0 = vcmp.ge.f32.partialorder %v3474_v49, 0.0  ;;  %v3705_v49 = vld [vmem:[%s6654_s18] sm:$0x1] }
0x150c   :  { %v3484_v56 = vsel %vm3479_vm0, 1.0, %v6681_v9 }
0x150d   :  { %v3494_v3 = vmul.f32 0.3275911, %v3489_v44  ;;  %v3554_v30 = vsub.f32 0.0, %v3489_v44 }
0x150f   :  { %v3499_v15 = vadd.f32 1.0, %v3494_v3  ;;  %v3559_v5 = vmul.f32 %v3554_v30, %v3489_v44  ;;  %v3706_v44 = vld [vmem:[%s6655_s19] sm:$0x1] }
0x1511   :  { %4864 = vrcp.f32 %v3499_v15  ;;  %v3568_v8 = vmul.f32 1.442695, %v3559_v5  ;;  %v3723_v15 = vld [vmem:[%s6656_s20] sm:$0x1] }
0x1513   :  { %4866 = vpow2.f32 %v3568_v8 }
0x151b   :  { %v4865_v62 = vpop.eup %4864 }
0x151c   :  { %v3509_v59 = vmul.f32 1.0614054, %v4865_v62 }
0x151d   :  { %v4867_v7 = vpop.eup %4866 }
0x151e   :  { %v3514_v61 = vadd.f32 -1.4531521, %v3509_v59 }
0x1520   :  { %v3519_v12 = vmul.f32 %v4865_v62, %v3514_v61  ;;  %v3993_v61 = vld [vmem:[%s6654_s18] ss:$0 sm:$0xff] }
0x1522   :  { %v3524_v4 = vadd.f32 1.4214138, %v3519_v12  ;;  %v3994_v12 = vld [vmem:[%s6655_s19] ss:$0 sm:$0xff] }
0x1524   :  { %v3529_v0 = vmul.f32 %v4865_v62, %v3524_v4 }
0x1526   :  { %v3534_v54 = vadd.f32 -0.28449672, %v3529_v0  ;;  %v3995_v0 = vld [vmem:[%s6656_s20] ss:$0 sm:$0xff] }
0x1528   :  { %v3539_v33 = vmul.f32 %v4865_v62, %v3534_v54 }
0x152a   :  { %v3544_v6 = vadd.f32 0.2548296, %v3539_v33 }
0x152c   :  { %v3549_v46 = vmul.f32 %v4865_v62, %v3544_v6 }
0x152e   :  { %v3574_v31 = vmul.f32 %v4867_v7, %v3549_v46  ;;  %v3728_v46 = vld [vmem:[#allocation2] sm:$0x1] }
0x1530   :  { %v3579_v47 = vsub.f32 1.0, %v3574_v31 }
0x1532   :  { %v3584_v36 = vmul.f32 %v3579_v47, %v3484_v56  ;;  %v3996_v47 = vld [vmem:[#allocation2] ss:$0 sm:$0xff] }
0x1534   :  { %v3589_v57 = vadd.f32 1.0, %v3584_v36 }
0x1536   :  { %v3594_v18 = vmul.f32 %v3589_v57, %v3469_v24 }
0x1538   :  { %v3597_v25 = vpack.c.bf16 %v3594_v18, %v3594_v18 }
0x153a   :  { %4558 = vmatmul.mubr.msk.bf16.gmra.mrb[148].mxu1 %vm1930_vm9, %v3597_v25 }
0x1570   :  { %v3674_v27 = vpop.f32.mrb[140].mxu1 }
0x1571   :  { %v3693_v32 = vadd.f32 %v3674_v27, %v6486_v50  ;;  %v4551_v1 = vpop.f32.mrb[141].mxu1 }
0x1572   :  { %v3677_v51 = vpop.f32.mrb[142].mxu1 }
0x1573   :  { %v3703_v48 = vadd.f32 %v3992_v34, %v3693_v32  ;;  %v4552_v39 = vpop.f32.mrb[143].mxu1 }
0x1575   :  { %v3708_v9 = vsel %vm3707_vm1, %v3703_v48, 0.0 }
0x1576   :  { %3709 = vadd.xlane.f32.xlu0 %v3708_v9 }
0x1578   :  { %v3681_v17 = vpop.f32.mrb[144].mxu1 }
0x1579   :  { %v3694_v11 = vadd.f32 %v3681_v17, %v6493_v22  ;;  %v4555_v2 = vpop.f32.mrb[145].mxu1 }
0x157a   :  { %v3684_v19 = vpop.f32.mrb[146].mxu1 }
0x157b   :  { %v3704_v29 = vadd.f32 %v3992_v34, %v3694_v11  ;;  %v4556_v63 = vpop.f32.mrb[147].mxu1 }
0x157d   :  { %v3735_v37 = vsel %vm3734_vm2, %v3704_v29, 0.0 }
0x157e   :  { %3736 = vadd.xlane.f32.xlu1 %v3735_v37 }
0x1603   :  { %v3710_v50 = vpop.xlane.xlu0 %3709 }
0x1604   :  { %v3711_v58 = vmul.f32 0.03125, %v3710_v50 }
0x1606   :  { %v3712_v53 = vsub.f32 %v3703_v48, %v3711_v58 }
0x1608   :  { %v3713_v45 = vmul.f32 %v3712_v53, %v3712_v53 }
0x160a   :  { %v3714_v60 = vsel %vm3707_vm1, %v3713_v45, 0.0 }
0x160b   :  { %3715 = vadd.xlane.f32.xlu0 %v3714_v60  ;;  %v3737_v20 = vpop.xlane.xlu1 %3736 }
0x160c   :  { %v3738_v13 = vmul.f32 0.03125, %v3737_v20 }
0x160d   :  { %v3688_v43 = vpop.f32.mrb[148].mxu1 }
0x160e   :  { %v4559_v52 = vpop.f32.mrb[149].mxu1  ;;  %v3739_v16 = vsub.f32 %v3704_v29, %v3738_v13 }
0x160f   :  { %v3690_v22 = vpop.f32.mrb[150].mxu1 }
0x1610   :  { %v4560_v21 = vpop.f32.mrb[151].mxu1  ;;  %v3740_v28 = vmul.f32 %v3739_v16, %v3739_v16 }
0x1612   :  { %v3741_v41 = vsel %vm3734_vm2, %v3740_v28, 0.0 }
0x1613   :  { %3742 = vadd.xlane.f32.xlu1 %v3741_v41 }
0x1698   :  { %v3716_v55 = vpop.xlane.xlu0 %3715 }
0x1699   :  { %v3717_v10 = vmul.f32 0.03125, %v3716_v55 }
0x169b   :  { %v3718_v23 = vadd.f32 1e-05, %v3717_v10 }
0x169d   :  { %4868 = vrsqrt.f32 %v3718_v23 }
0x16a0   :  { %v3743_v38 = vpop.xlane.xlu1 %3742 }
0x16a1   :  { %v3744_v35 = vmul.f32 0.03125, %v3743_v38 }
0x16a3   :  { %v3745_v14 = vadd.f32 1e-05, %v3744_v35 }
0x16a5   :  { %4870 = vrsqrt.f32 %v3745_v14 }
0x16a7   :  { %v4869_v42 = vpop.eup %4868 }
0x16a8   :  { %v3720_v26 = vmul.f32 %v4869_v42, %v3712_v53 }
0x16aa   :  { %v3721_v3 = vmul.f32 %v3720_v26, %v3705_v49 }
0x16ac   :  { %v3722_v30 = vadd.f32 %v3721_v3, %v3706_v44 }
0x16ae   :  { %v3724_v62 = vmul.f32 %v3723_v15, %v3722_v30 }
0x16af   :  { %v4871_v5 = vpop.eup %4870 }
0x16b0   :  { %v3725_v59 = vsel %vm3707_vm1, %v3724_v62, 0.0  ;;  %v3747_v8 = vmul.f32 %v4871_v5, %v3739_v16 }
0x16b1   :  { %3726 = vadd.xlane.f32.xlu0 %v3725_v59 }
0x16b2   :  { %v3754_v4 = vmul.f32 %v3993_v61, %v3747_v8 }
0x16b4   :  { %v3761_v54 = vadd.f32 %v3994_v12, %v3754_v4 }
0x16b6   :  { %v3769_v33 = vmul.f32 %v3995_v0, %v3761_v54 }
0x16b8   :  { %v3770_v6 = vsel %vm3734_vm2, %v3769_v33, 0.0 }
0x16b9   :  { %3771 = vadd.xlane.f32.xlu1 %v3770_v6 }
0x173e   :  { %v3727_v7 = vpop.xlane.xlu0 %3726 }
0x173f   :  { %v3729_v31 = vadd.f32 %v3728_v46, %v3727_v7 }
0x1741   :  { %3731 = vst.msk [vmem:[%s6657_s22] sm:$0x1] %vm3730_vm3, %v3729_v31 }
0x1746   :  { %v3772_v56 = vpop.xlane.xlu1 %3771 }
0x1747   :  { %v3780_v36 = vadd.f32 %v3996_v47, %v3772_v56 }
0x1749   :  { %3782 = vst.msk [vmem:[%s6657_s22] sm:$0x2] %vm3781_vm4, %v3780_v36 }

</bundles_post_ra>
